<compile_context>
chip_gen: v7x
topology: tpu7x:2x2x1
jax: 0.10.0
libtpu: 0.0.40
codegen_flags: <defaults>
</compile_context>

<pallas_src>
import functools

import jax
import jax.numpy as jnp
from jax import lax
from jax.experimental import pallas as pl
from jax.experimental.pallas import tpu as pltpu


# --------------------------------------------------------------------------
# Fused kernel: query BiGRU + answer BiGRU + score + log_softmax + CE loss.
# --------------------------------------------------------------------------
def _nocontext_kernel(
    q_x_ref, a_x_ref, q_len_ref, a_len_ref, gold_ref,
    q_wih_ref, q_whh_ref, q_bih_ref, q_bhh_ref,
    a_wih_ref, a_whh_ref, a_bih_ref, a_bhh_ref,
    logp_ref, loss_ref,
    *, Lq, Lc, Bq, Ba, H, n_real):
  """q_x: (Lq*Bq, E); a_x: (Lc*Ba, E); rows are timestep-major (row = t*B + b).

  w_ih: (E, 6H)  columns = [fwd_r fwd_z fwd_n bwd_r bwd_z bwd_n], b_ih: (1, 6H)
  w_hh: (2, 3, H, H) per (direction, gate),          b_hh: (2, 3, 1, H)
  lens: (B, 1) int32 (padded batch rows have length 0 -> hidden stays 0).
  gold: (1,) int32 in SMEM = unsort[gold]  (index in *sorted* candidate order).
  Outputs: logp (1, Ba) lane-dense log_softmax (sorted order), loss (1, 1).
  """

  def bigru(x_ref, len_ref, wih_ref, whh_ref, bih_ref, bhh_ref, L, B):
    x = x_ref[...]                                   # (L*B, E) f32
    lens = len_ref[...]                              # (B, 1) int32

    # ---- hoisted input projections: ONE well-shaped bf16 MXU matmul for all
    #      timesteps, both directions and all gates; f32 accumulate.
    gi_all = lax.dot_general(
        x.astype(jnp.bfloat16), wih_ref[...].astype(jnp.bfloat16),
        (((1,), (0,)), ((), ())),
        preferred_element_type=jnp.float32) + bih_ref[...]      # (L*B, 6H) f32

    # ---- hoisted padding masks (one compare per timestep, shared by both
    #      directions).  Emulates pack_padded_sequence; relies on zero init h.
    masks = [lens > t for t in range(L)]             # list of (B, 1) bool

    def run_direction(d, reverse):
      base = 3 * H * d
      # per-gate slices of the hoisted projection — loop invariant, so any
      # lane relayout happens once, outside the recurrence.
      gi_r = gi_all[:, base:base + H]
      gi_z = gi_all[:, base + H:base + 2 * H]
      gi_n = gi_all[:, base + 2 * H:base + 3 * H]
      # per-gate recurrent weights: every gate value starts at lane 0.
      w_r = whh_ref[d, 0]; w_z = whh_ref[d, 1]; w_n = whh_ref[d, 2]
      b_r = bhh_ref[d, 0]; b_z = bhh_ref[d, 1]; b_n = bhh_ref[d, 2]

      h = jnp.zeros((B, H), jnp.float32)
      steps = range(L - 1, -1, -1) if reverse else range(L)
      # TODO(synk): switch to lax.fori_loop(..., unroll=True) for long L to
      # bound vreg live ranges; at L=8 a static unroll is cheaper and simpler.
      for t in steps:
        lo = t * B                                   # B % 8 == 0 -> aligned
        hr = lax.dot_general(h, w_r, (((1,), (0,)), ((), ())),
                             preferred_element_type=jnp.float32) + b_r
        hz = lax.dot_general(h, w_z, (((1,), (0,)), ((), ())),
                             preferred_element_type=jnp.float32) + b_z
        hn = lax.dot_general(h, w_n, (((1,), (0,)), ((), ())),
                             preferred_element_type=jnp.float32) + b_n
        r = jax.nn.sigmoid(gi_r[lo:lo + B] + hr)
        z = jax.nn.sigmoid(gi_z[lo:lo + B] + hz)
        n = jnp.tanh(gi_n[lo:lo + B] + r * hn)
        h_new = (1.0 - z) * n + z * h
        h = jnp.where(masks[t], h_new, h)            # freeze on padded steps
      return h

    return run_direction(0, reverse=False), run_direction(1, reverse=True)

  # TODO(synk): on v7x the two encoders below could be split across the two
  # TensorCores (core_map / CMEM); kept single-core here to preserve fusion.
  q_fwd, q_bwd = bigru(q_x_ref, q_len_ref, q_wih_ref, q_whh_ref,
                       q_bih_ref, q_bhh_ref, Lq, Bq)
  a_fwd, a_bwd = bigru(a_x_ref, a_len_ref, a_wih_ref, a_whh_ref,
                       a_bih_ref, a_bhh_ref, Lc, Ba)

  qf = q_fwd[0:1, :]     # the real query occupies batch row 0
  qb = q_bwd[0:1, :]

  # Lane-dense scores: answer_hidden @ query_hidden^T, transposed to (1, Ba):
  #   [a_fwd | a_bwd] @ [q_fwd | q_bwd]^T == q_fwd @ a_fwd^T + q_bwd @ a_bwd^T
  scores = (lax.dot_general(qf, a_fwd, (((1,), (1,)), ((), ())),
                            preferred_element_type=jnp.float32) +
            lax.dot_general(qb, a_bwd, (((1,), (1,)), ((), ())),
                            preferred_element_type=jnp.float32))    # (1, Ba)

  col = lax.broadcasted_iota(jnp.int32, scores.shape, 1)
  scores = jnp.where(col < n_real, scores, jnp.float32(-1e30))      # mask pads

  # log_softmax over the candidate (lane) axis.
  m = jnp.max(scores, axis=1, keepdims=True)
  lse = m + jnp.log(jnp.sum(jnp.exp(scores - m), axis=1, keepdims=True))
  logp = scores - lse
  logp_ref[...] = logp

  # CrossEntropy with a batch of one: -logp at the gold (sorted-order) index.
  gold = gold_ref[0]
  picked = jnp.where(col == gold, logp, jnp.float32(0.0))
  loss_ref[...] = -jnp.sum(picked, axis=1, keepdims=True)           # (1, 1)


# --------------------------------------------------------------------------
# Parameter construction (deterministic, synthetic).
# --------------------------------------------------------------------------
def init_gru_params(key, embed_size, hidden_size):
  k1, k2, k3, k4 = jax.random.split(key, 4)
  s = 1.0 / (float(hidden_size) ** 0.5)
  return {
      # input projection packed for one hoisted matmul: (E, 6H)
      "w_ih": jax.random.uniform(k1, (embed_size, 6 * hidden_size),
                                 jnp.float32, -s, s),
      "b_ih": jax.random.uniform(k3, (1, 6 * hidden_size), jnp.float32, -s, s),
      # recurrent weights per (direction, gate) so gates are lane-0 aligned
      "w_hh": jax.random.uniform(k2, (2, 3, hidden_size, hidden_size),
                                 jnp.float32, -s, s),
      "b_hh": jax.random.uniform(k4, (2, 3, 1, hidden_size),
                                 jnp.float32, -s, s),
  }


_VMEM = pl.BlockSpec(memory_space=pltpu.MemorySpace.VMEM)
_SMEM = pl.BlockSpec(memory_space=pltpu.MemorySpace.SMEM)
_SUB = 8  # sublane multiple used to pad the batch dimension


# --------------------------------------------------------------------------
# NoContext.forward
# --------------------------------------------------------------------------
def nocontext_forward(params,
                      batch_query, batch_query_length,
                      batch_candidate, batch_candidate_lengths,
                      batch_candidate_unsort, gold_answer_index):
  emb = params["embedding"]
  enc = params["encoder"]
  aenc = params["answer_encoder"]
  H = enc["w_hh"].shape[-1]

  # ----- query: pad the batch dim to 8 (real query in row 0), t-major rows
  Lq = batch_query.shape[0]
  q_tok = jnp.zeros((Lq, _SUB), batch_query.dtype).at[:, 0].set(batch_query)
  q_x = emb[q_tok.reshape(-1)]                                   # (Lq*8, E)
  q_len = jnp.zeros((_SUB, 1), jnp.int32).at[0, 0].set(
      jnp.asarray(batch_query_length, jnp.int32).reshape(-1)[0])

  # ----- candidates: pad N -> multiple of 8, transpose to t-major rows
  N, Lc = batch_candidate.shape
  Npad = -(-N // _SUB) * _SUB
  c_tok = jnp.zeros((Npad, Lc), batch_candidate.dtype).at[:N].set(batch_candidate)
  a_x = emb[jnp.transpose(c_tok).reshape(-1)]                    # (Lc*Npad, E)
  a_len = jnp.zeros((Npad, 1), jnp.int32).at[:N, 0].set(
      jnp.asarray(batch_candidate_lengths, jnp.int32))

  # CE picks logp_sorted[unsort[gold]]  (log_softmax commutes with permutation)
  unsort = jnp.asarray(batch_candidate_unsort, jnp.int32)
  gold = jnp.asarray(gold_answer_index, jnp.int32).reshape(())
  gold_sorted = unsort[gold].reshape(1)

  kernel = functools.partial(_nocontext_kernel, Lq=Lq, Lc=Lc,
                             Bq=_SUB, Ba=Npad, H=H, n_real=N)
  logp_pad, loss = pl.pallas_call(
      kernel,
      out_shape=(jax.ShapeDtypeStruct((1, Npad), jnp.float32),
                 jax.ShapeDtypeStruct((1, 1), jnp.float32)),
      in_specs=[_VMEM, _VMEM, _VMEM, _VMEM, _SMEM,
                _VMEM, _VMEM, _VMEM, _VMEM,
                _VMEM, _VMEM, _VMEM, _VMEM],
      out_specs=(_VMEM, _VMEM),
  )(q_x, a_x, q_len, a_len, gold_sorted,
    enc["w_ih"], enc["w_hh"], enc["b_ih"], enc["b_hh"],
    aenc["w_ih"], aenc["w_hh"], aenc["b_ih"], aenc["b_hh"])

  # unsort (row permutation) + torch.sort(..., descending=True) indices (glue)
  logp_unsort = logp_pad[0, :N][unsort]                          # (N,)
  indices = jnp.argsort(-logp_unsort)[:, None]                   # (N, 1)
  return loss[0, 0], indices


# TODO(synk): multi-layer stacked GRU (args.num_layers > 1) and inter-layer
# dropout are not implemented; this models num_layers=1 (dropout is a no-op).
# TODO(synk): at realistic vocab/E, fold the embedding gather into the kernel
# via PrefetchScalarGridSpec, and add a BlockSpec grid over B/L with tiles
# re-derived for v7x's 64 MiB VMEM instead of whole-array residency.

if __name__ == "__main__":
  key = jax.random.PRNGKey(0)
  ks = jax.random.split(key, 8)

  vocab_size, embed_size, hidden_size = 50, 32, 32
  Lq, Lc, N = 8, 8, 6

  params = {
      "embedding": 0.1 * jax.random.normal(ks[0], (vocab_size, embed_size),
                                           jnp.float32),
      "encoder": init_gru_params(ks[1], embed_size, hidden_size),
      "answer_encoder": init_gru_params(ks[2], embed_size, hidden_size),
  }

  batch_query = jax.random.randint(ks[3], (Lq,), 0, vocab_size)
  batch_query_length = jnp.array([Lq], jnp.int32)

  # candidates come pre-sorted by descending length (packing convention)
  cand_lengths = jnp.sort(jax.random.randint(ks[4], (N,), 2, Lc + 1))[::-1]
  batch_candidate = jax.random.randint(ks[5], (N, Lc), 0, vocab_size)
  batch_candidate_unsort = jax.random.permutation(ks[6], N)
  gold_answer_index = jnp.array(2, jnp.int32)

  fwd = jax.jit(nocontext_forward)
  loss, indices = fwd(params, batch_query, batch_query_length,
                      batch_candidate, cand_lengths,
                      batch_candidate_unsort, gold_answer_index)
  jax.block_until_ready((loss, indices))
  assert indices.shape == (N, 1)
  assert bool(jnp.isfinite(loss))
  print("KERNEL_OK")
</pallas_src>

<mosaic_0001>
module attributes {stable_mosaic.version = 11 : i64} {
  func.func @_nocontext_kernel(%arg0: memref<64x32xf32, #tpu.memory_space<vmem>>, %arg1: memref<64x32xf32, #tpu.memory_space<vmem>>, %arg2: memref<8x1xi32, #tpu.memory_space<vmem>>, %arg3: memref<8x1xi32, #tpu.memory_space<vmem>>, %arg4: memref<1xi32, #tpu.memory_space<smem>>, %arg5: memref<32x192xf32, #tpu.memory_space<vmem>>, %arg6: memref<2x3x32x32xf32, #tpu.memory_space<vmem>>, %arg7: memref<1x192xf32, #tpu.memory_space<vmem>>, %arg8: memref<2x3x1x32xf32, #tpu.memory_space<vmem>>, %arg9: memref<32x192xf32, #tpu.memory_space<vmem>>, %arg10: memref<2x3x32x32xf32, #tpu.memory_space<vmem>>, %arg11: memref<1x192xf32, #tpu.memory_space<vmem>>, %arg12: memref<2x3x1x32xf32, #tpu.memory_space<vmem>>, %arg13: memref<1x8xf32, #tpu.memory_space<vmem>>, %arg14: memref<1x1xf32, #tpu.memory_space<vmem>>) attributes {dimension_semantics = [], scalar_prefetch = 0 : i64, scratch_operands = 0 : i64, tpu.core_type = #tpu.core_type<tc>} {
    %c0 = arith.constant 0 : index
    %c0_0 = arith.constant 0 : index
    %0 = vector.load %arg0[%c0, %c0_0] : memref<64x32xf32, #tpu.memory_space<vmem>>, vector<64x32xf32>
    %c0_1 = arith.constant 0 : index
    %c0_2 = arith.constant 0 : index
    %1 = vector.load %arg2[%c0_1, %c0_2] : memref<8x1xi32, #tpu.memory_space<vmem>>, vector<8x1xi32>
    %2 = arith.truncf %0 : vector<64x32xf32> to vector<64x32xbf16>
    %c0_3 = arith.constant 0 : index
    %c0_4 = arith.constant 0 : index
    %3 = vector.load %arg5[%c0_3, %c0_4] : memref<32x192xf32, #tpu.memory_space<vmem>>, vector<32x192xf32>
    %4 = arith.truncf %3 : vector<32x192xf32> to vector<32x192xbf16>
    %cst = arith.constant dense<0.000000e+00> : vector<64x192xf32>
    %5 = tpu.matmul %2, %4, %cst {dimension_numbers = #tpu.dot_dimension_numbers<[1], [0], [0], [1], [0, 0, 1, 1], [], []>} : vector<64x32xbf16>, vector<32x192xbf16>, vector<64x192xf32> -> vector<64x192xf32>
    %c0_5 = arith.constant 0 : index
    %c0_6 = arith.constant 0 : index
    %6 = vector.load %arg7[%c0_5, %c0_6] : memref<1x192xf32, #tpu.memory_space<vmem>>, vector<1x192xf32>
    %7 = vector.broadcast %6 : vector<1x192xf32> to vector<64x192xf32>
    %8 = arith.addf %5, %7 : vector<64x192xf32>
    %c0_i32 = arith.constant 0 : i32
    %9 = vector.broadcast %c0_i32 : i32 to vector<8x1xi32>
    %10 = arith.cmpi sgt, %1, %9 : vector<8x1xi32>
    %c1_i32 = arith.constant 1 : i32
    %11 = vector.broadcast %c1_i32 : i32 to vector<8x1xi32>
    %12 = arith.cmpi sgt, %1, %11 : vector<8x1xi32>
    %c2_i32 = arith.constant 2 : i32
    %13 = vector.broadcast %c2_i32 : i32 to vector<8x1xi32>
    %14 = arith.cmpi sgt, %1, %13 : vector<8x1xi32>
    %c3_i32 = arith.constant 3 : i32
    %15 = vector.broadcast %c3_i32 : i32 to vector<8x1xi32>
    %16 = arith.cmpi sgt, %1, %15 : vector<8x1xi32>
    %c4_i32 = arith.constant 4 : i32
    %17 = vector.broadcast %c4_i32 : i32 to vector<8x1xi32>
    %18 = arith.cmpi sgt, %1, %17 : vector<8x1xi32>
    %c5_i32 = arith.constant 5 : i32
    %19 = vector.broadcast %c5_i32 : i32 to vector<8x1xi32>
    %20 = arith.cmpi sgt, %1, %19 : vector<8x1xi32>
    %c6_i32 = arith.constant 6 : i32
    %21 = vector.broadcast %c6_i32 : i32 to vector<8x1xi32>
    %22 = arith.cmpi sgt, %1, %21 : vector<8x1xi32>
    %c7_i32 = arith.constant 7 : i32
    %23 = vector.broadcast %c7_i32 : i32 to vector<8x1xi32>
    %24 = arith.cmpi sgt, %1, %23 : vector<8x1xi32>
    %25 = vector.extract_strided_slice %8 {offsets = [0, 0], sizes = [64, 32], strides = [1, 1]} : vector<64x192xf32> to vector<64x32xf32>
    %26 = vector.extract_strided_slice %8 {offsets = [0, 32], sizes = [64, 32], strides = [1, 1]} : vector<64x192xf32> to vector<64x32xf32>
    %27 = vector.extract_strided_slice %8 {offsets = [0, 64], sizes = [64, 32], strides = [1, 1]} : vector<64x192xf32> to vector<64x32xf32>
    %c0_7 = arith.constant 0 : index
    %c0_8 = arith.constant 0 : index
    %c0_9 = arith.constant 0 : index
    %c0_10 = arith.constant 0 : index
    %28 = vector.load %arg6[%c0_7, %c0_8, %c0_9, %c0_10] : memref<2x3x32x32xf32, #tpu.memory_space<vmem>>, vector<1x1x32x32xf32>
    %29 = vector.shape_cast %28 : vector<1x1x32x32xf32> to vector<32x32xf32>
    %c0_11 = arith.constant 0 : index
    %c1 = arith.constant 1 : index
    %c0_12 = arith.constant 0 : index
    %c0_13 = arith.constant 0 : index
    %30 = vector.load %arg6[%c0_11, %c1, %c0_12, %c0_13] : memref<2x3x32x32xf32, #tpu.memory_space<vmem>>, vector<1x1x32x32xf32>
    %31 = vector.shape_cast %30 : vector<1x1x32x32xf32> to vector<32x32xf32>
    %c0_14 = arith.constant 0 : index
    %c2 = arith.constant 2 : index
    %c0_15 = arith.constant 0 : index
    %c0_16 = arith.constant 0 : index
    %32 = vector.load %arg6[%c0_14, %c2, %c0_15, %c0_16] : memref<2x3x32x32xf32, #tpu.memory_space<vmem>>, vector<1x1x32x32xf32>
    %33 = vector.shape_cast %32 : vector<1x1x32x32xf32> to vector<32x32xf32>
    %c0_17 = arith.constant 0 : index
    %c0_18 = arith.constant 0 : index
    %c0_19 = arith.constant 0 : index
    %c0_20 = arith.constant 0 : index
    %34 = vector.load %arg8[%c0_17, %c0_18, %c0_19, %c0_20] : memref<2x3x1x32xf32, #tpu.memory_space<vmem>>, vector<1x1x1x32xf32>
    %35 = vector.shape_cast %34 : vector<1x1x1x32xf32> to vector<1x32xf32>
    %c0_21 = arith.constant 0 : index
    %c1_22 = arith.constant 1 : index
    %c0_23 = arith.constant 0 : index
    %c0_24 = arith.constant 0 : index
    %36 = vector.load %arg8[%c0_21, %c1_22, %c0_23, %c0_24] : memref<2x3x1x32xf32, #tpu.memory_space<vmem>>, vector<1x1x1x32xf32>
    %37 = vector.shape_cast %36 : vector<1x1x1x32xf32> to vector<1x32xf32>
    %c0_25 = arith.constant 0 : index
    %c2_26 = arith.constant 2 : index
    %c0_27 = arith.constant 0 : index
    %c0_28 = arith.constant 0 : index
    %38 = vector.load %arg8[%c0_25, %c2_26, %c0_27, %c0_28] : memref<2x3x1x32xf32, #tpu.memory_space<vmem>>, vector<1x1x1x32xf32>
    %39 = vector.shape_cast %38 : vector<1x1x1x32xf32> to vector<1x32xf32>
    %cst_29 = arith.constant 0.000000e+00 : f32
    %40 = vector.broadcast %cst_29 : f32 to vector<8x32xf32>
    %cst_30 = arith.constant dense<0.000000e+00> : vector<8x32xf32>
    %41 = tpu.matmul %40, %29, %cst_30 {dimension_numbers = #tpu.dot_dimension_numbers<[1], [0], [0], [1], [0, 0, 1, 1], [], []>} : vector<8x32xf32>, vector<32x32xf32>, vector<8x32xf32> -> vector<8x32xf32>
    %42 = vector.broadcast %35 : vector<1x32xf32> to vector<8x32xf32>
    %43 = arith.addf %41, %42 : vector<8x32xf32>
    %cst_31 = arith.constant dense<0.000000e+00> : vector<8x32xf32>
    %44 = tpu.matmul %40, %31, %cst_31 {dimension_numbers = #tpu.dot_dimension_numbers<[1], [0], [0], [1], [0, 0, 1, 1], [], []>} : vector<8x32xf32>, vector<32x32xf32>, vector<8x32xf32> -> vector<8x32xf32>
    %45 = vector.broadcast %37 : vector<1x32xf32> to vector<8x32xf32>
    %46 = arith.addf %44, %45 : vector<8x32xf32>
    %cst_32 = arith.constant dense<0.000000e+00> : vector<8x32xf32>
    %47 = tpu.matmul %40, %33, %cst_32 {dimension_numbers = #tpu.dot_dimension_numbers<[1], [0], [0], [1], [0, 0, 1, 1], [], []>} : vector<8x32xf32>, vector<32x32xf32>, vector<8x32xf32> -> vector<8x32xf32>
    %48 = vector.broadcast %39 : vector<1x32xf32> to vector<8x32xf32>
    %49 = arith.addf %47, %48 : vector<8x32xf32>
    %50 = vector.extract_strided_slice %25 {offsets = [0, 0], sizes = [8, 32], strides = [1, 1]} : vector<64x32xf32> to vector<8x32xf32>
    %51 = arith.addf %50, %43 : vector<8x32xf32>
    %52 = arith.negf %51 : vector<8x32xf32>
    %53 = math.exp %52 : vector<8x32xf32>
    %cst_33 = arith.constant 1.000000e+00 : f32
    %54 = vector.broadcast %cst_33 : f32 to vector<8x32xf32>
    %55 = arith.addf %54, %53 : vector<8x32xf32>
    %56 = arith.divf %54, %55 : vector<8x32xf32>
    %57 = vector.extract_strided_slice %26 {offsets = [0, 0], sizes = [8, 32], strides = [1, 1]} : vector<64x32xf32> to vector<8x32xf32>
    %58 = arith.addf %57, %46 : vector<8x32xf32>
    %59 = arith.negf %58 : vector<8x32xf32>
    %60 = math.exp %59 : vector<8x32xf32>
    %cst_34 = arith.constant 1.000000e+00 : f32
    %61 = vector.broadcast %cst_34 : f32 to vector<8x32xf32>
    %62 = arith.addf %61, %60 : vector<8x32xf32>
    %63 = arith.divf %61, %62 : vector<8x32xf32>
    %64 = vector.extract_strided_slice %27 {offsets = [0, 0], sizes = [8, 32], strides = [1, 1]} : vector<64x32xf32> to vector<8x32xf32>
    %65 = arith.mulf %56, %49 : vector<8x32xf32>
    %66 = arith.addf %64, %65 : vector<8x32xf32>
    %67 = math.tanh %66 : vector<8x32xf32>
    %cst_35 = arith.constant 1.000000e+00 : f32
    %68 = vector.broadcast %cst_35 : f32 to vector<8x32xf32>
    %69 = arith.subf %68, %63 : vector<8x32xf32>
    %70 = arith.mulf %69, %67 : vector<8x32xf32>
    %71 = arith.mulf %63, %40 : vector<8x32xf32>
    %72 = arith.addf %70, %71 : vector<8x32xf32>
    %73 = vector.shape_cast %10 : vector<8x1xi1> to vector<8x1xi1>
    %74 = vector.broadcast %73 : vector<8x1xi1> to vector<8x32xi1>
    %75 = arith.select %74, %72, %40 : vector<8x32xi1>, vector<8x32xf32>
    %cst_36 = arith.constant dense<0.000000e+00> : vector<8x32xf32>
    %76 = tpu.matmul %75, %29, %cst_36 {dimension_numbers = #tpu.dot_dimension_numbers<[1], [0], [0], [1], [0, 0, 1, 1], [], []>} : vector<8x32xf32>, vector<32x32xf32>, vector<8x32xf32> -> vector<8x32xf32>
    %77 = vector.broadcast %35 : vector<1x32xf32> to vector<8x32xf32>
    %78 = arith.addf %76, %77 : vector<8x32xf32>
    %cst_37 = arith.constant dense<0.000000e+00> : vector<8x32xf32>
    %79 = tpu.matmul %75, %31, %cst_37 {dimension_numbers = #tpu.dot_dimension_numbers<[1], [0], [0], [1], [0, 0, 1, 1], [], []>} : vector<8x32xf32>, vector<32x32xf32>, vector<8x32xf32> -> vector<8x32xf32>
    %80 = vector.broadcast %37 : vector<1x32xf32> to vector<8x32xf32>
    %81 = arith.addf %79, %80 : vector<8x32xf32>
    %cst_38 = arith.constant dense<0.000000e+00> : vector<8x32xf32>
    %82 = tpu.matmul %75, %33, %cst_38 {dimension_numbers = #tpu.dot_dimension_numbers<[1], [0], [0], [1], [0, 0, 1, 1], [], []>} : vector<8x32xf32>, vector<32x32xf32>, vector<8x32xf32> -> vector<8x32xf32>
    %83 = vector.broadcast %39 : vector<1x32xf32> to vector<8x32xf32>
    %84 = arith.addf %82, %83 : vector<8x32xf32>
    %85 = vector.extract_strided_slice %25 {offsets = [8, 0], sizes = [8, 32], strides = [1, 1]} : vector<64x32xf32> to vector<8x32xf32>
    %86 = arith.addf %85, %78 : vector<8x32xf32>
    %87 = arith.negf %86 : vector<8x32xf32>
    %88 = math.exp %87 : vector<8x32xf32>
    %cst_39 = arith.constant 1.000000e+00 : f32
    %89 = vector.broadcast %cst_39 : f32 to vector<8x32xf32>
    %90 = arith.addf %89, %88 : vector<8x32xf32>
    %91 = arith.divf %89, %90 : vector<8x32xf32>
    %92 = vector.extract_strided_slice %26 {offsets = [8, 0], sizes = [8, 32], strides = [1, 1]} : vector<64x32xf32> to vector<8x32xf32>
    %93 = arith.addf %92, %81 : vector<8x32xf32>
    %94 = arith.negf %93 : vector<8x32xf32>
    %95 = math.exp %94 : vector<8x32xf32>
    %cst_40 = arith.constant 1.000000e+00 : f32
    %96 = vector.broadcast %cst_40 : f32 to vector<8x32xf32>
    %97 = arith.addf %96, %95 : vector<8x32xf32>
    %98 = arith.divf %96, %97 : vector<8x32xf32>
    %99 = vector.extract_strided_slice %27 {offsets = [8, 0], sizes = [8, 32], strides = [1, 1]} : vector<64x32xf32> to vector<8x32xf32>
    %100 = arith.mulf %91, %84 : vector<8x32xf32>
    %101 = arith.addf %99, %100 : vector<8x32xf32>
    %102 = math.tanh %101 : vector<8x32xf32>
    %cst_41 = arith.constant 1.000000e+00 : f32
    %103 = vector.broadcast %cst_41 : f32 to vector<8x32xf32>
    %104 = arith.subf %103, %98 : vector<8x32xf32>
    %105 = arith.mulf %104, %102 : vector<8x32xf32>
    %106 = arith.mulf %98, %75 : vector<8x32xf32>
    %107 = arith.addf %105, %106 : vector<8x32xf32>
    %108 = vector.shape_cast %12 : vector<8x1xi1> to vector<8x1xi1>
    %109 = vector.broadcast %108 : vector<8x1xi1> to vector<8x32xi1>
    %110 = arith.select %109, %107, %75 : vector<8x32xi1>, vector<8x32xf32>
    %cst_42 = arith.constant dense<0.000000e+00> : vector<8x32xf32>
    %111 = tpu.matmul %110, %29, %cst_42 {dimension_numbers = #tpu.dot_dimension_numbers<[1], [0], [0], [1], [0, 0, 1, 1], [], []>} : vector<8x32xf32>, vector<32x32xf32>, vector<8x32xf32> -> vector<8x32xf32>
    %112 = vector.broadcast %35 : vector<1x32xf32> to vector<8x32xf32>
    %113 = arith.addf %111, %112 : vector<8x32xf32>
    %cst_43 = arith.constant dense<0.000000e+00> : vector<8x32xf32>
    %114 = tpu.matmul %110, %31, %cst_43 {dimension_numbers = #tpu.dot_dimension_numbers<[1], [0], [0], [1], [0, 0, 1, 1], [], []>} : vector<8x32xf32>, vector<32x32xf32>, vector<8x32xf32> -> vector<8x32xf32>
    %115 = vector.broadcast %37 : vector<1x32xf32> to vector<8x32xf32>
    %116 = arith.addf %114, %115 : vector<8x32xf32>
    %cst_44 = arith.constant dense<0.000000e+00> : vector<8x32xf32>
    %117 = tpu.matmul %110, %33, %cst_44 {dimension_numbers = #tpu.dot_dimension_numbers<[1], [0], [0], [1], [0, 0, 1, 1], [], []>} : vector<8x32xf32>, vector<32x32xf32>, vector<8x32xf32> -> vector<8x32xf32>
    %118 = vector.broadcast %39 : vector<1x32xf32> to vector<8x32xf32>
    %119 = arith.addf %117, %118 : vector<8x32xf32>
    %120 = vector.extract_strided_slice %25 {offsets = [16, 0], sizes = [8, 32], strides = [1, 1]} : vector<64x32xf32> to vector<8x32xf32>
    %121 = arith.addf %120, %113 : vector<8x32xf32>
    %122 = arith.negf %121 : vector<8x32xf32>
    %123 = math.exp %122 : vector<8x32xf32>
    %cst_45 = arith.constant 1.000000e+00 : f32
    %124 = vector.broadcast %cst_45 : f32 to vector<8x32xf32>
    %125 = arith.addf %124, %123 : vector<8x32xf32>
    %126 = arith.divf %124, %125 : vector<8x32xf32>
    %127 = vector.extract_strided_slice %26 {offsets = [16, 0], sizes = [8, 32], strides = [1, 1]} : vector<64x32xf32> to vector<8x32xf32>
    %128 = arith.addf %127, %116 : vector<8x32xf32>
    %129 = arith.negf %128 : vector<8x32xf32>
    %130 = math.exp %129 : vector<8x32xf32>
    %cst_46 = arith.constant 1.000000e+00 : f32
    %131 = vector.broadcast %cst_46 : f32 to vector<8x32xf32>
    %132 = arith.addf %131, %130 : vector<8x32xf32>
    %133 = arith.divf %131, %132 : vector<8x32xf32>
    %134 = vector.extract_strided_slice %27 {offsets = [16, 0], sizes = [8, 32], strides = [1, 1]} : vector<64x32xf32> to vector<8x32xf32>
    %135 = arith.mulf %126, %119 : vector<8x32xf32>
    %136 = arith.addf %134, %135 : vector<8x32xf32>
    %137 = math.tanh %136 : vector<8x32xf32>
    %cst_47 = arith.constant 1.000000e+00 : f32
    %138 = vector.broadcast %cst_47 : f32 to vector<8x32xf32>
    %139 = arith.subf %138, %133 : vector<8x32xf32>
    %140 = arith.mulf %139, %137 : vector<8x32xf32>
    %141 = arith.mulf %133, %110 : vector<8x32xf32>
    %142 = arith.addf %140, %141 : vector<8x32xf32>
    %143 = vector.shape_cast %14 : vector<8x1xi1> to vector<8x1xi1>
    %144 = vector.broadcast %143 : vector<8x1xi1> to vector<8x32xi1>
    %145 = arith.select %144, %142, %110 : vector<8x32xi1>, vector<8x32xf32>
    %cst_48 = arith.constant dense<0.000000e+00> : vector<8x32xf32>
    %146 = tpu.matmul %145, %29, %cst_48 {dimension_numbers = #tpu.dot_dimension_numbers<[1], [0], [0], [1], [0, 0, 1, 1], [], []>} : vector<8x32xf32>, vector<32x32xf32>, vector<8x32xf32> -> vector<8x32xf32>
    %147 = vector.broadcast %35 : vector<1x32xf32> to vector<8x32xf32>
    %148 = arith.addf %146, %147 : vector<8x32xf32>
    %cst_49 = arith.constant dense<0.000000e+00> : vector<8x32xf32>
    %149 = tpu.matmul %145, %31, %cst_49 {dimension_numbers = #tpu.dot_dimension_numbers<[1], [0], [0], [1], [0, 0, 1, 1], [], []>} : vector<8x32xf32>, vector<32x32xf32>, vector<8x32xf32> -> vector<8x32xf32>
    %150 = vector.broadcast %37 : vector<1x32xf32> to vector<8x32xf32>
    %151 = arith.addf %149, %150 : vector<8x32xf32>
    %cst_50 = arith.constant dense<0.000000e+00> : vector<8x32xf32>
    %152 = tpu.matmul %145, %33, %cst_50 {dimension_numbers = #tpu.dot_dimension_numbers<[1], [0], [0], [1], [0, 0, 1, 1], [], []>} : vector<8x32xf32>, vector<32x32xf32>, vector<8x32xf32> -> vector<8x32xf32>
    %153 = vector.broadcast %39 : vector<1x32xf32> to vector<8x32xf32>
    %154 = arith.addf %152, %153 : vector<8x32xf32>
    %155 = vector.extract_strided_slice %25 {offsets = [24, 0], sizes = [8, 32], strides = [1, 1]} : vector<64x32xf32> to vector<8x32xf32>
    %156 = arith.addf %155, %148 : vector<8x32xf32>
    %157 = arith.negf %156 : vector<8x32xf32>
    %158 = math.exp %157 : vector<8x32xf32>
    %cst_51 = arith.constant 1.000000e+00 : f32
    %159 = vector.broadcast %cst_51 : f32 to vector<8x32xf32>
    %160 = arith.addf %159, %158 : vector<8x32xf32>
    %161 = arith.divf %159, %160 : vector<8x32xf32>
    %162 = vector.extract_strided_slice %26 {offsets = [24, 0], sizes = [8, 32], strides = [1, 1]} : vector<64x32xf32> to vector<8x32xf32>
    %163 = arith.addf %162, %151 : vector<8x32xf32>
    %164 = arith.negf %163 : vector<8x32xf32>
    %165 = math.exp %164 : vector<8x32xf32>
    %cst_52 = arith.constant 1.000000e+00 : f32
    %166 = vector.broadcast %cst_52 : f32 to vector<8x32xf32>
    %167 = arith.addf %166, %165 : vector<8x32xf32>
    %168 = arith.divf %166, %167 : vector<8x32xf32>
    %169 = vector.extract_strided_slice %27 {offsets = [24, 0], sizes = [8, 32], strides = [1, 1]} : vector<64x32xf32> to vector<8x32xf32>
    %170 = arith.mulf %161, %154 : vector<8x32xf32>
    %171 = arith.addf %169, %170 : vector<8x32xf32>
    %172 = math.tanh %171 : vector<8x32xf32>
    %cst_53 = arith.constant 1.000000e+00 : f32
    %173 = vector.broadcast %cst_53 : f32 to vector<8x32xf32>
    %174 = arith.subf %173, %168 : vector<8x32xf32>
    %175 = arith.mulf %174, %172 : vector<8x32xf32>
    %176 = arith.mulf %168, %145 : vector<8x32xf32>
    %177 = arith.addf %175, %176 : vector<8x32xf32>
    %178 = vector.shape_cast %16 : vector<8x1xi1> to vector<8x1xi1>
    %179 = vector.broadcast %178 : vector<8x1xi1> to vector<8x32xi1>
    %180 = arith.select %179, %177, %145 : vector<8x32xi1>, vector<8x32xf32>
    %cst_54 = arith.constant dense<0.000000e+00> : vector<8x32xf32>
    %181 = tpu.matmul %180, %29, %cst_54 {dimension_numbers = #tpu.dot_dimension_numbers<[1], [0], [0], [1], [0, 0, 1, 1], [], []>} : vector<8x32xf32>, vector<32x32xf32>, vector<8x32xf32> -> vector<8x32xf32>
    %182 = vector.broadcast %35 : vector<1x32xf32> to vector<8x32xf32>
    %183 = arith.addf %181, %182 : vector<8x32xf32>
    %cst_55 = arith.constant dense<0.000000e+00> : vector<8x32xf32>
    %184 = tpu.matmul %180, %31, %cst_55 {dimension_numbers = #tpu.dot_dimension_numbers<[1], [0], [0], [1], [0, 0, 1, 1], [], []>} : vector<8x32xf32>, vector<32x32xf32>, vector<8x32xf32> -> vector<8x32xf32>
    %185 = vector.broadcast %37 : vector<1x32xf32> to vector<8x32xf32>
    %186 = arith.addf %184, %185 : vector<8x32xf32>
    %cst_56 = arith.constant dense<0.000000e+00> : vector<8x32xf32>
    %187 = tpu.matmul %180, %33, %cst_56 {dimension_numbers = #tpu.dot_dimension_numbers<[1], [0], [0], [1], [0, 0, 1, 1], [], []>} : vector<8x32xf32>, vector<32x32xf32>, vector<8x32xf32> -> vector<8x32xf32>
    %188 = vector.broadcast %39 : vector<1x32xf32> to vector<8x32xf32>
    %189 = arith.addf %187, %188 : vector<8x32xf32>
    %190 = vector.extract_strided_slice %25 {offsets = [32, 0], sizes = [8, 32], strides = [1, 1]} : vector<64x32xf32> to vector<8x32xf32>
    %191 = arith.addf %190, %183 : vector<8x32xf32>
    %192 = arith.negf %191 : vector<8x32xf32>
    %193 = math.exp %192 : vector<8x32xf32>
    %cst_57 = arith.constant 1.000000e+00 : f32
    %194 = vector.broadcast %cst_57 : f32 to vector<8x32xf32>
    %195 = arith.addf %194, %193 : vector<8x32xf32>
    %196 = arith.divf %194, %195 : vector<8x32xf32>
    %197 = vector.extract_strided_slice %26 {offsets = [32, 0], sizes = [8, 32], strides = [1, 1]} : vector<64x32xf32> to vector<8x32xf32>
    %198 = arith.addf %197, %186 : vector<8x32xf32>
    %199 = arith.negf %198 : vector<8x32xf32>
    %200 = math.exp %199 : vector<8x32xf32>
    %cst_58 = arith.constant 1.000000e+00 : f32
    %201 = vector.broadcast %cst_58 : f32 to vector<8x32xf32>
    %202 = arith.addf %201, %200 : vector<8x32xf32>
    %203 = arith.divf %201, %202 : vector<8x32xf32>
    %204 = vector.extract_strided_slice %27 {offsets = [32, 0], sizes = [8, 32], strides = [1, 1]} : vector<64x32xf32> to vector<8x32xf32>
    %205 = arith.mulf %196, %189 : vector<8x32xf32>
    %206 = arith.addf %204, %205 : vector<8x32xf32>
    %207 = math.tanh %206 : vector<8x32xf32>
    %cst_59 = arith.constant 1.000000e+00 : f32
    %208 = vector.broadcast %cst_59 : f32 to vector<8x32xf32>
    %209 = arith.subf %208, %203 : vector<8x32xf32>
    %210 = arith.mulf %209, %207 : vector<8x32xf32>
    %211 = arith.mulf %203, %180 : vector<8x32xf32>
    %212 = arith.addf %210, %211 : vector<8x32xf32>
    %213 = vector.shape_cast %18 : vector<8x1xi1> to vector<8x1xi1>
    %214 = vector.broadcast %213 : vector<8x1xi1> to vector<8x32xi1>
    %215 = arith.select %214, %212, %180 : vector<8x32xi1>, vector<8x32xf32>
    %cst_60 = arith.constant dense<0.000000e+00> : vector<8x32xf32>
    %216 = tpu.matmul %215, %29, %cst_60 {dimension_numbers = #tpu.dot_dimension_numbers<[1], [0], [0], [1], [0, 0, 1, 1], [], []>} : vector<8x32xf32>, vector<32x32xf32>, vector<8x32xf32> -> vector<8x32xf32>
    %217 = vector.broadcast %35 : vector<1x32xf32> to vector<8x32xf32>
    %218 = arith.addf %216, %217 : vector<8x32xf32>
    %cst_61 = arith.constant dense<0.000000e+00> : vector<8x32xf32>
    %219 = tpu.matmul %215, %31, %cst_61 {dimension_numbers = #tpu.dot_dimension_numbers<[1], [0], [0], [1], [0, 0, 1, 1], [], []>} : vector<8x32xf32>, vector<32x32xf32>, vector<8x32xf32> -> vector<8x32xf32>
    %220 = vector.broadcast %37 : vector<1x32xf32> to vector<8x32xf32>
    %221 = arith.addf %219, %220 : vector<8x32xf32>
    %cst_62 = arith.constant dense<0.000000e+00> : vector<8x32xf32>
    %222 = tpu.matmul %215, %33, %cst_62 {dimension_numbers = #tpu.dot_dimension_numbers<[1], [0], [0], [1], [0, 0, 1, 1], [], []>} : vector<8x32xf32>, vector<32x32xf32>, vector<8x32xf32> -> vector<8x32xf32>
    %223 = vector.broadcast %39 : vector<1x32xf32> to vector<8x32xf32>
    %224 = arith.addf %222, %223 : vector<8x32xf32>
    %225 = vector.extract_strided_slice %25 {offsets = [40, 0], sizes = [8, 32], strides = [1, 1]} : vector<64x32xf32> to vector<8x32xf32>
    %226 = arith.addf %225, %218 : vector<8x32xf32>
    %227 = arith.negf %226 : vector<8x32xf32>
    %228 = math.exp %227 : vector<8x32xf32>
    %cst_63 = arith.constant 1.000000e+00 : f32
    %229 = vector.broadcast %cst_63 : f32 to vector<8x32xf32>
    %230 = arith.addf %229, %228 : vector<8x32xf32>
    %231 = arith.divf %229, %230 : vector<8x32xf32>
    %232 = vector.extract_strided_slice %26 {offsets = [40, 0], sizes = [8, 32], strides = [1, 1]} : vector<64x32xf32> to vector<8x32xf32>
    %233 = arith.addf %232, %221 : vector<8x32xf32>
    %234 = arith.negf %233 : vector<8x32xf32>
    %235 = math.exp %234 : vector<8x32xf32>
    %cst_64 = arith.constant 1.000000e+00 : f32
    %236 = vector.broadcast %cst_64 : f32 to vector<8x32xf32>
    %237 = arith.addf %236, %235 : vector<8x32xf32>
    %238 = arith.divf %236, %237 : vector<8x32xf32>
    %239 = vector.extract_strided_slice %27 {offsets = [40, 0], sizes = [8, 32], strides = [1, 1]} : vector<64x32xf32> to vector<8x32xf32>
    %240 = arith.mulf %231, %224 : vector<8x32xf32>
    %241 = arith.addf %239, %240 : vector<8x32xf32>
    %242 = math.tanh %241 : vector<8x32xf32>
    %cst_65 = arith.constant 1.000000e+00 : f32
    %243 = vector.broadcast %cst_65 : f32 to vector<8x32xf32>
    %244 = arith.subf %243, %238 : vector<8x32xf32>
    %245 = arith.mulf %244, %242 : vector<8x32xf32>
    %246 = arith.mulf %238, %215 : vector<8x32xf32>
    %247 = arith.addf %245, %246 : vector<8x32xf32>
    %248 = vector.shape_cast %20 : vector<8x1xi1> to vector<8x1xi1>
    %249 = vector.broadcast %248 : vector<8x1xi1> to vector<8x32xi1>
    %250 = arith.select %249, %247, %215 : vector<8x32xi1>, vector<8x32xf32>
    %cst_66 = arith.constant dense<0.000000e+00> : vector<8x32xf32>
    %251 = tpu.matmul %250, %29, %cst_66 {dimension_numbers = #tpu.dot_dimension_numbers<[1], [0], [0], [1], [0, 0, 1, 1], [], []>} : vector<8x32xf32>, vector<32x32xf32>, vector<8x32xf32> -> vector<8x32xf32>
    %252 = vector.broadcast %35 : vector<1x32xf32> to vector<8x32xf32>
    %253 = arith.addf %251, %252 : vector<8x32xf32>
    %cst_67 = arith.constant dense<0.000000e+00> : vector<8x32xf32>
    %254 = tpu.matmul %250, %31, %cst_67 {dimension_numbers = #tpu.dot_dimension_numbers<[1], [0], [0], [1], [0, 0, 1, 1], [], []>} : vector<8x32xf32>, vector<32x32xf32>, vector<8x32xf32> -> vector<8x32xf32>
    %255 = vector.broadcast %37 : vector<1x32xf32> to vector<8x32xf32>
    %256 = arith.addf %254, %255 : vector<8x32xf32>
    %cst_68 = arith.constant dense<0.000000e+00> : vector<8x32xf32>
    %257 = tpu.matmul %250, %33, %cst_68 {dimension_numbers = #tpu.dot_dimension_numbers<[1], [0], [0], [1], [0, 0, 1, 1], [], []>} : vector<8x32xf32>, vector<32x32xf32>, vector<8x32xf32> -> vector<8x32xf32>
    %258 = vector.broadcast %39 : vector<1x32xf32> to vector<8x32xf32>
    %259 = arith.addf %257, %258 : vector<8x32xf32>
    %260 = vector.extract_strided_slice %25 {offsets = [48, 0], sizes = [8, 32], strides = [1, 1]} : vector<64x32xf32> to vector<8x32xf32>
    %261 = arith.addf %260, %253 : vector<8x32xf32>
    %262 = arith.negf %261 : vector<8x32xf32>
    %263 = math.exp %262 : vector<8x32xf32>
    %cst_69 = arith.constant 1.000000e+00 : f32
    %264 = vector.broadcast %cst_69 : f32 to vector<8x32xf32>
    %265 = arith.addf %264, %263 : vector<8x32xf32>
    %266 = arith.divf %264, %265 : vector<8x32xf32>
    %267 = vector.extract_strided_slice %26 {offsets = [48, 0], sizes = [8, 32], strides = [1, 1]} : vector<64x32xf32> to vector<8x32xf32>
    %268 = arith.addf %267, %256 : vector<8x32xf32>
    %269 = arith.negf %268 : vector<8x32xf32>
    %270 = math.exp %269 : vector<8x32xf32>
    %cst_70 = arith.constant 1.000000e+00 : f32
    %271 = vector.broadcast %cst_70 : f32 to vector<8x32xf32>
    %272 = arith.addf %271, %270 : vector<8x32xf32>
    %273 = arith.divf %271, %272 : vector<8x32xf32>
    %274 = vector.extract_strided_slice %27 {offsets = [48, 0], sizes = [8, 32], strides = [1, 1]} : vector<64x32xf32> to vector<8x32xf32>
    %275 = arith.mulf %266, %259 : vector<8x32xf32>
    %276 = arith.addf %274, %275 : vector<8x32xf32>
    %277 = math.tanh %276 : vector<8x32xf32>
    %cst_71 = arith.constant 1.000000e+00 : f32
    %278 = vector.broadcast %cst_71 : f32 to vector<8x32xf32>
    %279 = arith.subf %278, %273 : vector<8x32xf32>
    %280 = arith.mulf %279, %277 : vector<8x32xf32>
    %281 = arith.mulf %273, %250 : vector<8x32xf32>
    %282 = arith.addf %280, %281 : vector<8x32xf32>
    %283 = vector.shape_cast %22 : vector<8x1xi1> to vector<8x1xi1>
    %284 = vector.broadcast %283 : vector<8x1xi1> to vector<8x32xi1>
    %285 = arith.select %284, %282, %250 : vector<8x32xi1>, vector<8x32xf32>
    %cst_72 = arith.constant dense<0.000000e+00> : vector<8x32xf32>
    %286 = tpu.matmul %285, %29, %cst_72 {dimension_numbers = #tpu.dot_dimension_numbers<[1], [0], [0], [1], [0, 0, 1, 1], [], []>} : vector<8x32xf32>, vector<32x32xf32>, vector<8x32xf32> -> vector<8x32xf32>
    %287 = vector.broadcast %35 : vector<1x32xf32> to vector<8x32xf32>
    %288 = arith.addf %286, %287 : vector<8x32xf32>
    %cst_73 = arith.constant dense<0.000000e+00> : vector<8x32xf32>
    %289 = tpu.matmul %285, %31, %cst_73 {dimension_numbers = #tpu.dot_dimension_numbers<[1], [0], [0], [1], [0, 0, 1, 1], [], []>} : vector<8x32xf32>, vector<32x32xf32>, vector<8x32xf32> -> vector<8x32xf32>
    %290 = vector.broadcast %37 : vector<1x32xf32> to vector<8x32xf32>
    %291 = arith.addf %289, %290 : vector<8x32xf32>
    %cst_74 = arith.constant dense<0.000000e+00> : vector<8x32xf32>
    %292 = tpu.matmul %285, %33, %cst_74 {dimension_numbers = #tpu.dot_dimension_numbers<[1], [0], [0], [1], [0, 0, 1, 1], [], []>} : vector<8x32xf32>, vector<32x32xf32>, vector<8x32xf32> -> vector<8x32xf32>
    %293 = vector.broadcast %39 : vector<1x32xf32> to vector<8x32xf32>
    %294 = arith.addf %292, %293 : vector<8x32xf32>
    %295 = vector.extract_strided_slice %25 {offsets = [56, 0], sizes = [8, 32], strides = [1, 1]} : vector<64x32xf32> to vector<8x32xf32>
    %296 = arith.addf %295, %288 : vector<8x32xf32>
    %297 = arith.negf %296 : vector<8x32xf32>
    %298 = math.exp %297 : vector<8x32xf32>
    %cst_75 = arith.constant 1.000000e+00 : f32
    %299 = vector.broadcast %cst_75 : f32 to vector<8x32xf32>
    %300 = arith.addf %299, %298 : vector<8x32xf32>
    %301 = arith.divf %299, %300 : vector<8x32xf32>
    %302 = vector.extract_strided_slice %26 {offsets = [56, 0], sizes = [8, 32], strides = [1, 1]} : vector<64x32xf32> to vector<8x32xf32>
    %303 = arith.addf %302, %291 : vector<8x32xf32>
    %304 = arith.negf %303 : vector<8x32xf32>
    %305 = math.exp %304 : vector<8x32xf32>
    %cst_76 = arith.constant 1.000000e+00 : f32
    %306 = vector.broadcast %cst_76 : f32 to vector<8x32xf32>
    %307 = arith.addf %306, %305 : vector<8x32xf32>
    %308 = arith.divf %306, %307 : vector<8x32xf32>
    %309 = vector.extract_strided_slice %27 {offsets = [56, 0], sizes = [8, 32], strides = [1, 1]} : vector<64x32xf32> to vector<8x32xf32>
    %310 = arith.mulf %301, %294 : vector<8x32xf32>
    %311 = arith.addf %309, %310 : vector<8x32xf32>
    %312 = math.tanh %311 : vector<8x32xf32>
    %cst_77 = arith.constant 1.000000e+00 : f32
    %313 = vector.broadcast %cst_77 : f32 to vector<8x32xf32>
    %314 = arith.subf %313, %308 : vector<8x32xf32>
    %315 = arith.mulf %314, %312 : vector<8x32xf32>
    %316 = arith.mulf %308, %285 : vector<8x32xf32>
    %317 = arith.addf %315, %316 : vector<8x32xf32>
    %318 = vector.shape_cast %24 : vector<8x1xi1> to vector<8x1xi1>
    %319 = vector.broadcast %318 : vector<8x1xi1> to vector<8x32xi1>
    %320 = arith.select %319, %317, %285 : vector<8x32xi1>, vector<8x32xf32>
    %321 = vector.extract_strided_slice %8 {offsets = [0, 96], sizes = [64, 32], strides = [1, 1]} : vector<64x192xf32> to vector<64x32xf32>
    %322 = vector.extract_strided_slice %8 {offsets = [0, 128], sizes = [64, 32], strides = [1, 1]} : vector<64x192xf32> to vector<64x32xf32>
    %323 = vector.extract_strided_slice %8 {offsets = [0, 160], sizes = [64, 32], strides = [1, 1]} : vector<64x192xf32> to vector<64x32xf32>
    %c1_78 = arith.constant 1 : index
    %c0_79 = arith.constant 0 : index
    %c0_80 = arith.constant 0 : index
    %c0_81 = arith.constant 0 : index
    %324 = vector.load %arg6[%c1_78, %c0_79, %c0_80, %c0_81] : memref<2x3x32x32xf32, #tpu.memory_space<vmem>>, vector<1x1x32x32xf32>
    %325 = vector.shape_cast %324 : vector<1x1x32x32xf32> to vector<32x32xf32>
    %c1_82 = arith.constant 1 : index
    %c1_83 = arith.constant 1 : index
    %c0_84 = arith.constant 0 : index
    %c0_85 = arith.constant 0 : index
    %326 = vector.load %arg6[%c1_82, %c1_83, %c0_84, %c0_85] : memref<2x3x32x32xf32, #tpu.memory_space<vmem>>, vector<1x1x32x32xf32>
    %327 = vector.shape_cast %326 : vector<1x1x32x32xf32> to vector<32x32xf32>
    %c1_86 = arith.constant 1 : index
    %c2_87 = arith.constant 2 : index
    %c0_88 = arith.constant 0 : index
    %c0_89 = arith.constant 0 : index
    %328 = vector.load %arg6[%c1_86, %c2_87, %c0_88, %c0_89] : memref<2x3x32x32xf32, #tpu.memory_space<vmem>>, vector<1x1x32x32xf32>
    %329 = vector.shape_cast %328 : vector<1x1x32x32xf32> to vector<32x32xf32>
    %c1_90 = arith.constant 1 : index
    %c0_91 = arith.constant 0 : index
    %c0_92 = arith.constant 0 : index
    %c0_93 = arith.constant 0 : index
    %330 = vector.load %arg8[%c1_90, %c0_91, %c0_92, %c0_93] : memref<2x3x1x32xf32, #tpu.memory_space<vmem>>, vector<1x1x1x32xf32>
    %331 = vector.shape_cast %330 : vector<1x1x1x32xf32> to vector<1x32xf32>
    %c1_94 = arith.constant 1 : index
    %c1_95 = arith.constant 1 : index
    %c0_96 = arith.constant 0 : index
    %c0_97 = arith.constant 0 : index
    %332 = vector.load %arg8[%c1_94, %c1_95, %c0_96, %c0_97] : memref<2x3x1x32xf32, #tpu.memory_space<vmem>>, vector<1x1x1x32xf32>
    %333 = vector.shape_cast %332 : vector<1x1x1x32xf32> to vector<1x32xf32>
    %c1_98 = arith.constant 1 : index
    %c2_99 = arith.constant 2 : index
    %c0_100 = arith.constant 0 : index
    %c0_101 = arith.constant 0 : index
    %334 = vector.load %arg8[%c1_98, %c2_99, %c0_100, %c0_101] : memref<2x3x1x32xf32, #tpu.memory_space<vmem>>, vector<1x1x1x32xf32>
    %335 = vector.shape_cast %334 : vector<1x1x1x32xf32> to vector<1x32xf32>
    %cst_102 = arith.constant 0.000000e+00 : f32
    %336 = vector.broadcast %cst_102 : f32 to vector<8x32xf32>
    %cst_103 = arith.constant dense<0.000000e+00> : vector<8x32xf32>
    %337 = tpu.matmul %336, %325, %cst_103 {dimension_numbers = #tpu.dot_dimension_numbers<[1], [0], [0], [1], [0, 0, 1, 1], [], []>} : vector<8x32xf32>, vector<32x32xf32>, vector<8x32xf32> -> vector<8x32xf32>
    %338 = vector.broadcast %331 : vector<1x32xf32> to vector<8x32xf32>
    %339 = arith.addf %337, %338 : vector<8x32xf32>
    %cst_104 = arith.constant dense<0.000000e+00> : vector<8x32xf32>
    %340 = tpu.matmul %336, %327, %cst_104 {dimension_numbers = #tpu.dot_dimension_numbers<[1], [0], [0], [1], [0, 0, 1, 1], [], []>} : vector<8x32xf32>, vector<32x32xf32>, vector<8x32xf32> -> vector<8x32xf32>
    %341 = vector.broadcast %333 : vector<1x32xf32> to vector<8x32xf32>
    %342 = arith.addf %340, %341 : vector<8x32xf32>
    %cst_105 = arith.constant dense<0.000000e+00> : vector<8x32xf32>
    %343 = tpu.matmul %336, %329, %cst_105 {dimension_numbers = #tpu.dot_dimension_numbers<[1], [0], [0], [1], [0, 0, 1, 1], [], []>} : vector<8x32xf32>, vector<32x32xf32>, vector<8x32xf32> -> vector<8x32xf32>
    %344 = vector.broadcast %335 : vector<1x32xf32> to vector<8x32xf32>
    %345 = arith.addf %343, %344 : vector<8x32xf32>
    %346 = vector.extract_strided_slice %321 {offsets = [56, 0], sizes = [8, 32], strides = [1, 1]} : vector<64x32xf32> to vector<8x32xf32>
    %347 = arith.addf %346, %339 : vector<8x32xf32>
    %348 = arith.negf %347 : vector<8x32xf32>
    %349 = math.exp %348 : vector<8x32xf32>
    %cst_106 = arith.constant 1.000000e+00 : f32
    %350 = vector.broadcast %cst_106 : f32 to vector<8x32xf32>
    %351 = arith.addf %350, %349 : vector<8x32xf32>
    %352 = arith.divf %350, %351 : vector<8x32xf32>
    %353 = vector.extract_strided_slice %322 {offsets = [56, 0], sizes = [8, 32], strides = [1, 1]} : vector<64x32xf32> to vector<8x32xf32>
    %354 = arith.addf %353, %342 : vector<8x32xf32>
    %355 = arith.negf %354 : vector<8x32xf32>
    %356 = math.exp %355 : vector<8x32xf32>
    %cst_107 = arith.constant 1.000000e+00 : f32
    %357 = vector.broadcast %cst_107 : f32 to vector<8x32xf32>
    %358 = arith.addf %357, %356 : vector<8x32xf32>
    %359 = arith.divf %357, %358 : vector<8x32xf32>
    %360 = vector.extract_strided_slice %323 {offsets = [56, 0], sizes = [8, 32], strides = [1, 1]} : vector<64x32xf32> to vector<8x32xf32>
    %361 = arith.mulf %352, %345 : vector<8x32xf32>
    %362 = arith.addf %360, %361 : vector<8x32xf32>
    %363 = math.tanh %362 : vector<8x32xf32>
    %cst_108 = arith.constant 1.000000e+00 : f32
    %364 = vector.broadcast %cst_108 : f32 to vector<8x32xf32>
    %365 = arith.subf %364, %359 : vector<8x32xf32>
    %366 = arith.mulf %365, %363 : vector<8x32xf32>
    %367 = arith.mulf %359, %336 : vector<8x32xf32>
    %368 = arith.addf %366, %367 : vector<8x32xf32>
    %369 = vector.shape_cast %24 : vector<8x1xi1> to vector<8x1xi1>
    %370 = vector.broadcast %369 : vector<8x1xi1> to vector<8x32xi1>
    %371 = arith.select %370, %368, %336 : vector<8x32xi1>, vector<8x32xf32>
    %cst_109 = arith.constant dense<0.000000e+00> : vector<8x32xf32>
    %372 = tpu.matmul %371, %325, %cst_109 {dimension_numbers = #tpu.dot_dimension_numbers<[1], [0], [0], [1], [0, 0, 1, 1], [], []>} : vector<8x32xf32>, vector<32x32xf32>, vector<8x32xf32> -> vector<8x32xf32>
    %373 = vector.broadcast %331 : vector<1x32xf32> to vector<8x32xf32>
    %374 = arith.addf %372, %373 : vector<8x32xf32>
    %cst_110 = arith.constant dense<0.000000e+00> : vector<8x32xf32>
    %375 = tpu.matmul %371, %327, %cst_110 {dimension_numbers = #tpu.dot_dimension_numbers<[1], [0], [0], [1], [0, 0, 1, 1], [], []>} : vector<8x32xf32>, vector<32x32xf32>, vector<8x32xf32> -> vector<8x32xf32>
    %376 = vector.broadcast %333 : vector<1x32xf32> to vector<8x32xf32>
    %377 = arith.addf %375, %376 : vector<8x32xf32>
    %cst_111 = arith.constant dense<0.000000e+00> : vector<8x32xf32>
    %378 = tpu.matmul %371, %329, %cst_111 {dimension_numbers = #tpu.dot_dimension_numbers<[1], [0], [0], [1], [0, 0, 1, 1], [], []>} : vector<8x32xf32>, vector<32x32xf32>, vector<8x32xf32> -> vector<8x32xf32>
    %379 = vector.broadcast %335 : vector<1x32xf32> to vector<8x32xf32>
    %380 = arith.addf %378, %379 : vector<8x32xf32>
    %381 = vector.extract_strided_slice %321 {offsets = [48, 0], sizes = [8, 32], strides = [1, 1]} : vector<64x32xf32> to vector<8x32xf32>
    %382 = arith.addf %381, %374 : vector<8x32xf32>
    %383 = arith.negf %382 : vector<8x32xf32>
    %384 = math.exp %383 : vector<8x32xf32>
    %cst_112 = arith.constant 1.000000e+00 : f32
    %385 = vector.broadcast %cst_112 : f32 to vector<8x32xf32>
    %386 = arith.addf %385, %384 : vector<8x32xf32>
    %387 = arith.divf %385, %386 : vector<8x32xf32>
    %388 = vector.extract_strided_slice %322 {offsets = [48, 0], sizes = [8, 32], strides = [1, 1]} : vector<64x32xf32> to vector<8x32xf32>
    %389 = arith.addf %388, %377 : vector<8x32xf32>
    %390 = arith.negf %389 : vector<8x32xf32>
    %391 = math.exp %390 : vector<8x32xf32>
    %cst_113 = arith.constant 1.000000e+00 : f32
    %392 = vector.broadcast %cst_113 : f32 to vector<8x32xf32>
    %393 = arith.addf %392, %391 : vector<8x32xf32>
    %394 = arith.divf %392, %393 : vector<8x32xf32>
    %395 = vector.extract_strided_slice %323 {offsets = [48, 0], sizes = [8, 32], strides = [1, 1]} : vector<64x32xf32> to vector<8x32xf32>
    %396 = arith.mulf %387, %380 : vector<8x32xf32>
    %397 = arith.addf %395, %396 : vector<8x32xf32>
    %398 = math.tanh %397 : vector<8x32xf32>
    %cst_114 = arith.constant 1.000000e+00 : f32
    %399 = vector.broadcast %cst_114 : f32 to vector<8x32xf32>
    %400 = arith.subf %399, %394 : vector<8x32xf32>
    %401 = arith.mulf %400, %398 : vector<8x32xf32>
    %402 = arith.mulf %394, %371 : vector<8x32xf32>
    %403 = arith.addf %401, %402 : vector<8x32xf32>
    %404 = vector.shape_cast %22 : vector<8x1xi1> to vector<8x1xi1>
    %405 = vector.broadcast %404 : vector<8x1xi1> to vector<8x32xi1>
    %406 = arith.select %405, %403, %371 : vector<8x32xi1>, vector<8x32xf32>
    %cst_115 = arith.constant dense<0.000000e+00> : vector<8x32xf32>
    %407 = tpu.matmul %406, %325, %cst_115 {dimension_numbers = #tpu.dot_dimension_numbers<[1], [0], [0], [1], [0, 0, 1, 1], [], []>} : vector<8x32xf32>, vector<32x32xf32>, vector<8x32xf32> -> vector<8x32xf32>
    %408 = vector.broadcast %331 : vector<1x32xf32> to vector<8x32xf32>
    %409 = arith.addf %407, %408 : vector<8x32xf32>
    %cst_116 = arith.constant dense<0.000000e+00> : vector<8x32xf32>
    %410 = tpu.matmul %406, %327, %cst_116 {dimension_numbers = #tpu.dot_dimension_numbers<[1], [0], [0], [1], [0, 0, 1, 1], [], []>} : vector<8x32xf32>, vector<32x32xf32>, vector<8x32xf32> -> vector<8x32xf32>
    %411 = vector.broadcast %333 : vector<1x32xf32> to vector<8x32xf32>
    %412 = arith.addf %410, %411 : vector<8x32xf32>
    %cst_117 = arith.constant dense<0.000000e+00> : vector<8x32xf32>
    %413 = tpu.matmul %406, %329, %cst_117 {dimension_numbers = #tpu.dot_dimension_numbers<[1], [0], [0], [1], [0, 0, 1, 1], [], []>} : vector<8x32xf32>, vector<32x32xf32>, vector<8x32xf32> -> vector<8x32xf32>
    %414 = vector.broadcast %335 : vector<1x32xf32> to vector<8x32xf32>
    %415 = arith.addf %413, %414 : vector<8x32xf32>
    %416 = vector.extract_strided_slice %321 {offsets = [40, 0], sizes = [8, 32], strides = [1, 1]} : vector<64x32xf32> to vector<8x32xf32>
    %417 = arith.addf %416, %409 : vector<8x32xf32>
    %418 = arith.negf %417 : vector<8x32xf32>
    %419 = math.exp %418 : vector<8x32xf32>
    %cst_118 = arith.constant 1.000000e+00 : f32
    %420 = vector.broadcast %cst_118 : f32 to vector<8x32xf32>
    %421 = arith.addf %420, %419 : vector<8x32xf32>
    %422 = arith.divf %420, %421 : vector<8x32xf32>
    %423 = vector.extract_strided_slice %322 {offsets = [40, 0], sizes = [8, 32], strides = [1, 1]} : vector<64x32xf32> to vector<8x32xf32>
    %424 = arith.addf %423, %412 : vector<8x32xf32>
    %425 = arith.negf %424 : vector<8x32xf32>
    %426 = math.exp %425 : vector<8x32xf32>
    %cst_119 = arith.constant 1.000000e+00 : f32
    %427 = vector.broadcast %cst_119 : f32 to vector<8x32xf32>
    %428 = arith.addf %427, %426 : vector<8x32xf32>
    %429 = arith.divf %427, %428 : vector<8x32xf32>
    %430 = vector.extract_strided_slice %323 {offsets = [40, 0], sizes = [8, 32], strides = [1, 1]} : vector<64x32xf32> to vector<8x32xf32>
    %431 = arith.mulf %422, %415 : vector<8x32xf32>
    %432 = arith.addf %430, %431 : vector<8x32xf32>
    %433 = math.tanh %432 : vector<8x32xf32>
    %cst_120 = arith.constant 1.000000e+00 : f32
    %434 = vector.broadcast %cst_120 : f32 to vector<8x32xf32>
    %435 = arith.subf %434, %429 : vector<8x32xf32>
    %436 = arith.mulf %435, %433 : vector<8x32xf32>
    %437 = arith.mulf %429, %406 : vector<8x32xf32>
    %438 = arith.addf %436, %437 : vector<8x32xf32>
    %439 = vector.shape_cast %20 : vector<8x1xi1> to vector<8x1xi1>
    %440 = vector.broadcast %439 : vector<8x1xi1> to vector<8x32xi1>
    %441 = arith.select %440, %438, %406 : vector<8x32xi1>, vector<8x32xf32>
    %cst_121 = arith.constant dense<0.000000e+00> : vector<8x32xf32>
    %442 = tpu.matmul %441, %325, %cst_121 {dimension_numbers = #tpu.dot_dimension_numbers<[1], [0], [0], [1], [0, 0, 1, 1], [], []>} : vector<8x32xf32>, vector<32x32xf32>, vector<8x32xf32> -> vector<8x32xf32>
    %443 = vector.broadcast %331 : vector<1x32xf32> to vector<8x32xf32>
    %444 = arith.addf %442, %443 : vector<8x32xf32>
    %cst_122 = arith.constant dense<0.000000e+00> : vector<8x32xf32>
    %445 = tpu.matmul %441, %327, %cst_122 {dimension_numbers = #tpu.dot_dimension_numbers<[1], [0], [0], [1], [0, 0, 1, 1], [], []>} : vector<8x32xf32>, vector<32x32xf32>, vector<8x32xf32> -> vector<8x32xf32>
    %446 = vector.broadcast %333 : vector<1x32xf32> to vector<8x32xf32>
    %447 = arith.addf %445, %446 : vector<8x32xf32>
    %cst_123 = arith.constant dense<0.000000e+00> : vector<8x32xf32>
    %448 = tpu.matmul %441, %329, %cst_123 {dimension_numbers = #tpu.dot_dimension_numbers<[1], [0], [0], [1], [0, 0, 1, 1], [], []>} : vector<8x32xf32>, vector<32x32xf32>, vector<8x32xf32> -> vector<8x32xf32>
    %449 = vector.broadcast %335 : vector<1x32xf32> to vector<8x32xf32>
    %450 = arith.addf %448, %449 : vector<8x32xf32>
    %451 = vector.extract_strided_slice %321 {offsets = [32, 0], sizes = [8, 32], strides = [1, 1]} : vector<64x32xf32> to vector<8x32xf32>
    %452 = arith.addf %451, %444 : vector<8x32xf32>
    %453 = arith.negf %452 : vector<8x32xf32>
    %454 = math.exp %453 : vector<8x32xf32>
    %cst_124 = arith.constant 1.000000e+00 : f32
    %455 = vector.broadcast %cst_124 : f32 to vector<8x32xf32>
    %456 = arith.addf %455, %454 : vector<8x32xf32>
    %457 = arith.divf %455, %456 : vector<8x32xf32>
    %458 = vector.extract_strided_slice %322 {offsets = [32, 0], sizes = [8, 32], strides = [1, 1]} : vector<64x32xf32> to vector<8x32xf32>
    %459 = arith.addf %458, %447 : vector<8x32xf32>
    %460 = arith.negf %459 : vector<8x32xf32>
    %461 = math.exp %460 : vector<8x32xf32>
    %cst_125 = arith.constant 1.000000e+00 : f32
    %462 = vector.broadcast %cst_125 : f32 to vector<8x32xf32>
    %463 = arith.addf %462, %461 : vector<8x32xf32>
    %464 = arith.divf %462, %463 : vector<8x32xf32>
    %465 = vector.extract_strided_slice %323 {offsets = [32, 0], sizes = [8, 32], strides = [1, 1]} : vector<64x32xf32> to vector<8x32xf32>
    %466 = arith.mulf %457, %450 : vector<8x32xf32>
    %467 = arith.addf %465, %466 : vector<8x32xf32>
    %468 = math.tanh %467 : vector<8x32xf32>
    %cst_126 = arith.constant 1.000000e+00 : f32
    %469 = vector.broadcast %cst_126 : f32 to vector<8x32xf32>
    %470 = arith.subf %469, %464 : vector<8x32xf32>
    %471 = arith.mulf %470, %468 : vector<8x32xf32>
    %472 = arith.mulf %464, %441 : vector<8x32xf32>
    %473 = arith.addf %471, %472 : vector<8x32xf32>
    %474 = vector.shape_cast %18 : vector<8x1xi1> to vector<8x1xi1>
    %475 = vector.broadcast %474 : vector<8x1xi1> to vector<8x32xi1>
    %476 = arith.select %475, %473, %441 : vector<8x32xi1>, vector<8x32xf32>
    %cst_127 = arith.constant dense<0.000000e+00> : vector<8x32xf32>
    %477 = tpu.matmul %476, %325, %cst_127 {dimension_numbers = #tpu.dot_dimension_numbers<[1], [0], [0], [1], [0, 0, 1, 1], [], []>} : vector<8x32xf32>, vector<32x32xf32>, vector<8x32xf32> -> vector<8x32xf32>
    %478 = vector.broadcast %331 : vector<1x32xf32> to vector<8x32xf32>
    %479 = arith.addf %477, %478 : vector<8x32xf32>
    %cst_128 = arith.constant dense<0.000000e+00> : vector<8x32xf32>
    %480 = tpu.matmul %476, %327, %cst_128 {dimension_numbers = #tpu.dot_dimension_numbers<[1], [0], [0], [1], [0, 0, 1, 1], [], []>} : vector<8x32xf32>, vector<32x32xf32>, vector<8x32xf32> -> vector<8x32xf32>
    %481 = vector.broadcast %333 : vector<1x32xf32> to vector<8x32xf32>
    %482 = arith.addf %480, %481 : vector<8x32xf32>
    %cst_129 = arith.constant dense<0.000000e+00> : vector<8x32xf32>
    %483 = tpu.matmul %476, %329, %cst_129 {dimension_numbers = #tpu.dot_dimension_numbers<[1], [0], [0], [1], [0, 0, 1, 1], [], []>} : vector<8x32xf32>, vector<32x32xf32>, vector<8x32xf32> -> vector<8x32xf32>
    %484 = vector.broadcast %335 : vector<1x32xf32> to vector<8x32xf32>
    %485 = arith.addf %483, %484 : vector<8x32xf32>
    %486 = vector.extract_strided_slice %321 {offsets = [24, 0], sizes = [8, 32], strides = [1, 1]} : vector<64x32xf32> to vector<8x32xf32>
    %487 = arith.addf %486, %479 : vector<8x32xf32>
    %488 = arith.negf %487 : vector<8x32xf32>
    %489 = math.exp %488 : vector<8x32xf32>
    %cst_130 = arith.constant 1.000000e+00 : f32
    %490 = vector.broadcast %cst_130 : f32 to vector<8x32xf32>
    %491 = arith.addf %490, %489 : vector<8x32xf32>
    %492 = arith.divf %490, %491 : vector<8x32xf32>
    %493 = vector.extract_strided_slice %322 {offsets = [24, 0], sizes = [8, 32], strides = [1, 1]} : vector<64x32xf32> to vector<8x32xf32>
    %494 = arith.addf %493, %482 : vector<8x32xf32>
    %495 = arith.negf %494 : vector<8x32xf32>
    %496 = math.exp %495 : vector<8x32xf32>
    %cst_131 = arith.constant 1.000000e+00 : f32
    %497 = vector.broadcast %cst_131 : f32 to vector<8x32xf32>
    %498 = arith.addf %497, %496 : vector<8x32xf32>
    %499 = arith.divf %497, %498 : vector<8x32xf32>
    %500 = vector.extract_strided_slice %323 {offsets = [24, 0], sizes = [8, 32], strides = [1, 1]} : vector<64x32xf32> to vector<8x32xf32>
    %501 = arith.mulf %492, %485 : vector<8x32xf32>
    %502 = arith.addf %500, %501 : vector<8x32xf32>
    %503 = math.tanh %502 : vector<8x32xf32>
    %cst_132 = arith.constant 1.000000e+00 : f32
    %504 = vector.broadcast %cst_132 : f32 to vector<8x32xf32>
    %505 = arith.subf %504, %499 : vector<8x32xf32>
    %506 = arith.mulf %505, %503 : vector<8x32xf32>
    %507 = arith.mulf %499, %476 : vector<8x32xf32>
    %508 = arith.addf %506, %507 : vector<8x32xf32>
    %509 = vector.shape_cast %16 : vector<8x1xi1> to vector<8x1xi1>
    %510 = vector.broadcast %509 : vector<8x1xi1> to vector<8x32xi1>
    %511 = arith.select %510, %508, %476 : vector<8x32xi1>, vector<8x32xf32>
    %cst_133 = arith.constant dense<0.000000e+00> : vector<8x32xf32>
    %512 = tpu.matmul %511, %325, %cst_133 {dimension_numbers = #tpu.dot_dimension_numbers<[1], [0], [0], [1], [0, 0, 1, 1], [], []>} : vector<8x32xf32>, vector<32x32xf32>, vector<8x32xf32> -> vector<8x32xf32>
    %513 = vector.broadcast %331 : vector<1x32xf32> to vector<8x32xf32>
    %514 = arith.addf %512, %513 : vector<8x32xf32>
    %cst_134 = arith.constant dense<0.000000e+00> : vector<8x32xf32>
    %515 = tpu.matmul %511, %327, %cst_134 {dimension_numbers = #tpu.dot_dimension_numbers<[1], [0], [0], [1], [0, 0, 1, 1], [], []>} : vector<8x32xf32>, vector<32x32xf32>, vector<8x32xf32> -> vector<8x32xf32>
    %516 = vector.broadcast %333 : vector<1x32xf32> to vector<8x32xf32>
    %517 = arith.addf %515, %516 : vector<8x32xf32>
    %cst_135 = arith.constant dense<0.000000e+00> : vector<8x32xf32>
    %518 = tpu.matmul %511, %329, %cst_135 {dimension_numbers = #tpu.dot_dimension_numbers<[1], [0], [0], [1], [0, 0, 1, 1], [], []>} : vector<8x32xf32>, vector<32x32xf32>, vector<8x32xf32> -> vector<8x32xf32>
    %519 = vector.broadcast %335 : vector<1x32xf32> to vector<8x32xf32>
    %520 = arith.addf %518, %519 : vector<8x32xf32>
    %521 = vector.extract_strided_slice %321 {offsets = [16, 0], sizes = [8, 32], strides = [1, 1]} : vector<64x32xf32> to vector<8x32xf32>
    %522 = arith.addf %521, %514 : vector<8x32xf32>
    %523 = arith.negf %522 : vector<8x32xf32>
    %524 = math.exp %523 : vector<8x32xf32>
    %cst_136 = arith.constant 1.000000e+00 : f32
    %525 = vector.broadcast %cst_136 : f32 to vector<8x32xf32>
    %526 = arith.addf %525, %524 : vector<8x32xf32>
    %527 = arith.divf %525, %526 : vector<8x32xf32>
    %528 = vector.extract_strided_slice %322 {offsets = [16, 0], sizes = [8, 32], strides = [1, 1]} : vector<64x32xf32> to vector<8x32xf32>
    %529 = arith.addf %528, %517 : vector<8x32xf32>
    %530 = arith.negf %529 : vector<8x32xf32>
    %531 = math.exp %530 : vector<8x32xf32>
    %cst_137 = arith.constant 1.000000e+00 : f32
    %532 = vector.broadcast %cst_137 : f32 to vector<8x32xf32>
    %533 = arith.addf %532, %531 : vector<8x32xf32>
    %534 = arith.divf %532, %533 : vector<8x32xf32>
    %535 = vector.extract_strided_slice %323 {offsets = [16, 0], sizes = [8, 32], strides = [1, 1]} : vector<64x32xf32> to vector<8x32xf32>
    %536 = arith.mulf %527, %520 : vector<8x32xf32>
    %537 = arith.addf %535, %536 : vector<8x32xf32>
    %538 = math.tanh %537 : vector<8x32xf32>
    %cst_138 = arith.constant 1.000000e+00 : f32
    %539 = vector.broadcast %cst_138 : f32 to vector<8x32xf32>
    %540 = arith.subf %539, %534 : vector<8x32xf32>
    %541 = arith.mulf %540, %538 : vector<8x32xf32>
    %542 = arith.mulf %534, %511 : vector<8x32xf32>
    %543 = arith.addf %541, %542 : vector<8x32xf32>
    %544 = vector.shape_cast %14 : vector<8x1xi1> to vector<8x1xi1>
    %545 = vector.broadcast %544 : vector<8x1xi1> to vector<8x32xi1>
    %546 = arith.select %545, %543, %511 : vector<8x32xi1>, vector<8x32xf32>
    %cst_139 = arith.constant dense<0.000000e+00> : vector<8x32xf32>
    %547 = tpu.matmul %546, %325, %cst_139 {dimension_numbers = #tpu.dot_dimension_numbers<[1], [0], [0], [1], [0, 0, 1, 1], [], []>} : vector<8x32xf32>, vector<32x32xf32>, vector<8x32xf32> -> vector<8x32xf32>
    %548 = vector.broadcast %331 : vector<1x32xf32> to vector<8x32xf32>
    %549 = arith.addf %547, %548 : vector<8x32xf32>
    %cst_140 = arith.constant dense<0.000000e+00> : vector<8x32xf32>
    %550 = tpu.matmul %546, %327, %cst_140 {dimension_numbers = #tpu.dot_dimension_numbers<[1], [0], [0], [1], [0, 0, 1, 1], [], []>} : vector<8x32xf32>, vector<32x32xf32>, vector<8x32xf32> -> vector<8x32xf32>
    %551 = vector.broadcast %333 : vector<1x32xf32> to vector<8x32xf32>
    %552 = arith.addf %550, %551 : vector<8x32xf32>
    %cst_141 = arith.constant dense<0.000000e+00> : vector<8x32xf32>
    %553 = tpu.matmul %546, %329, %cst_141 {dimension_numbers = #tpu.dot_dimension_numbers<[1], [0], [0], [1], [0, 0, 1, 1], [], []>} : vector<8x32xf32>, vector<32x32xf32>, vector<8x32xf32> -> vector<8x32xf32>
    %554 = vector.broadcast %335 : vector<1x32xf32> to vector<8x32xf32>
    %555 = arith.addf %553, %554 : vector<8x32xf32>
    %556 = vector.extract_strided_slice %321 {offsets = [8, 0], sizes = [8, 32], strides = [1, 1]} : vector<64x32xf32> to vector<8x32xf32>
    %557 = arith.addf %556, %549 : vector<8x32xf32>
    %558 = arith.negf %557 : vector<8x32xf32>
    %559 = math.exp %558 : vector<8x32xf32>
    %cst_142 = arith.constant 1.000000e+00 : f32
    %560 = vector.broadcast %cst_142 : f32 to vector<8x32xf32>
    %561 = arith.addf %560, %559 : vector<8x32xf32>
    %562 = arith.divf %560, %561 : vector<8x32xf32>
    %563 = vector.extract_strided_slice %322 {offsets = [8, 0], sizes = [8, 32], strides = [1, 1]} : vector<64x32xf32> to vector<8x32xf32>
    %564 = arith.addf %563, %552 : vector<8x32xf32>
    %565 = arith.negf %564 : vector<8x32xf32>
    %566 = math.exp %565 : vector<8x32xf32>
    %cst_143 = arith.constant 1.000000e+00 : f32
    %567 = vector.broadcast %cst_143 : f32 to vector<8x32xf32>
    %568 = arith.addf %567, %566 : vector<8x32xf32>
    %569 = arith.divf %567, %568 : vector<8x32xf32>
    %570 = vector.extract_strided_slice %323 {offsets = [8, 0], sizes = [8, 32], strides = [1, 1]} : vector<64x32xf32> to vector<8x32xf32>
    %571 = arith.mulf %562, %555 : vector<8x32xf32>
    %572 = arith.addf %570, %571 : vector<8x32xf32>
    %573 = math.tanh %572 : vector<8x32xf32>
    %cst_144 = arith.constant 1.000000e+00 : f32
    %574 = vector.broadcast %cst_144 : f32 to vector<8x32xf32>
    %575 = arith.subf %574, %569 : vector<8x32xf32>
    %576 = arith.mulf %575, %573 : vector<8x32xf32>
    %577 = arith.mulf %569, %546 : vector<8x32xf32>
    %578 = arith.addf %576, %577 : vector<8x32xf32>
    %579 = vector.shape_cast %12 : vector<8x1xi1> to vector<8x1xi1>
    %580 = vector.broadcast %579 : vector<8x1xi1> to vector<8x32xi1>
    %581 = arith.select %580, %578, %546 : vector<8x32xi1>, vector<8x32xf32>
    %cst_145 = arith.constant dense<0.000000e+00> : vector<8x32xf32>
    %582 = tpu.matmul %581, %325, %cst_145 {dimension_numbers = #tpu.dot_dimension_numbers<[1], [0], [0], [1], [0, 0, 1, 1], [], []>} : vector<8x32xf32>, vector<32x32xf32>, vector<8x32xf32> -> vector<8x32xf32>
    %583 = vector.broadcast %331 : vector<1x32xf32> to vector<8x32xf32>
    %584 = arith.addf %582, %583 : vector<8x32xf32>
    %cst_146 = arith.constant dense<0.000000e+00> : vector<8x32xf32>
    %585 = tpu.matmul %581, %327, %cst_146 {dimension_numbers = #tpu.dot_dimension_numbers<[1], [0], [0], [1], [0, 0, 1, 1], [], []>} : vector<8x32xf32>, vector<32x32xf32>, vector<8x32xf32> -> vector<8x32xf32>
    %586 = vector.broadcast %333 : vector<1x32xf32> to vector<8x32xf32>
    %587 = arith.addf %585, %586 : vector<8x32xf32>
    %cst_147 = arith.constant dense<0.000000e+00> : vector<8x32xf32>
    %588 = tpu.matmul %581, %329, %cst_147 {dimension_numbers = #tpu.dot_dimension_numbers<[1], [0], [0], [1], [0, 0, 1, 1], [], []>} : vector<8x32xf32>, vector<32x32xf32>, vector<8x32xf32> -> vector<8x32xf32>
    %589 = vector.broadcast %335 : vector<1x32xf32> to vector<8x32xf32>
    %590 = arith.addf %588, %589 : vector<8x32xf32>
    %591 = vector.extract_strided_slice %321 {offsets = [0, 0], sizes = [8, 32], strides = [1, 1]} : vector<64x32xf32> to vector<8x32xf32>
    %592 = arith.addf %591, %584 : vector<8x32xf32>
    %593 = arith.negf %592 : vector<8x32xf32>
    %594 = math.exp %593 : vector<8x32xf32>
    %cst_148 = arith.constant 1.000000e+00 : f32
    %595 = vector.broadcast %cst_148 : f32 to vector<8x32xf32>
    %596 = arith.addf %595, %594 : vector<8x32xf32>
    %597 = arith.divf %595, %596 : vector<8x32xf32>
    %598 = vector.extract_strided_slice %322 {offsets = [0, 0], sizes = [8, 32], strides = [1, 1]} : vector<64x32xf32> to vector<8x32xf32>
    %599 = arith.addf %598, %587 : vector<8x32xf32>
    %600 = arith.negf %599 : vector<8x32xf32>
    %601 = math.exp %600 : vector<8x32xf32>
    %cst_149 = arith.constant 1.000000e+00 : f32
    %602 = vector.broadcast %cst_149 : f32 to vector<8x32xf32>
    %603 = arith.addf %602, %601 : vector<8x32xf32>
    %604 = arith.divf %602, %603 : vector<8x32xf32>
    %605 = vector.extract_strided_slice %323 {offsets = [0, 0], sizes = [8, 32], strides = [1, 1]} : vector<64x32xf32> to vector<8x32xf32>
    %606 = arith.mulf %597, %590 : vector<8x32xf32>
    %607 = arith.addf %605, %606 : vector<8x32xf32>
    %608 = math.tanh %607 : vector<8x32xf32>
    %cst_150 = arith.constant 1.000000e+00 : f32
    %609 = vector.broadcast %cst_150 : f32 to vector<8x32xf32>
    %610 = arith.subf %609, %604 : vector<8x32xf32>
    %611 = arith.mulf %610, %608 : vector<8x32xf32>
    %612 = arith.mulf %604, %581 : vector<8x32xf32>
    %613 = arith.addf %611, %612 : vector<8x32xf32>
    %614 = vector.shape_cast %10 : vector<8x1xi1> to vector<8x1xi1>
    %615 = vector.broadcast %614 : vector<8x1xi1> to vector<8x32xi1>
    %616 = arith.select %615, %613, %581 : vector<8x32xi1>, vector<8x32xf32>
    %c0_151 = arith.constant 0 : index
    %c0_152 = arith.constant 0 : index
    %617 = vector.load %arg1[%c0_151, %c0_152] : memref<64x32xf32, #tpu.memory_space<vmem>>, vector<64x32xf32>
    %c0_153 = arith.constant 0 : index
    %c0_154 = arith.constant 0 : index
    %618 = vector.load %arg3[%c0_153, %c0_154] : memref<8x1xi32, #tpu.memory_space<vmem>>, vector<8x1xi32>
    %619 = arith.truncf %617 : vector<64x32xf32> to vector<64x32xbf16>
    %c0_155 = arith.constant 0 : index
    %c0_156 = arith.constant 0 : index
    %620 = vector.load %arg9[%c0_155, %c0_156] : memref<32x192xf32, #tpu.memory_space<vmem>>, vector<32x192xf32>
    %621 = arith.truncf %620 : vector<32x192xf32> to vector<32x192xbf16>
    %cst_157 = arith.constant dense<0.000000e+00> : vector<64x192xf32>
    %622 = tpu.matmul %619, %621, %cst_157 {dimension_numbers = #tpu.dot_dimension_numbers<[1], [0], [0], [1], [0, 0, 1, 1], [], []>} : vector<64x32xbf16>, vector<32x192xbf16>, vector<64x192xf32> -> vector<64x192xf32>
    %c0_158 = arith.constant 0 : index
    %c0_159 = arith.constant 0 : index
    %623 = vector.load %arg11[%c0_158, %c0_159] : memref<1x192xf32, #tpu.memory_space<vmem>>, vector<1x192xf32>
    %624 = vector.broadcast %623 : vector<1x192xf32> to vector<64x192xf32>
    %625 = arith.addf %622, %624 : vector<64x192xf32>
    %c0_i32_160 = arith.constant 0 : i32
    %626 = vector.broadcast %c0_i32_160 : i32 to vector<8x1xi32>
    %627 = arith.cmpi sgt, %618, %626 : vector<8x1xi32>
    %c1_i32_161 = arith.constant 1 : i32
    %628 = vector.broadcast %c1_i32_161 : i32 to vector<8x1xi32>
    %629 = arith.cmpi sgt, %618, %628 : vector<8x1xi32>
    %c2_i32_162 = arith.constant 2 : i32
    %630 = vector.broadcast %c2_i32_162 : i32 to vector<8x1xi32>
    %631 = arith.cmpi sgt, %618, %630 : vector<8x1xi32>
    %c3_i32_163 = arith.constant 3 : i32
    %632 = vector.broadcast %c3_i32_163 : i32 to vector<8x1xi32>
    %633 = arith.cmpi sgt, %618, %632 : vector<8x1xi32>
    %c4_i32_164 = arith.constant 4 : i32
    %634 = vector.broadcast %c4_i32_164 : i32 to vector<8x1xi32>
    %635 = arith.cmpi sgt, %618, %634 : vector<8x1xi32>
    %c5_i32_165 = arith.constant 5 : i32
    %636 = vector.broadcast %c5_i32_165 : i32 to vector<8x1xi32>
    %637 = arith.cmpi sgt, %618, %636 : vector<8x1xi32>
    %c6_i32_166 = arith.constant 6 : i32
    %638 = vector.broadcast %c6_i32_166 : i32 to vector<8x1xi32>
    %639 = arith.cmpi sgt, %618, %638 : vector<8x1xi32>
    %c7_i32_167 = arith.constant 7 : i32
    %640 = vector.broadcast %c7_i32_167 : i32 to vector<8x1xi32>
    %641 = arith.cmpi sgt, %618, %640 : vector<8x1xi32>
    %642 = vector.extract_strided_slice %625 {offsets = [0, 0], sizes = [64, 32], strides = [1, 1]} : vector<64x192xf32> to vector<64x32xf32>
    %643 = vector.extract_strided_slice %625 {offsets = [0, 32], sizes = [64, 32], strides = [1, 1]} : vector<64x192xf32> to vector<64x32xf32>
    %644 = vector.extract_strided_slice %625 {offsets = [0, 64], sizes = [64, 32], strides = [1, 1]} : vector<64x192xf32> to vector<64x32xf32>
    %c0_168 = arith.constant 0 : index
    %c0_169 = arith.constant 0 : index
    %c0_170 = arith.constant 0 : index
    %c0_171 = arith.constant 0 : index
    %645 = vector.load %arg10[%c0_168, %c0_169, %c0_170, %c0_171] : memref<2x3x32x32xf32, #tpu.memory_space<vmem>>, vector<1x1x32x32xf32>
    %646 = vector.shape_cast %645 : vector<1x1x32x32xf32> to vector<32x32xf32>
    %c0_172 = arith.constant 0 : index
    %c1_173 = arith.constant 1 : index
    %c0_174 = arith.constant 0 : index
    %c0_175 = arith.constant 0 : index
    %647 = vector.load %arg10[%c0_172, %c1_173, %c0_174, %c0_175] : memref<2x3x32x32xf32, #tpu.memory_space<vmem>>, vector<1x1x32x32xf32>
    %648 = vector.shape_cast %647 : vector<1x1x32x32xf32> to vector<32x32xf32>
    %c0_176 = arith.constant 0 : index
    %c2_177 = arith.constant 2 : index
    %c0_178 = arith.constant 0 : index
    %c0_179 = arith.constant 0 : index
    %649 = vector.load %arg10[%c0_176, %c2_177, %c0_178, %c0_179] : memref<2x3x32x32xf32, #tpu.memory_space<vmem>>, vector<1x1x32x32xf32>
    %650 = vector.shape_cast %649 : vector<1x1x32x32xf32> to vector<32x32xf32>
    %c0_180 = arith.constant 0 : index
    %c0_181 = arith.constant 0 : index
    %c0_182 = arith.constant 0 : index
    %c0_183 = arith.constant 0 : index
    %651 = vector.load %arg12[%c0_180, %c0_181, %c0_182, %c0_183] : memref<2x3x1x32xf32, #tpu.memory_space<vmem>>, vector<1x1x1x32xf32>
    %652 = vector.shape_cast %651 : vector<1x1x1x32xf32> to vector<1x32xf32>
    %c0_184 = arith.constant 0 : index
    %c1_185 = arith.constant 1 : index
    %c0_186 = arith.constant 0 : index
    %c0_187 = arith.constant 0 : index
    %653 = vector.load %arg12[%c0_184, %c1_185, %c0_186, %c0_187] : memref<2x3x1x32xf32, #tpu.memory_space<vmem>>, vector<1x1x1x32xf32>
    %654 = vector.shape_cast %653 : vector<1x1x1x32xf32> to vector<1x32xf32>
    %c0_188 = arith.constant 0 : index
    %c2_189 = arith.constant 2 : index
    %c0_190 = arith.constant 0 : index
    %c0_191 = arith.constant 0 : index
    %655 = vector.load %arg12[%c0_188, %c2_189, %c0_190, %c0_191] : memref<2x3x1x32xf32, #tpu.memory_space<vmem>>, vector<1x1x1x32xf32>
    %656 = vector.shape_cast %655 : vector<1x1x1x32xf32> to vector<1x32xf32>
    %cst_192 = arith.constant 0.000000e+00 : f32
    %657 = vector.broadcast %cst_192 : f32 to vector<8x32xf32>
    %cst_193 = arith.constant dense<0.000000e+00> : vector<8x32xf32>
    %658 = tpu.matmul %657, %646, %cst_193 {dimension_numbers = #tpu.dot_dimension_numbers<[1], [0], [0], [1], [0, 0, 1, 1], [], []>} : vector<8x32xf32>, vector<32x32xf32>, vector<8x32xf32> -> vector<8x32xf32>
    %659 = vector.broadcast %652 : vector<1x32xf32> to vector<8x32xf32>
    %660 = arith.addf %658, %659 : vector<8x32xf32>
    %cst_194 = arith.constant dense<0.000000e+00> : vector<8x32xf32>
    %661 = tpu.matmul %657, %648, %cst_194 {dimension_numbers = #tpu.dot_dimension_numbers<[1], [0], [0], [1], [0, 0, 1, 1], [], []>} : vector<8x32xf32>, vector<32x32xf32>, vector<8x32xf32> -> vector<8x32xf32>
    %662 = vector.broadcast %654 : vector<1x32xf32> to vector<8x32xf32>
    %663 = arith.addf %661, %662 : vector<8x32xf32>
    %cst_195 = arith.constant dense<0.000000e+00> : vector<8x32xf32>
    %664 = tpu.matmul %657, %650, %cst_195 {dimension_numbers = #tpu.dot_dimension_numbers<[1], [0], [0], [1], [0, 0, 1, 1], [], []>} : vector<8x32xf32>, vector<32x32xf32>, vector<8x32xf32> -> vector<8x32xf32>
    %665 = vector.broadcast %656 : vector<1x32xf32> to vector<8x32xf32>
    %666 = arith.addf %664, %665 : vector<8x32xf32>
    %667 = vector.extract_strided_slice %642 {offsets = [0, 0], sizes = [8, 32], strides = [1, 1]} : vector<64x32xf32> to vector<8x32xf32>
    %668 = arith.addf %667, %660 : vector<8x32xf32>
    %669 = arith.negf %668 : vector<8x32xf32>
    %670 = math.exp %669 : vector<8x32xf32>
    %cst_196 = arith.constant 1.000000e+00 : f32
    %671 = vector.broadcast %cst_196 : f32 to vector<8x32xf32>
    %672 = arith.addf %671, %670 : vector<8x32xf32>
    %673 = arith.divf %671, %672 : vector<8x32xf32>
    %674 = vector.extract_strided_slice %643 {offsets = [0, 0], sizes = [8, 32], strides = [1, 1]} : vector<64x32xf32> to vector<8x32xf32>
    %675 = arith.addf %674, %663 : vector<8x32xf32>
    %676 = arith.negf %675 : vector<8x32xf32>
    %677 = math.exp %676 : vector<8x32xf32>
    %cst_197 = arith.constant 1.000000e+00 : f32
    %678 = vector.broadcast %cst_197 : f32 to vector<8x32xf32>
    %679 = arith.addf %678, %677 : vector<8x32xf32>
    %680 = arith.divf %678, %679 : vector<8x32xf32>
    %681 = vector.extract_strided_slice %644 {offsets = [0, 0], sizes = [8, 32], strides = [1, 1]} : vector<64x32xf32> to vector<8x32xf32>
    %682 = arith.mulf %673, %666 : vector<8x32xf32>
    %683 = arith.addf %681, %682 : vector<8x32xf32>
    %684 = math.tanh %683 : vector<8x32xf32>
    %cst_198 = arith.constant 1.000000e+00 : f32
    %685 = vector.broadcast %cst_198 : f32 to vector<8x32xf32>
    %686 = arith.subf %685, %680 : vector<8x32xf32>
    %687 = arith.mulf %686, %684 : vector<8x32xf32>
    %688 = arith.mulf %680, %657 : vector<8x32xf32>
    %689 = arith.addf %687, %688 : vector<8x32xf32>
    %690 = vector.shape_cast %627 : vector<8x1xi1> to vector<8x1xi1>
    %691 = vector.broadcast %690 : vector<8x1xi1> to vector<8x32xi1>
    %692 = arith.select %691, %689, %657 : vector<8x32xi1>, vector<8x32xf32>
    %cst_199 = arith.constant dense<0.000000e+00> : vector<8x32xf32>
    %693 = tpu.matmul %692, %646, %cst_199 {dimension_numbers = #tpu.dot_dimension_numbers<[1], [0], [0], [1], [0, 0, 1, 1], [], []>} : vector<8x32xf32>, vector<32x32xf32>, vector<8x32xf32> -> vector<8x32xf32>
    %694 = vector.broadcast %652 : vector<1x32xf32> to vector<8x32xf32>
    %695 = arith.addf %693, %694 : vector<8x32xf32>
    %cst_200 = arith.constant dense<0.000000e+00> : vector<8x32xf32>
    %696 = tpu.matmul %692, %648, %cst_200 {dimension_numbers = #tpu.dot_dimension_numbers<[1], [0], [0], [1], [0, 0, 1, 1], [], []>} : vector<8x32xf32>, vector<32x32xf32>, vector<8x32xf32> -> vector<8x32xf32>
    %697 = vector.broadcast %654 : vector<1x32xf32> to vector<8x32xf32>
    %698 = arith.addf %696, %697 : vector<8x32xf32>
    %cst_201 = arith.constant dense<0.000000e+00> : vector<8x32xf32>
    %699 = tpu.matmul %692, %650, %cst_201 {dimension_numbers = #tpu.dot_dimension_numbers<[1], [0], [0], [1], [0, 0, 1, 1], [], []>} : vector<8x32xf32>, vector<32x32xf32>, vector<8x32xf32> -> vector<8x32xf32>
    %700 = vector.broadcast %656 : vector<1x32xf32> to vector<8x32xf32>
    %701 = arith.addf %699, %700 : vector<8x32xf32>
    %702 = vector.extract_strided_slice %642 {offsets = [8, 0], sizes = [8, 32], strides = [1, 1]} : vector<64x32xf32> to vector<8x32xf32>
    %703 = arith.addf %702, %695 : vector<8x32xf32>
    %704 = arith.negf %703 : vector<8x32xf32>
    %705 = math.exp %704 : vector<8x32xf32>
    %cst_202 = arith.constant 1.000000e+00 : f32
    %706 = vector.broadcast %cst_202 : f32 to vector<8x32xf32>
    %707 = arith.addf %706, %705 : vector<8x32xf32>
    %708 = arith.divf %706, %707 : vector<8x32xf32>
    %709 = vector.extract_strided_slice %643 {offsets = [8, 0], sizes = [8, 32], strides = [1, 1]} : vector<64x32xf32> to vector<8x32xf32>
    %710 = arith.addf %709, %698 : vector<8x32xf32>
    %711 = arith.negf %710 : vector<8x32xf32>
    %712 = math.exp %711 : vector<8x32xf32>
    %cst_203 = arith.constant 1.000000e+00 : f32
    %713 = vector.broadcast %cst_203 : f32 to vector<8x32xf32>
    %714 = arith.addf %713, %712 : vector<8x32xf32>
    %715 = arith.divf %713, %714 : vector<8x32xf32>
    %716 = vector.extract_strided_slice %644 {offsets = [8, 0], sizes = [8, 32], strides = [1, 1]} : vector<64x32xf32> to vector<8x32xf32>
    %717 = arith.mulf %708, %701 : vector<8x32xf32>
    %718 = arith.addf %716, %717 : vector<8x32xf32>
    %719 = math.tanh %718 : vector<8x32xf32>
    %cst_204 = arith.constant 1.000000e+00 : f32
    %720 = vector.broadcast %cst_204 : f32 to vector<8x32xf32>
    %721 = arith.subf %720, %715 : vector<8x32xf32>
    %722 = arith.mulf %721, %719 : vector<8x32xf32>
    %723 = arith.mulf %715, %692 : vector<8x32xf32>
    %724 = arith.addf %722, %723 : vector<8x32xf32>
    %725 = vector.shape_cast %629 : vector<8x1xi1> to vector<8x1xi1>
    %726 = vector.broadcast %725 : vector<8x1xi1> to vector<8x32xi1>
    %727 = arith.select %726, %724, %692 : vector<8x32xi1>, vector<8x32xf32>
    %cst_205 = arith.constant dense<0.000000e+00> : vector<8x32xf32>
    %728 = tpu.matmul %727, %646, %cst_205 {dimension_numbers = #tpu.dot_dimension_numbers<[1], [0], [0], [1], [0, 0, 1, 1], [], []>} : vector<8x32xf32>, vector<32x32xf32>, vector<8x32xf32> -> vector<8x32xf32>
    %729 = vector.broadcast %652 : vector<1x32xf32> to vector<8x32xf32>
    %730 = arith.addf %728, %729 : vector<8x32xf32>
    %cst_206 = arith.constant dense<0.000000e+00> : vector<8x32xf32>
    %731 = tpu.matmul %727, %648, %cst_206 {dimension_numbers = #tpu.dot_dimension_numbers<[1], [0], [0], [1], [0, 0, 1, 1], [], []>} : vector<8x32xf32>, vector<32x32xf32>, vector<8x32xf32> -> vector<8x32xf32>
    %732 = vector.broadcast %654 : vector<1x32xf32> to vector<8x32xf32>
    %733 = arith.addf %731, %732 : vector<8x32xf32>
    %cst_207 = arith.constant dense<0.000000e+00> : vector<8x32xf32>
    %734 = tpu.matmul %727, %650, %cst_207 {dimension_numbers = #tpu.dot_dimension_numbers<[1], [0], [0], [1], [0, 0, 1, 1], [], []>} : vector<8x32xf32>, vector<32x32xf32>, vector<8x32xf32> -> vector<8x32xf32>
    %735 = vector.broadcast %656 : vector<1x32xf32> to vector<8x32xf32>
    %736 = arith.addf %734, %735 : vector<8x32xf32>
    %737 = vector.extract_strided_slice %642 {offsets = [16, 0], sizes = [8, 32], strides = [1, 1]} : vector<64x32xf32> to vector<8x32xf32>
    %738 = arith.addf %737, %730 : vector<8x32xf32>
    %739 = arith.negf %738 : vector<8x32xf32>
    %740 = math.exp %739 : vector<8x32xf32>
    %cst_208 = arith.constant 1.000000e+00 : f32
    %741 = vector.broadcast %cst_208 : f32 to vector<8x32xf32>
    %742 = arith.addf %741, %740 : vector<8x32xf32>
    %743 = arith.divf %741, %742 : vector<8x32xf32>
    %744 = vector.extract_strided_slice %643 {offsets = [16, 0], sizes = [8, 32], strides = [1, 1]} : vector<64x32xf32> to vector<8x32xf32>
    %745 = arith.addf %744, %733 : vector<8x32xf32>
    %746 = arith.negf %745 : vector<8x32xf32>
    %747 = math.exp %746 : vector<8x32xf32>
    %cst_209 = arith.constant 1.000000e+00 : f32
    %748 = vector.broadcast %cst_209 : f32 to vector<8x32xf32>
    %749 = arith.addf %748, %747 : vector<8x32xf32>
    %750 = arith.divf %748, %749 : vector<8x32xf32>
    %751 = vector.extract_strided_slice %644 {offsets = [16, 0], sizes = [8, 32], strides = [1, 1]} : vector<64x32xf32> to vector<8x32xf32>
    %752 = arith.mulf %743, %736 : vector<8x32xf32>
    %753 = arith.addf %751, %752 : vector<8x32xf32>
    %754 = math.tanh %753 : vector<8x32xf32>
    %cst_210 = arith.constant 1.000000e+00 : f32
    %755 = vector.broadcast %cst_210 : f32 to vector<8x32xf32>
    %756 = arith.subf %755, %750 : vector<8x32xf32>
    %757 = arith.mulf %756, %754 : vector<8x32xf32>
    %758 = arith.mulf %750, %727 : vector<8x32xf32>
    %759 = arith.addf %757, %758 : vector<8x32xf32>
    %760 = vector.shape_cast %631 : vector<8x1xi1> to vector<8x1xi1>
    %761 = vector.broadcast %760 : vector<8x1xi1> to vector<8x32xi1>
    %762 = arith.select %761, %759, %727 : vector<8x32xi1>, vector<8x32xf32>
    %cst_211 = arith.constant dense<0.000000e+00> : vector<8x32xf32>
    %763 = tpu.matmul %762, %646, %cst_211 {dimension_numbers = #tpu.dot_dimension_numbers<[1], [0], [0], [1], [0, 0, 1, 1], [], []>} : vector<8x32xf32>, vector<32x32xf32>, vector<8x32xf32> -> vector<8x32xf32>
    %764 = vector.broadcast %652 : vector<1x32xf32> to vector<8x32xf32>
    %765 = arith.addf %763, %764 : vector<8x32xf32>
    %cst_212 = arith.constant dense<0.000000e+00> : vector<8x32xf32>
    %766 = tpu.matmul %762, %648, %cst_212 {dimension_numbers = #tpu.dot_dimension_numbers<[1], [0], [0], [1], [0, 0, 1, 1], [], []>} : vector<8x32xf32>, vector<32x32xf32>, vector<8x32xf32> -> vector<8x32xf32>
    %767 = vector.broadcast %654 : vector<1x32xf32> to vector<8x32xf32>
    %768 = arith.addf %766, %767 : vector<8x32xf32>
    %cst_213 = arith.constant dense<0.000000e+00> : vector<8x32xf32>
    %769 = tpu.matmul %762, %650, %cst_213 {dimension_numbers = #tpu.dot_dimension_numbers<[1], [0], [0], [1], [0, 0, 1, 1], [], []>} : vector<8x32xf32>, vector<32x32xf32>, vector<8x32xf32> -> vector<8x32xf32>
    %770 = vector.broadcast %656 : vector<1x32xf32> to vector<8x32xf32>
    %771 = arith.addf %769, %770 : vector<8x32xf32>
    %772 = vector.extract_strided_slice %642 {offsets = [24, 0], sizes = [8, 32], strides = [1, 1]} : vector<64x32xf32> to vector<8x32xf32>
    %773 = arith.addf %772, %765 : vector<8x32xf32>
    %774 = arith.negf %773 : vector<8x32xf32>
    %775 = math.exp %774 : vector<8x32xf32>
    %cst_214 = arith.constant 1.000000e+00 : f32
    %776 = vector.broadcast %cst_214 : f32 to vector<8x32xf32>
    %777 = arith.addf %776, %775 : vector<8x32xf32>
    %778 = arith.divf %776, %777 : vector<8x32xf32>
    %779 = vector.extract_strided_slice %643 {offsets = [24, 0], sizes = [8, 32], strides = [1, 1]} : vector<64x32xf32> to vector<8x32xf32>
    %780 = arith.addf %779, %768 : vector<8x32xf32>
    %781 = arith.negf %780 : vector<8x32xf32>
    %782 = math.exp %781 : vector<8x32xf32>
    %cst_215 = arith.constant 1.000000e+00 : f32
    %783 = vector.broadcast %cst_215 : f32 to vector<8x32xf32>
    %784 = arith.addf %783, %782 : vector<8x32xf32>
    %785 = arith.divf %783, %784 : vector<8x32xf32>
    %786 = vector.extract_strided_slice %644 {offsets = [24, 0], sizes = [8, 32], strides = [1, 1]} : vector<64x32xf32> to vector<8x32xf32>
    %787 = arith.mulf %778, %771 : vector<8x32xf32>
    %788 = arith.addf %786, %787 : vector<8x32xf32>
    %789 = math.tanh %788 : vector<8x32xf32>
    %cst_216 = arith.constant 1.000000e+00 : f32
    %790 = vector.broadcast %cst_216 : f32 to vector<8x32xf32>
    %791 = arith.subf %790, %785 : vector<8x32xf32>
    %792 = arith.mulf %791, %789 : vector<8x32xf32>
    %793 = arith.mulf %785, %762 : vector<8x32xf32>
    %794 = arith.addf %792, %793 : vector<8x32xf32>
    %795 = vector.shape_cast %633 : vector<8x1xi1> to vector<8x1xi1>
    %796 = vector.broadcast %795 : vector<8x1xi1> to vector<8x32xi1>
    %797 = arith.select %796, %794, %762 : vector<8x32xi1>, vector<8x32xf32>
    %cst_217 = arith.constant dense<0.000000e+00> : vector<8x32xf32>
    %798 = tpu.matmul %797, %646, %cst_217 {dimension_numbers = #tpu.dot_dimension_numbers<[1], [0], [0], [1], [0, 0, 1, 1], [], []>} : vector<8x32xf32>, vector<32x32xf32>, vector<8x32xf32> -> vector<8x32xf32>
    %799 = vector.broadcast %652 : vector<1x32xf32> to vector<8x32xf32>
    %800 = arith.addf %798, %799 : vector<8x32xf32>
    %cst_218 = arith.constant dense<0.000000e+00> : vector<8x32xf32>
    %801 = tpu.matmul %797, %648, %cst_218 {dimension_numbers = #tpu.dot_dimension_numbers<[1], [0], [0], [1], [0, 0, 1, 1], [], []>} : vector<8x32xf32>, vector<32x32xf32>, vector<8x32xf32> -> vector<8x32xf32>
    %802 = vector.broadcast %654 : vector<1x32xf32> to vector<8x32xf32>
    %803 = arith.addf %801, %802 : vector<8x32xf32>
    %cst_219 = arith.constant dense<0.000000e+00> : vector<8x32xf32>
    %804 = tpu.matmul %797, %650, %cst_219 {dimension_numbers = #tpu.dot_dimension_numbers<[1], [0], [0], [1], [0, 0, 1, 1], [], []>} : vector<8x32xf32>, vector<32x32xf32>, vector<8x32xf32> -> vector<8x32xf32>
    %805 = vector.broadcast %656 : vector<1x32xf32> to vector<8x32xf32>
    %806 = arith.addf %804, %805 : vector<8x32xf32>
    %807 = vector.extract_strided_slice %642 {offsets = [32, 0], sizes = [8, 32], strides = [1, 1]} : vector<64x32xf32> to vector<8x32xf32>
    %808 = arith.addf %807, %800 : vector<8x32xf32>
    %809 = arith.negf %808 : vector<8x32xf32>
    %810 = math.exp %809 : vector<8x32xf32>
    %cst_220 = arith.constant 1.000000e+00 : f32
    %811 = vector.broadcast %cst_220 : f32 to vector<8x32xf32>
    %812 = arith.addf %811, %810 : vector<8x32xf32>
    %813 = arith.divf %811, %812 : vector<8x32xf32>
    %814 = vector.extract_strided_slice %643 {offsets = [32, 0], sizes = [8, 32], strides = [1, 1]} : vector<64x32xf32> to vector<8x32xf32>
    %815 = arith.addf %814, %803 : vector<8x32xf32>
    %816 = arith.negf %815 : vector<8x32xf32>
    %817 = math.exp %816 : vector<8x32xf32>
    %cst_221 = arith.constant 1.000000e+00 : f32
    %818 = vector.broadcast %cst_221 : f32 to vector<8x32xf32>
    %819 = arith.addf %818, %817 : vector<8x32xf32>
    %820 = arith.divf %818, %819 : vector<8x32xf32>
    %821 = vector.extract_strided_slice %644 {offsets = [32, 0], sizes = [8, 32], strides = [1, 1]} : vector<64x32xf32> to vector<8x32xf32>
    %822 = arith.mulf %813, %806 : vector<8x32xf32>
    %823 = arith.addf %821, %822 : vector<8x32xf32>
    %824 = math.tanh %823 : vector<8x32xf32>
    %cst_222 = arith.constant 1.000000e+00 : f32
    %825 = vector.broadcast %cst_222 : f32 to vector<8x32xf32>
    %826 = arith.subf %825, %820 : vector<8x32xf32>
    %827 = arith.mulf %826, %824 : vector<8x32xf32>
    %828 = arith.mulf %820, %797 : vector<8x32xf32>
    %829 = arith.addf %827, %828 : vector<8x32xf32>
    %830 = vector.shape_cast %635 : vector<8x1xi1> to vector<8x1xi1>
    %831 = vector.broadcast %830 : vector<8x1xi1> to vector<8x32xi1>
    %832 = arith.select %831, %829, %797 : vector<8x32xi1>, vector<8x32xf32>
    %cst_223 = arith.constant dense<0.000000e+00> : vector<8x32xf32>
    %833 = tpu.matmul %832, %646, %cst_223 {dimension_numbers = #tpu.dot_dimension_numbers<[1], [0], [0], [1], [0, 0, 1, 1], [], []>} : vector<8x32xf32>, vector<32x32xf32>, vector<8x32xf32> -> vector<8x32xf32>
    %834 = vector.broadcast %652 : vector<1x32xf32> to vector<8x32xf32>
    %835 = arith.addf %833, %834 : vector<8x32xf32>
    %cst_224 = arith.constant dense<0.000000e+00> : vector<8x32xf32>
    %836 = tpu.matmul %832, %648, %cst_224 {dimension_numbers = #tpu.dot_dimension_numbers<[1], [0], [0], [1], [0, 0, 1, 1], [], []>} : vector<8x32xf32>, vector<32x32xf32>, vector<8x32xf32> -> vector<8x32xf32>
    %837 = vector.broadcast %654 : vector<1x32xf32> to vector<8x32xf32>
    %838 = arith.addf %836, %837 : vector<8x32xf32>
    %cst_225 = arith.constant dense<0.000000e+00> : vector<8x32xf32>
    %839 = tpu.matmul %832, %650, %cst_225 {dimension_numbers = #tpu.dot_dimension_numbers<[1], [0], [0], [1], [0, 0, 1, 1], [], []>} : vector<8x32xf32>, vector<32x32xf32>, vector<8x32xf32> -> vector<8x32xf32>
    %840 = vector.broadcast %656 : vector<1x32xf32> to vector<8x32xf32>
    %841 = arith.addf %839, %840 : vector<8x32xf32>
    %842 = vector.extract_strided_slice %642 {offsets = [40, 0], sizes = [8, 32], strides = [1, 1]} : vector<64x32xf32> to vector<8x32xf32>
    %843 = arith.addf %842, %835 : vector<8x32xf32>
    %844 = arith.negf %843 : vector<8x32xf32>
    %845 = math.exp %844 : vector<8x32xf32>
    %cst_226 = arith.constant 1.000000e+00 : f32
    %846 = vector.broadcast %cst_226 : f32 to vector<8x32xf32>
    %847 = arith.addf %846, %845 : vector<8x32xf32>
    %848 = arith.divf %846, %847 : vector<8x32xf32>
    %849 = vector.extract_strided_slice %643 {offsets = [40, 0], sizes = [8, 32], strides = [1, 1]} : vector<64x32xf32> to vector<8x32xf32>
    %850 = arith.addf %849, %838 : vector<8x32xf32>
    %851 = arith.negf %850 : vector<8x32xf32>
    %852 = math.exp %851 : vector<8x32xf32>
    %cst_227 = arith.constant 1.000000e+00 : f32
    %853 = vector.broadcast %cst_227 : f32 to vector<8x32xf32>
    %854 = arith.addf %853, %852 : vector<8x32xf32>
    %855 = arith.divf %853, %854 : vector<8x32xf32>
    %856 = vector.extract_strided_slice %644 {offsets = [40, 0], sizes = [8, 32], strides = [1, 1]} : vector<64x32xf32> to vector<8x32xf32>
    %857 = arith.mulf %848, %841 : vector<8x32xf32>
    %858 = arith.addf %856, %857 : vector<8x32xf32>
    %859 = math.tanh %858 : vector<8x32xf32>
    %cst_228 = arith.constant 1.000000e+00 : f32
    %860 = vector.broadcast %cst_228 : f32 to vector<8x32xf32>
    %861 = arith.subf %860, %855 : vector<8x32xf32>
    %862 = arith.mulf %861, %859 : vector<8x32xf32>
    %863 = arith.mulf %855, %832 : vector<8x32xf32>
    %864 = arith.addf %862, %863 : vector<8x32xf32>
    %865 = vector.shape_cast %637 : vector<8x1xi1> to vector<8x1xi1>
    %866 = vector.broadcast %865 : vector<8x1xi1> to vector<8x32xi1>
    %867 = arith.select %866, %864, %832 : vector<8x32xi1>, vector<8x32xf32>
    %cst_229 = arith.constant dense<0.000000e+00> : vector<8x32xf32>
    %868 = tpu.matmul %867, %646, %cst_229 {dimension_numbers = #tpu.dot_dimension_numbers<[1], [0], [0], [1], [0, 0, 1, 1], [], []>} : vector<8x32xf32>, vector<32x32xf32>, vector<8x32xf32> -> vector<8x32xf32>
    %869 = vector.broadcast %652 : vector<1x32xf32> to vector<8x32xf32>
    %870 = arith.addf %868, %869 : vector<8x32xf32>
    %cst_230 = arith.constant dense<0.000000e+00> : vector<8x32xf32>
    %871 = tpu.matmul %867, %648, %cst_230 {dimension_numbers = #tpu.dot_dimension_numbers<[1], [0], [0], [1], [0, 0, 1, 1], [], []>} : vector<8x32xf32>, vector<32x32xf32>, vector<8x32xf32> -> vector<8x32xf32>
    %872 = vector.broadcast %654 : vector<1x32xf32> to vector<8x32xf32>
    %873 = arith.addf %871, %872 : vector<8x32xf32>
    %cst_231 = arith.constant dense<0.000000e+00> : vector<8x32xf32>
    %874 = tpu.matmul %867, %650, %cst_231 {dimension_numbers = #tpu.dot_dimension_numbers<[1], [0], [0], [1], [0, 0, 1, 1], [], []>} : vector<8x32xf32>, vector<32x32xf32>, vector<8x32xf32> -> vector<8x32xf32>
    %875 = vector.broadcast %656 : vector<1x32xf32> to vector<8x32xf32>
    %876 = arith.addf %874, %875 : vector<8x32xf32>
    %877 = vector.extract_strided_slice %642 {offsets = [48, 0], sizes = [8, 32], strides = [1, 1]} : vector<64x32xf32> to vector<8x32xf32>
    %878 = arith.addf %877, %870 : vector<8x32xf32>
    %879 = arith.negf %878 : vector<8x32xf32>
    %880 = math.exp %879 : vector<8x32xf32>
    %cst_232 = arith.constant 1.000000e+00 : f32
    %881 = vector.broadcast %cst_232 : f32 to vector<8x32xf32>
    %882 = arith.addf %881, %880 : vector<8x32xf32>
    %883 = arith.divf %881, %882 : vector<8x32xf32>
    %884 = vector.extract_strided_slice %643 {offsets = [48, 0], sizes = [8, 32], strides = [1, 1]} : vector<64x32xf32> to vector<8x32xf32>
    %885 = arith.addf %884, %873 : vector<8x32xf32>
    %886 = arith.negf %885 : vector<8x32xf32>
    %887 = math.exp %886 : vector<8x32xf32>
    %cst_233 = arith.constant 1.000000e+00 : f32
    %888 = vector.broadcast %cst_233 : f32 to vector<8x32xf32>
    %889 = arith.addf %888, %887 : vector<8x32xf32>
    %890 = arith.divf %888, %889 : vector<8x32xf32>
    %891 = vector.extract_strided_slice %644 {offsets = [48, 0], sizes = [8, 32], strides = [1, 1]} : vector<64x32xf32> to vector<8x32xf32>
    %892 = arith.mulf %883, %876 : vector<8x32xf32>
    %893 = arith.addf %891, %892 : vector<8x32xf32>
    %894 = math.tanh %893 : vector<8x32xf32>
    %cst_234 = arith.constant 1.000000e+00 : f32
    %895 = vector.broadcast %cst_234 : f32 to vector<8x32xf32>
    %896 = arith.subf %895, %890 : vector<8x32xf32>
    %897 = arith.mulf %896, %894 : vector<8x32xf32>
    %898 = arith.mulf %890, %867 : vector<8x32xf32>
    %899 = arith.addf %897, %898 : vector<8x32xf32>
    %900 = vector.shape_cast %639 : vector<8x1xi1> to vector<8x1xi1>
    %901 = vector.broadcast %900 : vector<8x1xi1> to vector<8x32xi1>
    %902 = arith.select %901, %899, %867 : vector<8x32xi1>, vector<8x32xf32>
    %cst_235 = arith.constant dense<0.000000e+00> : vector<8x32xf32>
    %903 = tpu.matmul %902, %646, %cst_235 {dimension_numbers = #tpu.dot_dimension_numbers<[1], [0], [0], [1], [0, 0, 1, 1], [], []>} : vector<8x32xf32>, vector<32x32xf32>, vector<8x32xf32> -> vector<8x32xf32>
    %904 = vector.broadcast %652 : vector<1x32xf32> to vector<8x32xf32>
    %905 = arith.addf %903, %904 : vector<8x32xf32>
    %cst_236 = arith.constant dense<0.000000e+00> : vector<8x32xf32>
    %906 = tpu.matmul %902, %648, %cst_236 {dimension_numbers = #tpu.dot_dimension_numbers<[1], [0], [0], [1], [0, 0, 1, 1], [], []>} : vector<8x32xf32>, vector<32x32xf32>, vector<8x32xf32> -> vector<8x32xf32>
    %907 = vector.broadcast %654 : vector<1x32xf32> to vector<8x32xf32>
    %908 = arith.addf %906, %907 : vector<8x32xf32>
    %cst_237 = arith.constant dense<0.000000e+00> : vector<8x32xf32>
    %909 = tpu.matmul %902, %650, %cst_237 {dimension_numbers = #tpu.dot_dimension_numbers<[1], [0], [0], [1], [0, 0, 1, 1], [], []>} : vector<8x32xf32>, vector<32x32xf32>, vector<8x32xf32> -> vector<8x32xf32>
    %910 = vector.broadcast %656 : vector<1x32xf32> to vector<8x32xf32>
    %911 = arith.addf %909, %910 : vector<8x32xf32>
    %912 = vector.extract_strided_slice %642 {offsets = [56, 0], sizes = [8, 32], strides = [1, 1]} : vector<64x32xf32> to vector<8x32xf32>
    %913 = arith.addf %912, %905 : vector<8x32xf32>
    %914 = arith.negf %913 : vector<8x32xf32>
    %915 = math.exp %914 : vector<8x32xf32>
    %cst_238 = arith.constant 1.000000e+00 : f32
    %916 = vector.broadcast %cst_238 : f32 to vector<8x32xf32>
    %917 = arith.addf %916, %915 : vector<8x32xf32>
    %918 = arith.divf %916, %917 : vector<8x32xf32>
    %919 = vector.extract_strided_slice %643 {offsets = [56, 0], sizes = [8, 32], strides = [1, 1]} : vector<64x32xf32> to vector<8x32xf32>
    %920 = arith.addf %919, %908 : vector<8x32xf32>
    %921 = arith.negf %920 : vector<8x32xf32>
    %922 = math.exp %921 : vector<8x32xf32>
    %cst_239 = arith.constant 1.000000e+00 : f32
    %923 = vector.broadcast %cst_239 : f32 to vector<8x32xf32>
    %924 = arith.addf %923, %922 : vector<8x32xf32>
    %925 = arith.divf %923, %924 : vector<8x32xf32>
    %926 = vector.extract_strided_slice %644 {offsets = [56, 0], sizes = [8, 32], strides = [1, 1]} : vector<64x32xf32> to vector<8x32xf32>
    %927 = arith.mulf %918, %911 : vector<8x32xf32>
    %928 = arith.addf %926, %927 : vector<8x32xf32>
    %929 = math.tanh %928 : vector<8x32xf32>
    %cst_240 = arith.constant 1.000000e+00 : f32
    %930 = vector.broadcast %cst_240 : f32 to vector<8x32xf32>
    %931 = arith.subf %930, %925 : vector<8x32xf32>
    %932 = arith.mulf %931, %929 : vector<8x32xf32>
    %933 = arith.mulf %925, %902 : vector<8x32xf32>
    %934 = arith.addf %932, %933 : vector<8x32xf32>
    %935 = vector.shape_cast %641 : vector<8x1xi1> to vector<8x1xi1>
    %936 = vector.broadcast %935 : vector<8x1xi1> to vector<8x32xi1>
    %937 = arith.select %936, %934, %902 : vector<8x32xi1>, vector<8x32xf32>
    %938 = vector.extract_strided_slice %625 {offsets = [0, 96], sizes = [64, 32], strides = [1, 1]} : vector<64x192xf32> to vector<64x32xf32>
    %939 = vector.extract_strided_slice %625 {offsets = [0, 128], sizes = [64, 32], strides = [1, 1]} : vector<64x192xf32> to vector<64x32xf32>
    %940 = vector.extract_strided_slice %625 {offsets = [0, 160], sizes = [64, 32], strides = [1, 1]} : vector<64x192xf32> to vector<64x32xf32>
    %c1_241 = arith.constant 1 : index
    %c0_242 = arith.constant 0 : index
    %c0_243 = arith.constant 0 : index
    %c0_244 = arith.constant 0 : index
    %941 = vector.load %arg10[%c1_241, %c0_242, %c0_243, %c0_244] : memref<2x3x32x32xf32, #tpu.memory_space<vmem>>, vector<1x1x32x32xf32>
    %942 = vector.shape_cast %941 : vector<1x1x32x32xf32> to vector<32x32xf32>
    %c1_245 = arith.constant 1 : index
    %c1_246 = arith.constant 1 : index
    %c0_247 = arith.constant 0 : index
    %c0_248 = arith.constant 0 : index
    %943 = vector.load %arg10[%c1_245, %c1_246, %c0_247, %c0_248] : memref<2x3x32x32xf32, #tpu.memory_space<vmem>>, vector<1x1x32x32xf32>
    %944 = vector.shape_cast %943 : vector<1x1x32x32xf32> to vector<32x32xf32>
    %c1_249 = arith.constant 1 : index
    %c2_250 = arith.constant 2 : index
    %c0_251 = arith.constant 0 : index
    %c0_252 = arith.constant 0 : index
    %945 = vector.load %arg10[%c1_249, %c2_250, %c0_251, %c0_252] : memref<2x3x32x32xf32, #tpu.memory_space<vmem>>, vector<1x1x32x32xf32>
    %946 = vector.shape_cast %945 : vector<1x1x32x32xf32> to vector<32x32xf32>
    %c1_253 = arith.constant 1 : index
    %c0_254 = arith.constant 0 : index
    %c0_255 = arith.constant 0 : index
    %c0_256 = arith.constant 0 : index
    %947 = vector.load %arg12[%c1_253, %c0_254, %c0_255, %c0_256] : memref<2x3x1x32xf32, #tpu.memory_space<vmem>>, vector<1x1x1x32xf32>
    %948 = vector.shape_cast %947 : vector<1x1x1x32xf32> to vector<1x32xf32>
    %c1_257 = arith.constant 1 : index
    %c1_258 = arith.constant 1 : index
    %c0_259 = arith.constant 0 : index
    %c0_260 = arith.constant 0 : index
    %949 = vector.load %arg12[%c1_257, %c1_258, %c0_259, %c0_260] : memref<2x3x1x32xf32, #tpu.memory_space<vmem>>, vector<1x1x1x32xf32>
    %950 = vector.shape_cast %949 : vector<1x1x1x32xf32> to vector<1x32xf32>
    %c1_261 = arith.constant 1 : index
    %c2_262 = arith.constant 2 : index
    %c0_263 = arith.constant 0 : index
    %c0_264 = arith.constant 0 : index
    %951 = vector.load %arg12[%c1_261, %c2_262, %c0_263, %c0_264] : memref<2x3x1x32xf32, #tpu.memory_space<vmem>>, vector<1x1x1x32xf32>
    %952 = vector.shape_cast %951 : vector<1x1x1x32xf32> to vector<1x32xf32>
    %cst_265 = arith.constant 0.000000e+00 : f32
    %953 = vector.broadcast %cst_265 : f32 to vector<8x32xf32>
    %cst_266 = arith.constant dense<0.000000e+00> : vector<8x32xf32>
    %954 = tpu.matmul %953, %942, %cst_266 {dimension_numbers = #tpu.dot_dimension_numbers<[1], [0], [0], [1], [0, 0, 1, 1], [], []>} : vector<8x32xf32>, vector<32x32xf32>, vector<8x32xf32> -> vector<8x32xf32>
    %955 = vector.broadcast %948 : vector<1x32xf32> to vector<8x32xf32>
    %956 = arith.addf %954, %955 : vector<8x32xf32>
    %cst_267 = arith.constant dense<0.000000e+00> : vector<8x32xf32>
    %957 = tpu.matmul %953, %944, %cst_267 {dimension_numbers = #tpu.dot_dimension_numbers<[1], [0], [0], [1], [0, 0, 1, 1], [], []>} : vector<8x32xf32>, vector<32x32xf32>, vector<8x32xf32> -> vector<8x32xf32>
    %958 = vector.broadcast %950 : vector<1x32xf32> to vector<8x32xf32>
    %959 = arith.addf %957, %958 : vector<8x32xf32>
    %cst_268 = arith.constant dense<0.000000e+00> : vector<8x32xf32>
    %960 = tpu.matmul %953, %946, %cst_268 {dimension_numbers = #tpu.dot_dimension_numbers<[1], [0], [0], [1], [0, 0, 1, 1], [], []>} : vector<8x32xf32>, vector<32x32xf32>, vector<8x32xf32> -> vector<8x32xf32>
    %961 = vector.broadcast %952 : vector<1x32xf32> to vector<8x32xf32>
    %962 = arith.addf %960, %961 : vector<8x32xf32>
    %963 = vector.extract_strided_slice %938 {offsets = [56, 0], sizes = [8, 32], strides = [1, 1]} : vector<64x32xf32> to vector<8x32xf32>
    %964 = arith.addf %963, %956 : vector<8x32xf32>
    %965 = arith.negf %964 : vector<8x32xf32>
    %966 = math.exp %965 : vector<8x32xf32>
    %cst_269 = arith.constant 1.000000e+00 : f32
    %967 = vector.broadcast %cst_269 : f32 to vector<8x32xf32>
    %968 = arith.addf %967, %966 : vector<8x32xf32>
    %969 = arith.divf %967, %968 : vector<8x32xf32>
    %970 = vector.extract_strided_slice %939 {offsets = [56, 0], sizes = [8, 32], strides = [1, 1]} : vector<64x32xf32> to vector<8x32xf32>
    %971 = arith.addf %970, %959 : vector<8x32xf32>
    %972 = arith.negf %971 : vector<8x32xf32>
    %973 = math.exp %972 : vector<8x32xf32>
    %cst_270 = arith.constant 1.000000e+00 : f32
    %974 = vector.broadcast %cst_270 : f32 to vector<8x32xf32>
    %975 = arith.addf %974, %973 : vector<8x32xf32>
    %976 = arith.divf %974, %975 : vector<8x32xf32>
    %977 = vector.extract_strided_slice %940 {offsets = [56, 0], sizes = [8, 32], strides = [1, 1]} : vector<64x32xf32> to vector<8x32xf32>
    %978 = arith.mulf %969, %962 : vector<8x32xf32>
    %979 = arith.addf %977, %978 : vector<8x32xf32>
    %980 = math.tanh %979 : vector<8x32xf32>
    %cst_271 = arith.constant 1.000000e+00 : f32
    %981 = vector.broadcast %cst_271 : f32 to vector<8x32xf32>
    %982 = arith.subf %981, %976 : vector<8x32xf32>
    %983 = arith.mulf %982, %980 : vector<8x32xf32>
    %984 = arith.mulf %976, %953 : vector<8x32xf32>
    %985 = arith.addf %983, %984 : vector<8x32xf32>
    %986 = vector.shape_cast %641 : vector<8x1xi1> to vector<8x1xi1>
    %987 = vector.broadcast %986 : vector<8x1xi1> to vector<8x32xi1>
    %988 = arith.select %987, %985, %953 : vector<8x32xi1>, vector<8x32xf32>
    %cst_272 = arith.constant dense<0.000000e+00> : vector<8x32xf32>
    %989 = tpu.matmul %988, %942, %cst_272 {dimension_numbers = #tpu.dot_dimension_numbers<[1], [0], [0], [1], [0, 0, 1, 1], [], []>} : vector<8x32xf32>, vector<32x32xf32>, vector<8x32xf32> -> vector<8x32xf32>
    %990 = vector.broadcast %948 : vector<1x32xf32> to vector<8x32xf32>
    %991 = arith.addf %989, %990 : vector<8x32xf32>
    %cst_273 = arith.constant dense<0.000000e+00> : vector<8x32xf32>
    %992 = tpu.matmul %988, %944, %cst_273 {dimension_numbers = #tpu.dot_dimension_numbers<[1], [0], [0], [1], [0, 0, 1, 1], [], []>} : vector<8x32xf32>, vector<32x32xf32>, vector<8x32xf32> -> vector<8x32xf32>
    %993 = vector.broadcast %950 : vector<1x32xf32> to vector<8x32xf32>
    %994 = arith.addf %992, %993 : vector<8x32xf32>
    %cst_274 = arith.constant dense<0.000000e+00> : vector<8x32xf32>
    %995 = tpu.matmul %988, %946, %cst_274 {dimension_numbers = #tpu.dot_dimension_numbers<[1], [0], [0], [1], [0, 0, 1, 1], [], []>} : vector<8x32xf32>, vector<32x32xf32>, vector<8x32xf32> -> vector<8x32xf32>
    %996 = vector.broadcast %952 : vector<1x32xf32> to vector<8x32xf32>
    %997 = arith.addf %995, %996 : vector<8x32xf32>
    %998 = vector.extract_strided_slice %938 {offsets = [48, 0], sizes = [8, 32], strides = [1, 1]} : vector<64x32xf32> to vector<8x32xf32>
    %999 = arith.addf %998, %991 : vector<8x32xf32>
    %1000 = arith.negf %999 : vector<8x32xf32>
    %1001 = math.exp %1000 : vector<8x32xf32>
    %cst_275 = arith.constant 1.000000e+00 : f32
    %1002 = vector.broadcast %cst_275 : f32 to vector<8x32xf32>
    %1003 = arith.addf %1002, %1001 : vector<8x32xf32>
    %1004 = arith.divf %1002, %1003 : vector<8x32xf32>
    %1005 = vector.extract_strided_slice %939 {offsets = [48, 0], sizes = [8, 32], strides = [1, 1]} : vector<64x32xf32> to vector<8x32xf32>
    %1006 = arith.addf %1005, %994 : vector<8x32xf32>
    %1007 = arith.negf %1006 : vector<8x32xf32>
    %1008 = math.exp %1007 : vector<8x32xf32>
    %cst_276 = arith.constant 1.000000e+00 : f32
    %1009 = vector.broadcast %cst_276 : f32 to vector<8x32xf32>
    %1010 = arith.addf %1009, %1008 : vector<8x32xf32>
    %1011 = arith.divf %1009, %1010 : vector<8x32xf32>
    %1012 = vector.extract_strided_slice %940 {offsets = [48, 0], sizes = [8, 32], strides = [1, 1]} : vector<64x32xf32> to vector<8x32xf32>
    %1013 = arith.mulf %1004, %997 : vector<8x32xf32>
    %1014 = arith.addf %1012, %1013 : vector<8x32xf32>
    %1015 = math.tanh %1014 : vector<8x32xf32>
    %cst_277 = arith.constant 1.000000e+00 : f32
    %1016 = vector.broadcast %cst_277 : f32 to vector<8x32xf32>
    %1017 = arith.subf %1016, %1011 : vector<8x32xf32>
    %1018 = arith.mulf %1017, %1015 : vector<8x32xf32>
    %1019 = arith.mulf %1011, %988 : vector<8x32xf32>
    %1020 = arith.addf %1018, %1019 : vector<8x32xf32>
    %1021 = vector.shape_cast %639 : vector<8x1xi1> to vector<8x1xi1>
    %1022 = vector.broadcast %1021 : vector<8x1xi1> to vector<8x32xi1>
    %1023 = arith.select %1022, %1020, %988 : vector<8x32xi1>, vector<8x32xf32>
    %cst_278 = arith.constant dense<0.000000e+00> : vector<8x32xf32>
    %1024 = tpu.matmul %1023, %942, %cst_278 {dimension_numbers = #tpu.dot_dimension_numbers<[1], [0], [0], [1], [0, 0, 1, 1], [], []>} : vector<8x32xf32>, vector<32x32xf32>, vector<8x32xf32> -> vector<8x32xf32>
    %1025 = vector.broadcast %948 : vector<1x32xf32> to vector<8x32xf32>
    %1026 = arith.addf %1024, %1025 : vector<8x32xf32>
    %cst_279 = arith.constant dense<0.000000e+00> : vector<8x32xf32>
    %1027 = tpu.matmul %1023, %944, %cst_279 {dimension_numbers = #tpu.dot_dimension_numbers<[1], [0], [0], [1], [0, 0, 1, 1], [], []>} : vector<8x32xf32>, vector<32x32xf32>, vector<8x32xf32> -> vector<8x32xf32>
    %1028 = vector.broadcast %950 : vector<1x32xf32> to vector<8x32xf32>
    %1029 = arith.addf %1027, %1028 : vector<8x32xf32>
    %cst_280 = arith.constant dense<0.000000e+00> : vector<8x32xf32>
    %1030 = tpu.matmul %1023, %946, %cst_280 {dimension_numbers = #tpu.dot_dimension_numbers<[1], [0], [0], [1], [0, 0, 1, 1], [], []>} : vector<8x32xf32>, vector<32x32xf32>, vector<8x32xf32> -> vector<8x32xf32>
    %1031 = vector.broadcast %952 : vector<1x32xf32> to vector<8x32xf32>
    %1032 = arith.addf %1030, %1031 : vector<8x32xf32>
    %1033 = vector.extract_strided_slice %938 {offsets = [40, 0], sizes = [8, 32], strides = [1, 1]} : vector<64x32xf32> to vector<8x32xf32>
    %1034 = arith.addf %1033, %1026 : vector<8x32xf32>
    %1035 = arith.negf %1034 : vector<8x32xf32>
    %1036 = math.exp %1035 : vector<8x32xf32>
    %cst_281 = arith.constant 1.000000e+00 : f32
    %1037 = vector.broadcast %cst_281 : f32 to vector<8x32xf32>
    %1038 = arith.addf %1037, %1036 : vector<8x32xf32>
    %1039 = arith.divf %1037, %1038 : vector<8x32xf32>
    %1040 = vector.extract_strided_slice %939 {offsets = [40, 0], sizes = [8, 32], strides = [1, 1]} : vector<64x32xf32> to vector<8x32xf32>
    %1041 = arith.addf %1040, %1029 : vector<8x32xf32>
    %1042 = arith.negf %1041 : vector<8x32xf32>
    %1043 = math.exp %1042 : vector<8x32xf32>
    %cst_282 = arith.constant 1.000000e+00 : f32
    %1044 = vector.broadcast %cst_282 : f32 to vector<8x32xf32>
    %1045 = arith.addf %1044, %1043 : vector<8x32xf32>
    %1046 = arith.divf %1044, %1045 : vector<8x32xf32>
    %1047 = vector.extract_strided_slice %940 {offsets = [40, 0], sizes = [8, 32], strides = [1, 1]} : vector<64x32xf32> to vector<8x32xf32>
    %1048 = arith.mulf %1039, %1032 : vector<8x32xf32>
    %1049 = arith.addf %1047, %1048 : vector<8x32xf32>
    %1050 = math.tanh %1049 : vector<8x32xf32>
    %cst_283 = arith.constant 1.000000e+00 : f32
    %1051 = vector.broadcast %cst_283 : f32 to vector<8x32xf32>
    %1052 = arith.subf %1051, %1046 : vector<8x32xf32>
    %1053 = arith.mulf %1052, %1050 : vector<8x32xf32>
    %1054 = arith.mulf %1046, %1023 : vector<8x32xf32>
    %1055 = arith.addf %1053, %1054 : vector<8x32xf32>
    %1056 = vector.shape_cast %637 : vector<8x1xi1> to vector<8x1xi1>
    %1057 = vector.broadcast %1056 : vector<8x1xi1> to vector<8x32xi1>
    %1058 = arith.select %1057, %1055, %1023 : vector<8x32xi1>, vector<8x32xf32>
    %cst_284 = arith.constant dense<0.000000e+00> : vector<8x32xf32>
    %1059 = tpu.matmul %1058, %942, %cst_284 {dimension_numbers = #tpu.dot_dimension_numbers<[1], [0], [0], [1], [0, 0, 1, 1], [], []>} : vector<8x32xf32>, vector<32x32xf32>, vector<8x32xf32> -> vector<8x32xf32>
    %1060 = vector.broadcast %948 : vector<1x32xf32> to vector<8x32xf32>
    %1061 = arith.addf %1059, %1060 : vector<8x32xf32>
    %cst_285 = arith.constant dense<0.000000e+00> : vector<8x32xf32>
    %1062 = tpu.matmul %1058, %944, %cst_285 {dimension_numbers = #tpu.dot_dimension_numbers<[1], [0], [0], [1], [0, 0, 1, 1], [], []>} : vector<8x32xf32>, vector<32x32xf32>, vector<8x32xf32> -> vector<8x32xf32>
    %1063 = vector.broadcast %950 : vector<1x32xf32> to vector<8x32xf32>
    %1064 = arith.addf %1062, %1063 : vector<8x32xf32>
    %cst_286 = arith.constant dense<0.000000e+00> : vector<8x32xf32>
    %1065 = tpu.matmul %1058, %946, %cst_286 {dimension_numbers = #tpu.dot_dimension_numbers<[1], [0], [0], [1], [0, 0, 1, 1], [], []>} : vector<8x32xf32>, vector<32x32xf32>, vector<8x32xf32> -> vector<8x32xf32>
    %1066 = vector.broadcast %952 : vector<1x32xf32> to vector<8x32xf32>
    %1067 = arith.addf %1065, %1066 : vector<8x32xf32>
    %1068 = vector.extract_strided_slice %938 {offsets = [32, 0], sizes = [8, 32], strides = [1, 1]} : vector<64x32xf32> to vector<8x32xf32>
    %1069 = arith.addf %1068, %1061 : vector<8x32xf32>
    %1070 = arith.negf %1069 : vector<8x32xf32>
    %1071 = math.exp %1070 : vector<8x32xf32>
    %cst_287 = arith.constant 1.000000e+00 : f32
    %1072 = vector.broadcast %cst_287 : f32 to vector<8x32xf32>
    %1073 = arith.addf %1072, %1071 : vector<8x32xf32>
    %1074 = arith.divf %1072, %1073 : vector<8x32xf32>
    %1075 = vector.extract_strided_slice %939 {offsets = [32, 0], sizes = [8, 32], strides = [1, 1]} : vector<64x32xf32> to vector<8x32xf32>
    %1076 = arith.addf %1075, %1064 : vector<8x32xf32>
    %1077 = arith.negf %1076 : vector<8x32xf32>
    %1078 = math.exp %1077 : vector<8x32xf32>
    %cst_288 = arith.constant 1.000000e+00 : f32
    %1079 = vector.broadcast %cst_288 : f32 to vector<8x32xf32>
    %1080 = arith.addf %1079, %1078 : vector<8x32xf32>
    %1081 = arith.divf %1079, %1080 : vector<8x32xf32>
    %1082 = vector.extract_strided_slice %940 {offsets = [32, 0], sizes = [8, 32], strides = [1, 1]} : vector<64x32xf32> to vector<8x32xf32>
    %1083 = arith.mulf %1074, %1067 : vector<8x32xf32>
    %1084 = arith.addf %1082, %1083 : vector<8x32xf32>
    %1085 = math.tanh %1084 : vector<8x32xf32>
    %cst_289 = arith.constant 1.000000e+00 : f32
    %1086 = vector.broadcast %cst_289 : f32 to vector<8x32xf32>
    %1087 = arith.subf %1086, %1081 : vector<8x32xf32>
    %1088 = arith.mulf %1087, %1085 : vector<8x32xf32>
    %1089 = arith.mulf %1081, %1058 : vector<8x32xf32>
    %1090 = arith.addf %1088, %1089 : vector<8x32xf32>
    %1091 = vector.shape_cast %635 : vector<8x1xi1> to vector<8x1xi1>
    %1092 = vector.broadcast %1091 : vector<8x1xi1> to vector<8x32xi1>
    %1093 = arith.select %1092, %1090, %1058 : vector<8x32xi1>, vector<8x32xf32>
    %cst_290 = arith.constant dense<0.000000e+00> : vector<8x32xf32>
    %1094 = tpu.matmul %1093, %942, %cst_290 {dimension_numbers = #tpu.dot_dimension_numbers<[1], [0], [0], [1], [0, 0, 1, 1], [], []>} : vector<8x32xf32>, vector<32x32xf32>, vector<8x32xf32> -> vector<8x32xf32>
    %1095 = vector.broadcast %948 : vector<1x32xf32> to vector<8x32xf32>
    %1096 = arith.addf %1094, %1095 : vector<8x32xf32>
    %cst_291 = arith.constant dense<0.000000e+00> : vector<8x32xf32>
    %1097 = tpu.matmul %1093, %944, %cst_291 {dimension_numbers = #tpu.dot_dimension_numbers<[1], [0], [0], [1], [0, 0, 1, 1], [], []>} : vector<8x32xf32>, vector<32x32xf32>, vector<8x32xf32> -> vector<8x32xf32>
    %1098 = vector.broadcast %950 : vector<1x32xf32> to vector<8x32xf32>
    %1099 = arith.addf %1097, %1098 : vector<8x32xf32>
    %cst_292 = arith.constant dense<0.000000e+00> : vector<8x32xf32>
    %1100 = tpu.matmul %1093, %946, %cst_292 {dimension_numbers = #tpu.dot_dimension_numbers<[1], [0], [0], [1], [0, 0, 1, 1], [], []>} : vector<8x32xf32>, vector<32x32xf32>, vector<8x32xf32> -> vector<8x32xf32>
    %1101 = vector.broadcast %952 : vector<1x32xf32> to vector<8x32xf32>
    %1102 = arith.addf %1100, %1101 : vector<8x32xf32>
    %1103 = vector.extract_strided_slice %938 {offsets = [24, 0], sizes = [8, 32], strides = [1, 1]} : vector<64x32xf32> to vector<8x32xf32>
    %1104 = arith.addf %1103, %1096 : vector<8x32xf32>
    %1105 = arith.negf %1104 : vector<8x32xf32>
    %1106 = math.exp %1105 : vector<8x32xf32>
    %cst_293 = arith.constant 1.000000e+00 : f32
    %1107 = vector.broadcast %cst_293 : f32 to vector<8x32xf32>
    %1108 = arith.addf %1107, %1106 : vector<8x32xf32>
    %1109 = arith.divf %1107, %1108 : vector<8x32xf32>
    %1110 = vector.extract_strided_slice %939 {offsets = [24, 0], sizes = [8, 32], strides = [1, 1]} : vector<64x32xf32> to vector<8x32xf32>
    %1111 = arith.addf %1110, %1099 : vector<8x32xf32>
    %1112 = arith.negf %1111 : vector<8x32xf32>
    %1113 = math.exp %1112 : vector<8x32xf32>
    %cst_294 = arith.constant 1.000000e+00 : f32
    %1114 = vector.broadcast %cst_294 : f32 to vector<8x32xf32>
    %1115 = arith.addf %1114, %1113 : vector<8x32xf32>
    %1116 = arith.divf %1114, %1115 : vector<8x32xf32>
    %1117 = vector.extract_strided_slice %940 {offsets = [24, 0], sizes = [8, 32], strides = [1, 1]} : vector<64x32xf32> to vector<8x32xf32>
    %1118 = arith.mulf %1109, %1102 : vector<8x32xf32>
    %1119 = arith.addf %1117, %1118 : vector<8x32xf32>
    %1120 = math.tanh %1119 : vector<8x32xf32>
    %cst_295 = arith.constant 1.000000e+00 : f32
    %1121 = vector.broadcast %cst_295 : f32 to vector<8x32xf32>
    %1122 = arith.subf %1121, %1116 : vector<8x32xf32>
    %1123 = arith.mulf %1122, %1120 : vector<8x32xf32>
    %1124 = arith.mulf %1116, %1093 : vector<8x32xf32>
    %1125 = arith.addf %1123, %1124 : vector<8x32xf32>
    %1126 = vector.shape_cast %633 : vector<8x1xi1> to vector<8x1xi1>
    %1127 = vector.broadcast %1126 : vector<8x1xi1> to vector<8x32xi1>
    %1128 = arith.select %1127, %1125, %1093 : vector<8x32xi1>, vector<8x32xf32>
    %cst_296 = arith.constant dense<0.000000e+00> : vector<8x32xf32>
    %1129 = tpu.matmul %1128, %942, %cst_296 {dimension_numbers = #tpu.dot_dimension_numbers<[1], [0], [0], [1], [0, 0, 1, 1], [], []>} : vector<8x32xf32>, vector<32x32xf32>, vector<8x32xf32> -> vector<8x32xf32>
    %1130 = vector.broadcast %948 : vector<1x32xf32> to vector<8x32xf32>
    %1131 = arith.addf %1129, %1130 : vector<8x32xf32>
    %cst_297 = arith.constant dense<0.000000e+00> : vector<8x32xf32>
    %1132 = tpu.matmul %1128, %944, %cst_297 {dimension_numbers = #tpu.dot_dimension_numbers<[1], [0], [0], [1], [0, 0, 1, 1], [], []>} : vector<8x32xf32>, vector<32x32xf32>, vector<8x32xf32> -> vector<8x32xf32>
    %1133 = vector.broadcast %950 : vector<1x32xf32> to vector<8x32xf32>
    %1134 = arith.addf %1132, %1133 : vector<8x32xf32>
    %cst_298 = arith.constant dense<0.000000e+00> : vector<8x32xf32>
    %1135 = tpu.matmul %1128, %946, %cst_298 {dimension_numbers = #tpu.dot_dimension_numbers<[1], [0], [0], [1], [0, 0, 1, 1], [], []>} : vector<8x32xf32>, vector<32x32xf32>, vector<8x32xf32> -> vector<8x32xf32>
    %1136 = vector.broadcast %952 : vector<1x32xf32> to vector<8x32xf32>
    %1137 = arith.addf %1135, %1136 : vector<8x32xf32>
    %1138 = vector.extract_strided_slice %938 {offsets = [16, 0], sizes = [8, 32], strides = [1, 1]} : vector<64x32xf32> to vector<8x32xf32>
    %1139 = arith.addf %1138, %1131 : vector<8x32xf32>
    %1140 = arith.negf %1139 : vector<8x32xf32>
    %1141 = math.exp %1140 : vector<8x32xf32>
    %cst_299 = arith.constant 1.000000e+00 : f32
    %1142 = vector.broadcast %cst_299 : f32 to vector<8x32xf32>
    %1143 = arith.addf %1142, %1141 : vector<8x32xf32>
    %1144 = arith.divf %1142, %1143 : vector<8x32xf32>
    %1145 = vector.extract_strided_slice %939 {offsets = [16, 0], sizes = [8, 32], strides = [1, 1]} : vector<64x32xf32> to vector<8x32xf32>
    %1146 = arith.addf %1145, %1134 : vector<8x32xf32>
    %1147 = arith.negf %1146 : vector<8x32xf32>
    %1148 = math.exp %1147 : vector<8x32xf32>
    %cst_300 = arith.constant 1.000000e+00 : f32
    %1149 = vector.broadcast %cst_300 : f32 to vector<8x32xf32>
    %1150 = arith.addf %1149, %1148 : vector<8x32xf32>
    %1151 = arith.divf %1149, %1150 : vector<8x32xf32>
    %1152 = vector.extract_strided_slice %940 {offsets = [16, 0], sizes = [8, 32], strides = [1, 1]} : vector<64x32xf32> to vector<8x32xf32>
    %1153 = arith.mulf %1144, %1137 : vector<8x32xf32>
    %1154 = arith.addf %1152, %1153 : vector<8x32xf32>
    %1155 = math.tanh %1154 : vector<8x32xf32>
    %cst_301 = arith.constant 1.000000e+00 : f32
    %1156 = vector.broadcast %cst_301 : f32 to vector<8x32xf32>
    %1157 = arith.subf %1156, %1151 : vector<8x32xf32>
    %1158 = arith.mulf %1157, %1155 : vector<8x32xf32>
    %1159 = arith.mulf %1151, %1128 : vector<8x32xf32>
    %1160 = arith.addf %1158, %1159 : vector<8x32xf32>
    %1161 = vector.shape_cast %631 : vector<8x1xi1> to vector<8x1xi1>
    %1162 = vector.broadcast %1161 : vector<8x1xi1> to vector<8x32xi1>
    %1163 = arith.select %1162, %1160, %1128 : vector<8x32xi1>, vector<8x32xf32>
    %cst_302 = arith.constant dense<0.000000e+00> : vector<8x32xf32>
    %1164 = tpu.matmul %1163, %942, %cst_302 {dimension_numbers = #tpu.dot_dimension_numbers<[1], [0], [0], [1], [0, 0, 1, 1], [], []>} : vector<8x32xf32>, vector<32x32xf32>, vector<8x32xf32> -> vector<8x32xf32>
    %1165 = vector.broadcast %948 : vector<1x32xf32> to vector<8x32xf32>
    %1166 = arith.addf %1164, %1165 : vector<8x32xf32>
    %cst_303 = arith.constant dense<0.000000e+00> : vector<8x32xf32>
    %1167 = tpu.matmul %1163, %944, %cst_303 {dimension_numbers = #tpu.dot_dimension_numbers<[1], [0], [0], [1], [0, 0, 1, 1], [], []>} : vector<8x32xf32>, vector<32x32xf32>, vector<8x32xf32> -> vector<8x32xf32>
    %1168 = vector.broadcast %950 : vector<1x32xf32> to vector<8x32xf32>
    %1169 = arith.addf %1167, %1168 : vector<8x32xf32>
    %cst_304 = arith.constant dense<0.000000e+00> : vector<8x32xf32>
    %1170 = tpu.matmul %1163, %946, %cst_304 {dimension_numbers = #tpu.dot_dimension_numbers<[1], [0], [0], [1], [0, 0, 1, 1], [], []>} : vector<8x32xf32>, vector<32x32xf32>, vector<8x32xf32> -> vector<8x32xf32>
    %1171 = vector.broadcast %952 : vector<1x32xf32> to vector<8x32xf32>
    %1172 = arith.addf %1170, %1171 : vector<8x32xf32>
    %1173 = vector.extract_strided_slice %938 {offsets = [8, 0], sizes = [8, 32], strides = [1, 1]} : vector<64x32xf32> to vector<8x32xf32>
    %1174 = arith.addf %1173, %1166 : vector<8x32xf32>
    %1175 = arith.negf %1174 : vector<8x32xf32>
    %1176 = math.exp %1175 : vector<8x32xf32>
    %cst_305 = arith.constant 1.000000e+00 : f32
    %1177 = vector.broadcast %cst_305 : f32 to vector<8x32xf32>
    %1178 = arith.addf %1177, %1176 : vector<8x32xf32>
    %1179 = arith.divf %1177, %1178 : vector<8x32xf32>
    %1180 = vector.extract_strided_slice %939 {offsets = [8, 0], sizes = [8, 32], strides = [1, 1]} : vector<64x32xf32> to vector<8x32xf32>
    %1181 = arith.addf %1180, %1169 : vector<8x32xf32>
    %1182 = arith.negf %1181 : vector<8x32xf32>
    %1183 = math.exp %1182 : vector<8x32xf32>
    %cst_306 = arith.constant 1.000000e+00 : f32
    %1184 = vector.broadcast %cst_306 : f32 to vector<8x32xf32>
    %1185 = arith.addf %1184, %1183 : vector<8x32xf32>
    %1186 = arith.divf %1184, %1185 : vector<8x32xf32>
    %1187 = vector.extract_strided_slice %940 {offsets = [8, 0], sizes = [8, 32], strides = [1, 1]} : vector<64x32xf32> to vector<8x32xf32>
    %1188 = arith.mulf %1179, %1172 : vector<8x32xf32>
    %1189 = arith.addf %1187, %1188 : vector<8x32xf32>
    %1190 = math.tanh %1189 : vector<8x32xf32>
    %cst_307 = arith.constant 1.000000e+00 : f32
    %1191 = vector.broadcast %cst_307 : f32 to vector<8x32xf32>
    %1192 = arith.subf %1191, %1186 : vector<8x32xf32>
    %1193 = arith.mulf %1192, %1190 : vector<8x32xf32>
    %1194 = arith.mulf %1186, %1163 : vector<8x32xf32>
    %1195 = arith.addf %1193, %1194 : vector<8x32xf32>
    %1196 = vector.shape_cast %629 : vector<8x1xi1> to vector<8x1xi1>
    %1197 = vector.broadcast %1196 : vector<8x1xi1> to vector<8x32xi1>
    %1198 = arith.select %1197, %1195, %1163 : vector<8x32xi1>, vector<8x32xf32>
    %cst_308 = arith.constant dense<0.000000e+00> : vector<8x32xf32>
    %1199 = tpu.matmul %1198, %942, %cst_308 {dimension_numbers = #tpu.dot_dimension_numbers<[1], [0], [0], [1], [0, 0, 1, 1], [], []>} : vector<8x32xf32>, vector<32x32xf32>, vector<8x32xf32> -> vector<8x32xf32>
    %1200 = vector.broadcast %948 : vector<1x32xf32> to vector<8x32xf32>
    %1201 = arith.addf %1199, %1200 : vector<8x32xf32>
    %cst_309 = arith.constant dense<0.000000e+00> : vector<8x32xf32>
    %1202 = tpu.matmul %1198, %944, %cst_309 {dimension_numbers = #tpu.dot_dimension_numbers<[1], [0], [0], [1], [0, 0, 1, 1], [], []>} : vector<8x32xf32>, vector<32x32xf32>, vector<8x32xf32> -> vector<8x32xf32>
    %1203 = vector.broadcast %950 : vector<1x32xf32> to vector<8x32xf32>
    %1204 = arith.addf %1202, %1203 : vector<8x32xf32>
    %cst_310 = arith.constant dense<0.000000e+00> : vector<8x32xf32>
    %1205 = tpu.matmul %1198, %946, %cst_310 {dimension_numbers = #tpu.dot_dimension_numbers<[1], [0], [0], [1], [0, 0, 1, 1], [], []>} : vector<8x32xf32>, vector<32x32xf32>, vector<8x32xf32> -> vector<8x32xf32>
    %1206 = vector.broadcast %952 : vector<1x32xf32> to vector<8x32xf32>
    %1207 = arith.addf %1205, %1206 : vector<8x32xf32>
    %1208 = vector.extract_strided_slice %938 {offsets = [0, 0], sizes = [8, 32], strides = [1, 1]} : vector<64x32xf32> to vector<8x32xf32>
    %1209 = arith.addf %1208, %1201 : vector<8x32xf32>
    %1210 = arith.negf %1209 : vector<8x32xf32>
    %1211 = math.exp %1210 : vector<8x32xf32>
    %cst_311 = arith.constant 1.000000e+00 : f32
    %1212 = vector.broadcast %cst_311 : f32 to vector<8x32xf32>
    %1213 = arith.addf %1212, %1211 : vector<8x32xf32>
    %1214 = arith.divf %1212, %1213 : vector<8x32xf32>
    %1215 = vector.extract_strided_slice %939 {offsets = [0, 0], sizes = [8, 32], strides = [1, 1]} : vector<64x32xf32> to vector<8x32xf32>
    %1216 = arith.addf %1215, %1204 : vector<8x32xf32>
    %1217 = arith.negf %1216 : vector<8x32xf32>
    %1218 = math.exp %1217 : vector<8x32xf32>
    %cst_312 = arith.constant 1.000000e+00 : f32
    %1219 = vector.broadcast %cst_312 : f32 to vector<8x32xf32>
    %1220 = arith.addf %1219, %1218 : vector<8x32xf32>
    %1221 = arith.divf %1219, %1220 : vector<8x32xf32>
    %1222 = vector.extract_strided_slice %940 {offsets = [0, 0], sizes = [8, 32], strides = [1, 1]} : vector<64x32xf32> to vector<8x32xf32>
    %1223 = arith.mulf %1214, %1207 : vector<8x32xf32>
    %1224 = arith.addf %1222, %1223 : vector<8x32xf32>
    %1225 = math.tanh %1224 : vector<8x32xf32>
    %cst_313 = arith.constant 1.000000e+00 : f32
    %1226 = vector.broadcast %cst_313 : f32 to vector<8x32xf32>
    %1227 = arith.subf %1226, %1221 : vector<8x32xf32>
    %1228 = arith.mulf %1227, %1225 : vector<8x32xf32>
    %1229 = arith.mulf %1221, %1198 : vector<8x32xf32>
    %1230 = arith.addf %1228, %1229 : vector<8x32xf32>
    %1231 = vector.shape_cast %627 : vector<8x1xi1> to vector<8x1xi1>
    %1232 = vector.broadcast %1231 : vector<8x1xi1> to vector<8x32xi1>
    %1233 = arith.select %1232, %1230, %1198 : vector<8x32xi1>, vector<8x32xf32>
    %1234 = vector.extract_strided_slice %320 {offsets = [0, 0], sizes = [1, 32], strides = [1, 1]} : vector<8x32xf32> to vector<1x32xf32>
    %1235 = vector.extract_strided_slice %616 {offsets = [0, 0], sizes = [1, 32], strides = [1, 1]} : vector<8x32xf32> to vector<1x32xf32>
    %cst_314 = arith.constant dense<0.000000e+00> : vector<1x8xf32>
    %1236 = tpu.matmul %1234, %937, %cst_314 {dimension_numbers = #tpu.dot_dimension_numbers<[1], [1], [0], [0], [0, 0, 1, 0], [], []>} : vector<1x32xf32>, vector<8x32xf32>, vector<1x8xf32> -> vector<1x8xf32>
    %cst_315 = arith.constant dense<0.000000e+00> : vector<1x8xf32>
    %1237 = tpu.matmul %1235, %1233, %cst_315 {dimension_numbers = #tpu.dot_dimension_numbers<[1], [1], [0], [0], [0, 0, 1, 0], [], []>} : vector<1x32xf32>, vector<8x32xf32>, vector<1x8xf32> -> vector<1x8xf32>
    %1238 = arith.addf %1236, %1237 : vector<1x8xf32>
    %1239 = tpu.iota {dimensions = array<i32: 1>} : vector<1x8xi32>
    %c6_i32_316 = arith.constant 6 : i32
    %1240 = vector.broadcast %c6_i32_316 : i32 to vector<1x8xi32>
    %1241 = arith.cmpi slt, %1239, %1240 : vector<1x8xi32>
    %cst_317 = arith.constant -1.000000e+30 : f32
    %1242 = vector.broadcast %cst_317 : f32 to vector<1x8xf32>
    %1243 = arith.select %1241, %1238, %1242 : vector<1x8xi1>, vector<1x8xf32>
    %cst_318 = arith.constant dense<0xFF800000> : vector<1xf32>
    %1244 = vector.multi_reduction <maximumf>, %1243, %cst_318 [1] : vector<1x8xf32> to vector<1xf32>
    %1245 = vector.shape_cast %1244 : vector<1xf32> to vector<1x1xf32>
    %1246 = vector.broadcast %1245 : vector<1x1xf32> to vector<1x8xf32>
    %1247 = arith.subf %1243, %1246 : vector<1x8xf32>
    %1248 = math.exp %1247 : vector<1x8xf32>
    %cst_319 = arith.constant dense<0.000000e+00> : vector<1xf32>
    %1249 = vector.multi_reduction <add>, %1248, %cst_319 [1] : vector<1x8xf32> to vector<1xf32>
    %1250 = vector.shape_cast %1249 : vector<1xf32> to vector<1x1xf32>
    %1251 = math.log %1250 : vector<1x1xf32>
    %1252 = arith.addf %1245, %1251 : vector<1x1xf32>
    %1253 = vector.broadcast %1252 : vector<1x1xf32> to vector<1x8xf32>
    %1254 = arith.subf %1243, %1253 : vector<1x8xf32>
    %c0_320 = arith.constant 0 : index
    %c0_321 = arith.constant 0 : index
    %1255 = vector.load %arg13[%c0_320, %c0_321] : memref<1x8xf32, #tpu.memory_space<vmem>>, vector<1x8xf32>
    tpu.vector_store %arg13[%c0_320, %c0_321], %1254 {strides = array<i32>} : memref<1x8xf32, #tpu.memory_space<vmem>>, vector<1x8xf32>,
    %c0_322 = arith.constant 0 : index
    %1256 = memref.load %arg4[%c0_322] : memref<1xi32, #tpu.memory_space<smem>>
    %1257 = vector.broadcast %1256 : i32 to vector<1x8xi32>
    %1258 = arith.cmpi eq, %1239, %1257 : vector<1x8xi32>
    %cst_323 = arith.constant 0.000000e+00 : f32
    %1259 = vector.broadcast %cst_323 : f32 to vector<1x8xf32>
    %1260 = arith.select %1258, %1254, %1259 : vector<1x8xi1>, vector<1x8xf32>
    %cst_324 = arith.constant dense<0.000000e+00> : vector<1xf32>
    %1261 = vector.multi_reduction <add>, %1260, %cst_324 [1] : vector<1x8xf32> to vector<1xf32>
    %1262 = vector.shape_cast %1261 : vector<1xf32> to vector<1x1xf32>
    %cst_325 = arith.constant 0.000000e+00 : f32
    %1263 = vector.broadcast %cst_325 : f32 to vector<1x1xf32>
    %1264 = arith.subf %1263, %1262 : vector<1x1xf32>
    %c0_326 = arith.constant 0 : index
    %c0_327 = arith.constant 0 : index
    %1265 = vector.load %arg14[%c0_326, %c0_327] : memref<1x1xf32, #tpu.memory_space<vmem>>, vector<1x1xf32>
    tpu.vector_store %arg14[%c0_326, %c0_327], %1264 {strides = array<i32>} : memref<1x1xf32, #tpu.memory_space<vmem>>, vector<1x1xf32>,
    return
  }
}

</mosaic_0001>

<bundles_post_ra>
// kernel: neg.1
= control target key start
LH: loop header
LB: loop body
LE: loop exit
PB: predicated region body
PF: predicated region fallthrough
CT: control target
= control target key end

     0   :  { %s24_s0 = inlined_call_operand.vmem [shape: f32[6], index: 0, kind: input, shape index: {}]   ;;  %s25_s1 = inlined_call_operand.vmem [shape: f32[6], index: 1, kind: output, shape index: {}]  }
   0x1   :  { %v2_v0 = vld [vmem:[%s24_s0] sm:$0x1] }
   0x2   :  { %v5_v1 = vxor.u32 2147483648, %v2_v0 }
   0x4   :  { %7 = vst [vmem:[%s25_s1] sm:$0x1] %v5_v1 }

// kernel: nocontext_forward.1
= control target key start
LH: loop header
LB: loop body
LE: loop exit
PB: predicated region body
PF: predicated region fallthrough
CT: control target
= control target key end

     0   :  { %v13396_v3 = vmov 0.0|0.0   ;;  %vm11453_vm0 = vmmov 0   ;;  %v13398_v8 = vmov 0.0   ;;  %v11455_v14 = vmov 0   ;;  %s13379_s0 = inlined_call_operand.vmem [shape: f32[64,32], index: 0, kind: input, shape index: {}]   ;;  %s13380_s1 = inlined_call_operand.vmem [shape: f32[64,32], index: 1, kind: input, shape index: {}]   ;;  %s13381_s2 = inlined_call_operand.vmem [shape: s32[8,1], index: 2, kind: input, shape index: {}]   ;;  %s13382_s3 = inlined_call_operand.vmem [shape: s32[8,1], index: 3, kind: input, shape index: {}]   ;;  %s13383_s4 = inlined_call_operand.<no memory space> [shape: s32[1], index: 4, kind: input, shape index: {}]   ;;  %s13384_s5 = inlined_call_operand.vmem [shape: f32[32,192], index: 5, kind: input, shape index: {}]   ;;  %s13385_s6 = inlined_call_operand.vmem [shape: f32[2,3,32,32], index: 6, kind: input, shape index: {}]   ;;  %s13386_s7 = inlined_call_operand.vmem [shape: f32[1,192], index: 7, kind: input, shape index: {}]   ;;  %s13387_s8 = inlined_call_operand.vmem [shape: f32[2,3,1,32], index: 8, kind: input, shape index: {}]   ;;  %s13388_s9 = inlined_call_operand.vmem [shape: f32[32,192], index: 9, kind: input, shape index: {}]   ;;  %s13389_s10 = inlined_call_operand.vmem [shape: f32[2,3,32,32], index: 10, kind: input, shape index: {}]   ;;  %s13390_s11 = inlined_call_operand.vmem [shape: f32[1,192], index: 11, kind: input, shape index: {}]   ;;  %s13391_s12 = inlined_call_operand.vmem [shape: f32[2,3,1,32], index: 12, kind: input, shape index: {}]   ;;  %s13392_s13 = inlined_call_operand.vmem [shape: f32[1,8], index: 13, kind: output, shape index: {0}]   ;;  %s13393_s14 = inlined_call_operand.hbm [shape: f32[1,1], index: 14, kind: output, shape index: {1}]  }
   0x1   :  { %v63_v0 = vld [vmem:[%s13384_s5 + $0x8] sm:$0xff]  ;;  %v65_v1 = vld [vmem:[%s13384_s5 + $0x18] sm:$0xff]  ;;  %v180_v2 = vld [vmem:[%s13385_s6] sm:$0xff]  ;;  %10504 = vmatprep.subr.bf16.mxu1 %v13396_v3  ;;  %9446 = vmatprep.mubr.msk.f32.mxu1 %vm11453_vm0, %v13398_v8 }
   0x2   :  { %v71_v4 = vpack.c.bf16 %v65_v1, %v63_v0  ;;  %v181_v5 = vld [vmem:[%s13385_s6 + $0x8] sm:$0xff]  ;;  %v62_v6 = vld [vmem:[%s13384_s5] sm:$0xff]  ;;  %v64_v7 = vld [vmem:[%s13384_s5 + $0x10] sm:$0xff]  ;;  %131 = vmatprep.mubr.bf16.mxu0 %v11455_v14  ;;  %11089 = vset.pattern.permute.xlu1 %v11455_v14 }
   0x3   :  { %v11556_v9 = vpack.c.bf16 %v181_v5, %v180_v2  ;;  %v70_v10 = vpack.c.bf16 %v64_v7, %v62_v6  ;;  %v67_v11 = vld [vmem:[%s13384_s5 + $0x28] sm:$0xff]  ;;  %v69_v12 = vld [vmem:[%s13384_s5 + $0x38] sm:$0xff]  ;;  %v182_v13 = vld [vmem:[%s13385_s6 + $0x10] sm:$0xff]  ;;  %11090 = vset.pattern.permute.xlu0 %v11455_v14 }
   0x4   :  { %99 = vmatprep.subr.bf16.mxu0 %v71_v4  ;;  %v73_v15 = vpack.c.bf16 %v69_v12, %v67_v11  ;;  %v183_v16 = vld [vmem:[%s13385_s6 + $0x18] sm:$0xff]  ;;  %v66_v17 = vld [vmem:[%s13384_s5 + $0x20] sm:$0xff]  ;;  %v68_v18 = vld [vmem:[%s13384_s5 + $0x30] sm:$0xff] }
   0x5   :  { %10506 = vmatpush3.bf16.msra.mxu1 %v11556_v9  ;;  %100 = vmatpush1.bf16.msra.mxu0 %v70_v10  ;;  %v11580_v19 = vpack.c.bf16 %v183_v16, %v182_v13  ;;  %v72_v20 = vpack.c.bf16 %v68_v18, %v66_v17  ;;  %v49_v21 = vld [vmem:[%s13379_s0] sm:$0xff]  ;;  %v50_v22 = vld [vmem:[%s13379_s0 + $0x8] sm:$0xff] }
   0x6   :  { %10507 = vmatprep.subr.bf16.mxu1 %v13396_v3  ;;  %101 = vmatprep.subr.bf16.mxu0 %v73_v15  ;;  %v8736_v23 = vld [vmem:[%s13385_s6 + $0x20] sm:$0xff]  ;;  %v8737_v24 = vld [vmem:[%s13385_s6 + $0x28] sm:$0xff]  ;;  %v58_v25 = vpack.c.bf16 %v50_v22, %v49_v21 }
   0x7   :  { %21 = vsyncpa [#allocation4], 0  ;;  %vm86_vm1 = vcmask 261120   ;;  %v11596_v26 = vpack.c.bf16 %v8737_v24, %v8736_v23  ;;  %v8738_v27 = vld [vmem:[%s13385_s6 + $0x30] sm:$0xff]  ;;  %v8739_v28 = vld [vmem:[%s13385_s6 + $0x38] sm:$0xff]  ;;  %v13394_v38 = vlaneseq  ;;  %s11456_s17 = smov 64  }
   0x8   :  { %v11609_v29 = vpack.c.bf16 %v8739_v28, %v8738_v27  ;;  %v8740_v30 = vld [vmem:[%s13385_s6 + $0x40] sm:$0xff]  ;;  %v8741_v31 = vld [vmem:[%s13385_s6 + $0x48] sm:$0xff]  ;;  %v8742_v33 = vld [vmem:[%s13385_s6 + $0x50] sm:$0xff]  ;;  %s11457_s18 = smov 32   ;;  %s11458_s26 = smov 96  }
   0x9   :  { %10509 = vmatpush3.bf16.msra.mxu1 %v11580_v19  ;;  %102 = vmatpush1.bf16.msra.mxu0 %v72_v20  ;;  %v11624_v32 = vpack.c.bf16 %v8741_v31, %v8740_v30  ;;  %v8743_v34 = vld [vmem:[%s13385_s6 + $0x58] sm:$0xff]  ;;  %v11654_v36 = vld [vmem:[%s13381_s2] sm:$0xff]  ;;  %v11659_v39 = vshrl.u32 %v13394_v38, 7  ;;  %v51_v5 = vld [vmem:[%s13379_s0 + $0x10] sm:$0xff] }
   0xa   :  { %10510 = vmatprep.subr.bf16.mxu1 %v13396_v3  ;;  %10528 = vmatprep.subr.bf16.mxu0 %v13396_v3  ;;  %v11637_v35 = vpack.c.bf16 %v8743_v34, %v8742_v33  ;;  %vm172_vm2 = vcmp.gt.s32.totalorder %v11654_v36, 0  ;;  %v74_v41 = vld [vmem:[%s13386_s7] sm:$0x3]  ;;  %v11688_v60 = vld [vmem:[%s13387_s8 + $0x2] ss:$0 sm:$0xff]  ;;  %v52_v6 = vld [vmem:[%s13379_s0 + $0x18] sm:$0xff] }
   0xb   :  { %v463_v37 = vsel %vm172_vm2, 1, %v11455_v14  ;;  %v78_v40 = vsub.s32 0, %v11659_v39  ;;  %v11672_v43 = vld [vmem:[%s13387_s8] ss:$0 sm:$0xff]  ;;  %v11694_v0 = vld [vmem:[%s13387_s8 + $0x1] ss:$0 sm:$0xff]  ;;  %v59_v7 = vpack.c.bf16 %v52_v6, %v51_v5 }
   0xc   :  { %9447 = vmatmul.mubr.f32.vlgmr.msra.gmra.mrb[0].mxu1 %v13398_v8  ;;  %8732 = vmatmul.mubr.msk.bf16.vlgmr.msra.gmra.mrb[0].mxu0 %vm86_vm1, %v58_v25  ;;  %v53_v10 = vld [vmem:[%s13379_s0 + $0x20] sm:$0xff]  ;;  %v54_v11 = vld [vmem:[%s13379_s0 + $0x28] sm:$0xff]  ;;  %v55_v15 = vld [vmem:[%s13379_s0 + $0x30] sm:$0xff]  ;;  %vm173_vm4 = vcmp.gt.s32.totalorder %v11654_v36, 1  ;;  %vm174_vm6 = vcmp.gt.s32.totalorder %v11654_v36, 2  ;;  %vm175_vm8 = vcmp.gt.s32.totalorder %v11654_v36, 3 }
   0xd   :  { %10512 = vmatpush3.bf16.msra.mxu1 %v11596_v26  ;;  %9457 = vmatprep.mubr.msk.f32.mxu1 %vm11453_vm0, %v13398_v8  ;;  %v11667_v42 = vrot.slane %v74_v41, %v78_v40  ;;  %v60_v13 = vpack.c.bf16 %v54_v11, %v53_v10  ;;  %v56_v16 = vld [vmem:[%s13379_s0 + $0x38] sm:$0xff]  ;;  %vm176_vm10 = vcmp.gt.s32.totalorder %v11654_v36, 4  ;;  %vm177_vm12 = vcmp.gt.s32.totalorder %v11654_v36, 5 }
   0xe   :  { %10513 = vmatprep.subr.bf16.mxu1 %v13396_v3  ;;  %141 = vmatprep.mubr.bf16.mxu0 %v11455_v14  ;;  %v61_v17 = vpack.c.bf16 %v56_v16, %v55_v15  ;;  %v717_v16 = vsel %vm173_vm4, 1, %v11455_v14  ;;  %vm178_vm14 = vcmp.gt.s32.totalorder %v11654_v36, 6 }
   0xf   :  { %10530 = vmatpush3.bf16.msra.mxu0 %v11596_v26  ;;  %465 = vperm.xlu1 %11089, %v463_v37  }
  0x10   :  { %10531 = vmatprep.subr.bf16.mxu0 %v13396_v3 }
  0x11   :  { %10515 = vmatpush3.bf16.msra.mxu1 %v11609_v29 }
  0x12   :  { %10516 = vmatprep.subr.bf16.mxu1 %v13396_v3 }
  0x13   :  { %10533 = vmatpush3.bf16.msra.mxu0 %v11609_v29 }
  0x14   :  { %9458 = vmatmul.mubr.f32.vlgmr.msra.gmra.mrb[2].mxu1 %v13398_v8  ;;  %10540 = vmatprep.subr.bf16.mxu0 %v13396_v3 }
  0x15   :  { %10518 = vmatpush3.bf16.msra.mxu1 %v11624_v32  ;;  %9468 = vmatprep.mubr.msk.f32.mxu1 %vm11453_vm0, %v13398_v8 }
  0x16   :  { %10519 = vmatprep.subr.bf16.mxu1 %v13396_v3  ;;  %8733 = vmatmul.mubr.msk.bf16.gmra.mrb[4].mxu0 %vm86_vm1, %v59_v7 }
  0x17   :  { %151 = vmatprep.mubr.bf16.mxu0 %v11455_v14 }
  0x19   :  { %10521 = vmatpush3.bf16.msra.mxu1 %v11637_v35 }
  0x1a   :  { %10522 = vmatprep.subr.bf16.mxu1 %v13396_v3 }
  0x1c   :  { %9469 = vmatmul.mubr.f32.vlgmr.msra.gmra.mrb[4].mxu1 %v13398_v8 }
  0x1d   :  { %10524 = vmatpush3.bf16.msra.mxu1 %v11556_v9  ;;  %9479 = vmatprep.mubr.msk.f32.mxu1 %vm11453_vm0, %v13398_v8 }
  0x1e   :  { %10525 = vmatprep.subr.bf16.mxu1 %v13396_v3  ;;  %8734 = vmatmul.mubr.msk.bf16.gmra.mrb[8].mxu0 %vm86_vm1, %v60_v13 }
  0x1f   :  { %161 = vmatprep.mubr.bf16.mxu0 %v11455_v14 }
  0x21   :  { %10527 = vmatpush3.bf16.msra.mxu1 %v11580_v19 }
  0x22   :  { %10534 = vmatprep.subr.bf16.mxu1 %v13396_v3 }
  0x26   :  { %8735 = vmatmul.mubr.msk.bf16.gmra.mrb[12].mxu0 %vm86_vm1, %v61_v17 }
  0x27   :  { %9490 = vmatprep.mubr.msk.f32.mxu0 %vm11453_vm0, %v13398_v8 }
  0x8e   :  { %v11727_v24 = vpop.permute.xlu1 %465 }
  0x8f   :  { %13402 = vst [vmem:[#allocation6_spill] sm:$0xff] %v11727_v24  ;;  %vm467_vm3 = vcmp.eq.s32.totalorder %v11727_v24, 1 }
  0xdf   :  { %v274_v44 = vpop.f32.mrb[0].mxu1  ;;  %v133_v45 = vpop.f32.mrb[0].mxu0 }
  0xe0   :  { %v275_v46 = vadd.f32 %v11672_v43, %v274_v44  ;;  %v11676_v47 = vadd.f32 %v133_v45, %v11667_v42  ;;  %v9448_v48 = vpop.f32.mrb[1].mxu1  ;;  %v11678_v49 = vpop.f32.mrb[1].mxu0 }
  0xe1   :  { %v11680_v50 = vpop.f32.mrb[2].mxu0 }
  0xe2   :  { %v430_v51 = vadd.f32 %v275_v46, %v11676_v47  ;;  %v11683_v52 = vpop.f32.mrb[3].mxu0 }
  0xe4   :  { %v8749_v53 = vmul.f32 -1.442695, %v430_v51 }
  0xe6   :  { %11091 = vpow2.f32 %v8749_v53 }
  0xe7   :  { %v350_v54 = vpop.f32.mrb[2].mxu1 }
  0xe8   :  { %v9459_v55 = vpop.f32.mrb[3].mxu1  ;;  %v351_v1 = vadd.f32 %v11694_v0, %v350_v54 }
  0xe9   :  { %v11736_v37 = vpop.f32.mrb[4].mxu0 }
  0xea   :  { %v11738_v41 = vpop.f32.mrb[5].mxu0 }
  0xeb   :  { %v11740_v44 = vpop.f32.mrb[6].mxu0 }
  0xec   :  { %v11742_v45 = vpop.f32.mrb[7].mxu0 }
  0xef   :  { %v426_v56 = vpop.f32.mrb[4].mxu1 }
  0xf0   :  { %v11092_v57 = vpop.eup %11091  ;;  %v9470_v58 = vpop.f32.mrb[5].mxu1  ;;  %v427_v61 = vadd.f32 %v11688_v60, %v426_v56 }
  0xf1   :  { %v434_v59 = vadd.f32 1.0, %v11092_v57  ;;  %v11744_v46 = vpop.f32.mrb[8].mxu0 }
  0xf2   :  { %v11746_v48 = vpop.f32.mrb[9].mxu0 }
  0xf3   :  { %11093 = vrcp.f32 %v434_v59  ;;  %v11748_v51 = vpop.f32.mrb[10].mxu0 }
  0xf4   :  { %v11750_v53 = vpop.f32.mrb[11].mxu0 }
  0xf9   :  { %v11752_v54 = vpop.f32.mrb[12].mxu0 }
  0xfa   :  { %v11754_v55 = vpop.f32.mrb[13].mxu0 }
  0xfb   :  { %v11756_v56 = vpop.f32.mrb[14].mxu0 }
  0xfc   :  { %v11758_v57 = vpop.f32.mrb[15].mxu0 }
  0xfd   :  { %v11094_v62 = vpop.eup %11093 }
  0xfe   :  { %v448_v63 = vmul.f32 %v11094_v62, %v427_v61  ;;  %v11783_v62 = vadd.f32 %v11680_v50, %v11667_v42 }
 0x100   :  { %450 = vrot.lane.b32.xlu0 %v448_v63, %s11456_s17 }
 0x104   :  { %438 = vrot.lane.b32.xlu0 %v351_v1, %s11457_s18 }
 0x172   :  { %v451_v2 = vpop.permute.xlu0 %450 }
 0x173   :  { %v453_v4 = vadd.f32 %v451_v2, %v11676_v47 }
 0x175   :  { %11095 = vtanh.f32 %v453_v4 }
 0x176   :  { %v439_v18 = vpop.permute.xlu0 %438 }
 0x177   :  { %v441_v20 = vadd.f32 %v439_v18, %v11676_v47 }
 0x179   :  { %v8750_v21 = vmul.f32 -1.442695, %v441_v20 }
 0x17b   :  { %11097 = vpow2.f32 %v8750_v21 }
 0x17f   :  { %v11096_v12 = vpop.eup %11095 }
 0x180   :  { %457 = vrot.lane.b32.xlu1 %v11096_v12, %s11458_s26 }
 0x185   :  { %v11098_v22 = vpop.eup %11097 }
 0x186   :  { %v445_v23 = vadd.f32 1.0, %v11098_v22 }
 0x188   :  { %11099 = vrcp.f32 %v445_v23 }
 0x192   :  { %v11100_v25 = vpop.eup %11099 }
 0x193   :  { %v455_v27 = vsub.f32 1.0, %v11100_v25  ;;  %v461_v31 = vmul.f32 0.0, %v11100_v25 }
 0x1f2   :  { %v458_v28 = vpop.permute.xlu1 %457 }
 0x1f3   :  { %v460_v30 = vmul.f32 %v458_v28, %v455_v27 }
 0x1f5   :  { %v462_v33 = vadd.f32 %v461_v31, %v460_v30 }
 0x1f7   :  { %v11732_v34 = vsel %vm467_vm3, %v462_v33, 0.0 }
 0x1f8   :  { %470 = vrot.lane.b32.xlu0 %v11732_v34, %s11458_s26 }
 0x26a   :  { %v471_v58 = vpop.permute.xlu0 %470 }
 0x26b   :  { %9480 = vmatmul.mubr.msk.f32.vlgmr.msra.gmra.mrb[6].mxu1 %vm86_vm1, %v471_v58  ;;  %9491 = vmatmul.mubr.msk.f32.vlgmr.msra.gmra.mrb[16].mxu0 %vm86_vm1, %v471_v58 }
 0x26c   :  { %10536 = vmatpush3.bf16.msra.mxu1 %v11624_v32  ;;  %9501 = vmatprep.mubr.msk.f32.mxu1 %vm11453_vm0, %v13398_v8 }
 0x26d   :  { %10537 = vmatprep.subr.bf16.mxu1 %v13396_v3  ;;  %10542 = vmatpush3.bf16.msra.mxu0 %v11556_v9 }
 0x26e   :  { %10543 = vmatprep.subr.bf16.mxu0 %v13396_v3  ;;  %9512 = vmatprep.mubr.msk.f32.mxu0 %vm11453_vm0, %v13398_v8 }
 0x270   :  { %10539 = vmatpush3.bf16.msra.mxu1 %v11637_v35 }
 0x271   :  { %10546 = vmatprep.subr.bf16.mxu1 %v13396_v3  ;;  %10545 = vmatpush3.bf16.msra.mxu0 %v11580_v19 }
 0x272   :  { %10552 = vmatprep.subr.bf16.mxu0 %v13396_v3 }
 0x273   :  { %9502 = vmatmul.mubr.msk.f32.vlgmr.msra.gmra.mrb[8].mxu1 %vm86_vm1, %v471_v58 }
 0x274   :  { %10548 = vmatpush3.bf16.msra.mxu1 %v11596_v26  ;;  %9523 = vmatprep.mubr.msk.f32.mxu1 %vm11453_vm0, %v13398_v8 }
 0x275   :  { %10549 = vmatprep.subr.bf16.mxu1 %v13396_v3 }
 0x278   :  { %10551 = vmatpush3.bf16.msra.mxu1 %v11609_v29 }
 0x279   :  { %10558 = vmatprep.subr.bf16.mxu1 %v13396_v3 }
 0x33e   :  { %v540_v59 = vpop.f32.mrb[6].mxu1  ;;  %v610_v61 = vpop.f32.mrb[16].mxu0 }
 0x33f   :  { %v541_v63 = vadd.f32 %v11672_v43, %v540_v59  ;;  %v611_v1 = vadd.f32 %v11694_v0, %v610_v61  ;;  %v9481_v2 = vpop.f32.mrb[7].mxu1  ;;  %v9492_v4 = vpop.f32.mrb[17].mxu0 }
 0x340   :  { %v11830_v4 = vadd.f32 %v11736_v37, %v11667_v42 }
 0x341   :  { %v684_v5 = vadd.f32 %v541_v63, %v11783_v62  ;;  %692 = vrot.lane.b32.xlu0 %v611_v1, %s11457_s18 }
 0x343   :  { %v8754_v6 = vmul.f32 -1.442695, %v684_v5 }
 0x345   :  { %11101 = vpow2.f32 %v8754_v6 }
 0x346   :  { %v680_v7 = vpop.f32.mrb[8].mxu1 }
 0x347   :  { %v9503_v10 = vpop.f32.mrb[9].mxu1  ;;  %v681_v50 = vadd.f32 %v11688_v60, %v680_v7 }
 0x34f   :  { %v11102_v11 = vpop.eup %11101 }
 0x350   :  { %v688_v12 = vadd.f32 1.0, %v11102_v11 }
 0x352   :  { %11103 = vrcp.f32 %v688_v12 }
 0x35c   :  { %v11104_v13 = vpop.eup %11103 }
 0x35d   :  { %v702_v15 = vmul.f32 %v11104_v13, %v681_v50 }
 0x35f   :  { %704 = vrot.lane.b32.xlu1 %v702_v15, %s11456_s17 }
 0x363   :  { %719 = vperm.xlu1 %11089, %v717_v16  }
 0x3b3   :  { %v693_v21 = vpop.permute.xlu0 %692 }
 0x3b4   :  { %v695_v22 = vadd.f32 %v693_v21, %v11783_v62 }
 0x3b6   :  { %v8755_v23 = vmul.f32 -1.442695, %v695_v22 }
 0x3d1   :  { %v705_v17 = vpop.permute.xlu1 %704 }
 0x3d2   :  { %v707_v18 = vadd.f32 %v705_v17, %v11783_v62 }
 0x3d4   :  { %11105 = vtanh.f32 %v707_v18 }
 0x3d5   :  { %11107 = vpow2.f32 %v8755_v23 }
 0x3de   :  { %v11106_v20 = vpop.eup %11105 }
 0x3df   :  { %711 = vrot.lane.b32.xlu0 %v11106_v20, %s11458_s26  ;;  %v11108_v25 = vpop.eup %11107  ;;  %v971_v20 = vsel %vm174_vm6, 1, %v11455_v14 }
 0x3e0   :  { %v699_v27 = vadd.f32 1.0, %v11108_v25 }
 0x3e2   :  { %11109 = vrcp.f32 %v699_v27  ;;  %v11796_v33 = vpop.permute.xlu1 %719 }
 0x3e3   :  { %vm721_vm5 = vcmp.eq.s32.totalorder %v11796_v33, 1  ;;  %v4292_v33 = vld [vmem:[%s13380_s1 + $0x8] sm:$0xff] }
 0x3ec   :  { %v11110_v28 = vpop.eup %11109 }
 0x3ed   :  { %v709_v30 = vsub.f32 1.0, %v11110_v28  ;;  %v715_v58 = vmul.f32 %v11110_v28, %v11732_v34 }
 0x451   :  { %v712_v31 = vpop.permute.xlu0 %711 }
 0x452   :  { %v714_v59 = vmul.f32 %v712_v31, %v709_v30 }
 0x454   :  { %v716_v61 = vadd.f32 %v715_v58, %v714_v59 }
 0x456   :  { %v11803_v63 = vsel %vm721_vm5, %v716_v61, %v11732_v34 }
 0x457   :  { %724 = vrot.lane.b32.xlu1 %v11803_v63, %s11458_s26 }
 0x4c9   :  { %v725_v1 = vpop.permute.xlu1 %724 }
 0x4ca   :  { %9513 = vmatmul.mubr.msk.f32.vlgmr.msra.gmra.mrb[18].mxu0 %vm86_vm1, %v725_v1  ;;  %9524 = vmatmul.mubr.msk.f32.vlgmr.msra.gmra.mrb[10].mxu1 %vm86_vm1, %v725_v1 }
 0x4cb   :  { %10554 = vmatpush3.bf16.msra.mxu0 %v11624_v32  ;;  %9534 = vmatprep.mubr.msk.f32.mxu0 %vm11453_vm0, %v13398_v8 }
 0x4cc   :  { %10555 = vmatprep.subr.bf16.mxu0 %v13396_v3  ;;  %10560 = vmatpush3.bf16.msra.mxu1 %v11556_v9 }
 0x4cd   :  { %10561 = vmatprep.subr.bf16.mxu1 %v13396_v3  ;;  %9545 = vmatprep.mubr.msk.f32.mxu1 %vm11453_vm0, %v13398_v8 }
 0x4cf   :  { %10557 = vmatpush3.bf16.msra.mxu0 %v11637_v35 }
 0x4d0   :  { %10564 = vmatprep.subr.bf16.mxu0 %v13396_v3  ;;  %10563 = vmatpush3.bf16.msra.mxu1 %v11580_v19 }
 0x4d1   :  { %10570 = vmatprep.subr.bf16.mxu1 %v13396_v3 }
 0x4d2   :  { %9535 = vmatmul.mubr.msk.f32.vlgmr.msra.gmra.mrb[20].mxu0 %vm86_vm1, %v725_v1 }
 0x4d3   :  { %10566 = vmatpush3.bf16.msra.mxu0 %v11596_v26  ;;  %9556 = vmatprep.mubr.msk.f32.mxu0 %vm11453_vm0, %v13398_v8 }
 0x4d4   :  { %10567 = vmatprep.subr.bf16.mxu0 %v13396_v3 }
 0x4d7   :  { %10569 = vmatpush3.bf16.msra.mxu0 %v11609_v29 }
 0x4d8   :  { %10576 = vmatprep.subr.bf16.mxu0 %v13396_v3 }
 0x59d   :  { %v794_v34 = vpop.f32.mrb[18].mxu0  ;;  %v864_v2 = vpop.f32.mrb[10].mxu1 }
 0x59e   :  { %v795_v5 = vadd.f32 %v11672_v43, %v794_v34  ;;  %v865_v6 = vadd.f32 %v11694_v0, %v864_v2  ;;  %v9514_v7 = vpop.f32.mrb[19].mxu0  ;;  %v9525_v10 = vpop.f32.mrb[11].mxu1 }
 0x5a0   :  { %v938_v11 = vadd.f32 %v795_v5, %v11830_v4  ;;  %946 = vrot.lane.b32.xlu1 %v865_v6, %s11457_s18 }
 0x5a2   :  { %v8759_v12 = vmul.f32 -1.442695, %v938_v11  ;;  %v11877_v11 = vadd.f32 %v11740_v44, %v11667_v42 }
 0x5a4   :  { %11111 = vpow2.f32 %v8759_v12 }
 0x5a5   :  { %v934_v50 = vpop.f32.mrb[20].mxu0 }
 0x5a6   :  { %v9536_v13 = vpop.f32.mrb[21].mxu0  ;;  %v935_v37 = vadd.f32 %v11688_v60, %v934_v50 }
 0x5ae   :  { %v11112_v15 = vpop.eup %11111 }
 0x5af   :  { %v942_v16 = vadd.f32 1.0, %v11112_v15 }
 0x5b1   :  { %11113 = vrcp.f32 %v942_v16 }
 0x5bb   :  { %v11114_v17 = vpop.eup %11113 }
 0x5bc   :  { %v956_v18 = vmul.f32 %v11114_v17, %v935_v37 }
 0x5be   :  { %958 = vrot.lane.b32.xlu0 %v956_v18, %s11456_s17 }
 0x5c2   :  { %973 = vperm.xlu0 %11090, %v971_v20  }
 0x612   :  { %v947_v25 = vpop.permute.xlu1 %946 }
 0x613   :  { %v949_v27 = vadd.f32 %v947_v25, %v11830_v4  ;;  %v1225_v25 = vsel %vm175_vm8, 1, %v11455_v14 }
 0x615   :  { %v8760_v28 = vmul.f32 -1.442695, %v949_v27 }
 0x630   :  { %v959_v21 = vpop.permute.xlu0 %958 }
 0x631   :  { %v961_v22 = vadd.f32 %v959_v21, %v11830_v4 }
 0x633   :  { %11115 = vtanh.f32 %v961_v22 }
 0x634   :  { %11117 = vpow2.f32 %v8760_v28 }
 0x63d   :  { %v11116_v23 = vpop.eup %11115 }
 0x63e   :  { %965 = vrot.lane.b32.xlu1 %v11116_v23, %s11458_s26  ;;  %v11118_v30 = vpop.eup %11117 }
 0x63f   :  { %v953_v31 = vadd.f32 1.0, %v11118_v30 }
 0x641   :  { %11119 = vrcp.f32 %v953_v31  ;;  %v11843_v61 = vpop.permute.xlu0 %973 }
 0x642   :  { %vm975_vm7 = vcmp.eq.s32.totalorder %v11843_v61, 1 }
 0x64b   :  { %v11120_v58 = vpop.eup %11119 }
 0x64c   :  { %v963_v59 = vsub.f32 1.0, %v11120_v58  ;;  %v969_v34 = vmul.f32 %v11120_v58, %v11803_v63 }
 0x6b0   :  { %v966_v1 = vpop.permute.xlu1 %965 }
 0x6b1   :  { %v968_v2 = vmul.f32 %v966_v1, %v963_v59 }
 0x6b3   :  { %v970_v5 = vadd.f32 %v969_v34, %v968_v2 }
 0x6b5   :  { %v11850_v6 = vsel %vm975_vm7, %v970_v5, %v11803_v63 }
 0x6b6   :  { %978 = vrot.lane.b32.xlu1 %v11850_v6, %s11458_s26 }
 0x728   :  { %v979_v7 = vpop.permute.xlu1 %978 }
 0x729   :  { %9546 = vmatmul.mubr.msk.f32.vlgmr.msra.gmra.mrb[12].mxu1 %vm86_vm1, %v979_v7  ;;  %9557 = vmatmul.mubr.msk.f32.vlgmr.msra.gmra.mrb[22].mxu0 %vm86_vm1, %v979_v7 }
 0x72a   :  { %10572 = vmatpush3.bf16.msra.mxu1 %v11624_v32  ;;  %9567 = vmatprep.mubr.msk.f32.mxu1 %vm11453_vm0, %v13398_v8 }
 0x72b   :  { %10573 = vmatprep.subr.bf16.mxu1 %v13396_v3  ;;  %10578 = vmatpush3.bf16.msra.mxu0 %v11556_v9 }
 0x72c   :  { %10579 = vmatprep.subr.bf16.mxu0 %v13396_v3  ;;  %9578 = vmatprep.mubr.msk.f32.mxu0 %vm11453_vm0, %v13398_v8 }
 0x72e   :  { %10575 = vmatpush3.bf16.msra.mxu1 %v11637_v35 }
 0x72f   :  { %10582 = vmatprep.subr.bf16.mxu1 %v13396_v3  ;;  %10581 = vmatpush3.bf16.msra.mxu0 %v11580_v19 }
 0x730   :  { %10588 = vmatprep.subr.bf16.mxu0 %v13396_v3 }
 0x731   :  { %9568 = vmatmul.mubr.msk.f32.vlgmr.msra.gmra.mrb[14].mxu1 %vm86_vm1, %v979_v7 }
 0x732   :  { %10584 = vmatpush3.bf16.msra.mxu1 %v11596_v26  ;;  %9589 = vmatprep.mubr.msk.f32.mxu1 %vm11453_vm0, %v13398_v8 }
 0x733   :  { %10585 = vmatprep.subr.bf16.mxu1 %v13396_v3 }
 0x736   :  { %10587 = vmatpush3.bf16.msra.mxu1 %v11609_v29 }
 0x737   :  { %10594 = vmatprep.subr.bf16.mxu1 %v13396_v3 }
 0x7fc   :  { %v1048_v63 = vpop.f32.mrb[12].mxu1  ;;  %v1118_v10 = vpop.f32.mrb[22].mxu0 }
 0x7fd   :  { %v1049_v12 = vadd.f32 %v11672_v43, %v1048_v63  ;;  %v1119_v50 = vadd.f32 %v11694_v0, %v1118_v10  ;;  %v9547_v13 = vpop.f32.mrb[13].mxu1  ;;  %v9558_v15 = vpop.f32.mrb[23].mxu0 }
 0x7ff   :  { %v1192_v16 = vadd.f32 %v1049_v12, %v11877_v11  ;;  %1200 = vrot.lane.b32.xlu1 %v1119_v50, %s11457_s18 }
 0x801   :  { %v8764_v37 = vmul.f32 -1.442695, %v1192_v16 }
 0x803   :  { %11121 = vpow2.f32 %v8764_v37  ;;  %v11924_v37 = vadd.f32 %v11744_v46, %v11667_v42 }
 0x804   :  { %v1188_v17 = vpop.f32.mrb[14].mxu1 }
 0x805   :  { %v9569_v18 = vpop.f32.mrb[15].mxu1  ;;  %v1189_v44 = vadd.f32 %v11688_v60, %v1188_v17 }
 0x80d   :  { %v11122_v20 = vpop.eup %11121 }
 0x80e   :  { %v1196_v21 = vadd.f32 1.0, %v11122_v20 }
 0x810   :  { %11123 = vrcp.f32 %v1196_v21 }
 0x81a   :  { %v11124_v22 = vpop.eup %11123 }
 0x81b   :  { %v1210_v23 = vmul.f32 %v11124_v22, %v1189_v44 }
 0x81d   :  { %1212 = vrot.lane.b32.xlu0 %v1210_v23, %s11456_s17 }
 0x821   :  { %1227 = vperm.xlu0 %11090, %v1225_v25  }
 0x871   :  { %v1201_v31 = vpop.permute.xlu1 %1200 }
 0x872   :  { %v1203_v58 = vadd.f32 %v1201_v31, %v11877_v11 }
 0x874   :  { %v8765_v59 = vmul.f32 -1.442695, %v1203_v58  ;;  %v1479_v58 = vsel %vm176_vm10, 1, %v11455_v14 }
 0x88f   :  { %v1213_v27 = vpop.permute.xlu0 %1212 }
 0x890   :  { %v1215_v28 = vadd.f32 %v1213_v27, %v11877_v11 }
 0x892   :  { %11125 = vtanh.f32 %v1215_v28 }
 0x893   :  { %11127 = vpow2.f32 %v8765_v59 }
 0x89c   :  { %v11126_v30 = vpop.eup %11125 }
 0x89d   :  { %1219 = vrot.lane.b32.xlu1 %v11126_v30, %s11458_s26  ;;  %v11128_v1 = vpop.eup %11127 }
 0x89e   :  { %v1207_v34 = vadd.f32 1.0, %v11128_v1 }
 0x8a0   :  { %11129 = vrcp.f32 %v1207_v34  ;;  %v11890_v63 = vpop.permute.xlu0 %1227 }
 0x8a1   :  { %vm1229_vm9 = vcmp.eq.s32.totalorder %v11890_v63, 1 }
 0x8aa   :  { %v11130_v2 = vpop.eup %11129 }
 0x8ab   :  { %v1217_v5 = vsub.f32 1.0, %v11130_v2  ;;  %v1223_v10 = vmul.f32 %v11130_v2, %v11850_v6 }
 0x90f   :  { %v1220_v7 = vpop.permute.xlu1 %1219 }
 0x910   :  { %v1222_v12 = vmul.f32 %v1220_v7, %v1217_v5 }
 0x912   :  { %v1224_v50 = vadd.f32 %v1223_v10, %v1222_v12 }
 0x914   :  { %v11897_v13 = vsel %vm1229_vm9, %v1224_v50, %v11850_v6 }
 0x915   :  { %1232 = vrot.lane.b32.xlu0 %v11897_v13, %s11458_s26 }
 0x987   :  { %v1233_v15 = vpop.permute.xlu0 %1232 }
 0x988   :  { %9579 = vmatmul.mubr.msk.f32.vlgmr.msra.gmra.mrb[24].mxu0 %vm86_vm1, %v1233_v15  ;;  %9590 = vmatmul.mubr.msk.f32.vlgmr.msra.gmra.mrb[16].mxu1 %vm86_vm1, %v1233_v15 }
 0x989   :  { %10590 = vmatpush3.bf16.msra.mxu0 %v11624_v32  ;;  %9600 = vmatprep.mubr.msk.f32.mxu0 %vm11453_vm0, %v13398_v8 }
 0x98a   :  { %10591 = vmatprep.subr.bf16.mxu0 %v13396_v3  ;;  %10596 = vmatpush3.bf16.msra.mxu1 %v11556_v9 }
 0x98b   :  { %10597 = vmatprep.subr.bf16.mxu1 %v13396_v3  ;;  %9611 = vmatprep.mubr.msk.f32.mxu1 %vm11453_vm0, %v13398_v8 }
 0x98d   :  { %10593 = vmatpush3.bf16.msra.mxu0 %v11637_v35 }
 0x98e   :  { %10600 = vmatprep.subr.bf16.mxu0 %v13396_v3  ;;  %10599 = vmatpush3.bf16.msra.mxu1 %v11580_v19 }
 0x98f   :  { %10606 = vmatprep.subr.bf16.mxu1 %v13396_v3 }
 0x990   :  { %9601 = vmatmul.mubr.msk.f32.vlgmr.msra.gmra.mrb[26].mxu0 %vm86_vm1, %v1233_v15 }
 0x991   :  { %10602 = vmatpush3.bf16.msra.mxu0 %v11596_v26  ;;  %9622 = vmatprep.mubr.msk.f32.mxu0 %vm11453_vm0, %v13398_v8 }
 0x992   :  { %10603 = vmatprep.subr.bf16.mxu0 %v13396_v3 }
 0x995   :  { %10605 = vmatpush3.bf16.msra.mxu0 %v11609_v29 }
 0x996   :  { %10612 = vmatprep.subr.bf16.mxu0 %v13396_v3 }
 0xa5b   :  { %v1302_v6 = vpop.f32.mrb[24].mxu0  ;;  %v1372_v16 = vpop.f32.mrb[16].mxu1 }
 0xa5c   :  { %v1303_v17 = vadd.f32 %v11672_v43, %v1302_v6  ;;  %v1373_v18 = vadd.f32 %v11694_v0, %v1372_v16  ;;  %v9580_v20 = vpop.f32.mrb[25].mxu0  ;;  %v9591_v21 = vpop.f32.mrb[17].mxu1 }
 0xa5e   :  { %v1446_v44 = vadd.f32 %v1303_v17, %v11924_v37  ;;  %1454 = vrot.lane.b32.xlu0 %v1373_v18, %s11457_s18 }
 0xa60   :  { %v8769_v22 = vmul.f32 -1.442695, %v1446_v44 }
 0xa62   :  { %11131 = vpow2.f32 %v8769_v22 }
 0xa63   :  { %v1442_v23 = vpop.f32.mrb[26].mxu0 }
 0xa64   :  { %v9602_v25 = vpop.f32.mrb[27].mxu0  ;;  %v1443_v46 = vadd.f32 %v11688_v60, %v1442_v23  ;;  %v11971_v23 = vadd.f32 %v11748_v51, %v11667_v42 }
 0xa6c   :  { %v11132_v27 = vpop.eup %11131 }
 0xa6d   :  { %v1450_v28 = vadd.f32 1.0, %v11132_v27 }
 0xa6f   :  { %11133 = vrcp.f32 %v1450_v28 }
 0xa79   :  { %v11134_v30 = vpop.eup %11133 }
 0xa7a   :  { %v1464_v31 = vmul.f32 %v11134_v30, %v1443_v46 }
 0xa7c   :  { %1466 = vrot.lane.b32.xlu1 %v1464_v31, %s11456_s17 }
 0xa80   :  { %1481 = vperm.xlu1 %11089, %v1479_v58  }
 0xad0   :  { %v1455_v2 = vpop.permute.xlu0 %1454 }
 0xad1   :  { %v1457_v5 = vadd.f32 %v1455_v2, %v11924_v37 }
 0xad3   :  { %v8770_v7 = vmul.f32 -1.442695, %v1457_v5 }
 0xaee   :  { %v1467_v59 = vpop.permute.xlu1 %1466 }
 0xaef   :  { %v1469_v1 = vadd.f32 %v1467_v59, %v11924_v37 }
 0xaf1   :  { %11135 = vtanh.f32 %v1469_v1 }
 0xaf2   :  { %11137 = vpow2.f32 %v8770_v7  ;;  %v1733_v7 = vsel %vm177_vm12, 1, %v11455_v14 }
 0xafb   :  { %v11136_v34 = vpop.eup %11135 }
 0xafc   :  { %1473 = vrot.lane.b32.xlu0 %v11136_v34, %s11458_s26  ;;  %v11138_v10 = vpop.eup %11137 }
 0xafd   :  { %v1461_v12 = vadd.f32 1.0, %v11138_v10 }
 0xaff   :  { %11139 = vrcp.f32 %v1461_v12  ;;  %v11937_v16 = vpop.permute.xlu1 %1481 }
 0xb00   :  { %vm1483_vm11 = vcmp.eq.s32.totalorder %v11937_v16, 1 }
 0xb09   :  { %v11140_v50 = vpop.eup %11139 }
 0xb0a   :  { %v1471_v15 = vsub.f32 1.0, %v11140_v50  ;;  %v1477_v17 = vmul.f32 %v11140_v50, %v11897_v13 }
 0xb6e   :  { %v1474_v6 = vpop.permute.xlu0 %1473 }
 0xb6f   :  { %v1476_v18 = vmul.f32 %v1474_v6, %v1471_v15 }
 0xb71   :  { %v1478_v20 = vadd.f32 %v1477_v17, %v1476_v18 }
 0xb73   :  { %v11944_v21 = vsel %vm1483_vm11, %v1478_v20, %v11897_v13 }
 0xb74   :  { %1486 = vrot.lane.b32.xlu1 %v11944_v21, %s11458_s26 }
 0xbe6   :  { %v1487_v44 = vpop.permute.xlu1 %1486 }
 0xbe7   :  { %9612 = vmatmul.mubr.msk.f32.vlgmr.msra.gmra.mrb[18].mxu1 %vm86_vm1, %v1487_v44  ;;  %9623 = vmatmul.mubr.msk.f32.vlgmr.msra.gmra.mrb[28].mxu0 %vm86_vm1, %v1487_v44 }
 0xbe8   :  { %10608 = vmatpush3.bf16.msra.mxu1 %v11624_v32  ;;  %9633 = vmatprep.mubr.msk.f32.mxu1 %vm11453_vm0, %v13398_v8 }
 0xbe9   :  { %10609 = vmatprep.subr.bf16.mxu1 %v13396_v3  ;;  %10614 = vmatpush3.bf16.msra.mxu0 %v11556_v9 }
 0xbea   :  { %10615 = vmatprep.subr.bf16.mxu0 %v13396_v3  ;;  %9644 = vmatprep.mubr.msk.f32.mxu0 %vm11453_vm0, %v13398_v8 }
 0xbec   :  { %10611 = vmatpush3.bf16.msra.mxu1 %v11637_v35 }
 0xbed   :  { %10618 = vmatprep.subr.bf16.mxu1 %v13396_v3  ;;  %10617 = vmatpush3.bf16.msra.mxu0 %v11580_v19 }
 0xbee   :  { %10624 = vmatprep.subr.bf16.mxu0 %v13396_v3 }
 0xbef   :  { %9634 = vmatmul.mubr.msk.f32.vlgmr.msra.gmra.mrb[20].mxu1 %vm86_vm1, %v1487_v44 }
 0xbf0   :  { %10620 = vmatpush3.bf16.msra.mxu1 %v11596_v26  ;;  %9655 = vmatprep.mubr.msk.f32.mxu1 %vm11453_vm0, %v13398_v8 }
 0xbf1   :  { %10621 = vmatprep.subr.bf16.mxu1 %v13396_v3 }
 0xbf4   :  { %10623 = vmatpush3.bf16.msra.mxu1 %v11609_v29 }
 0xbf5   :  { %10630 = vmatprep.subr.bf16.mxu1 %v13396_v3 }
 0xcba   :  { %v1556_v13 = vpop.f32.mrb[18].mxu1  ;;  %v1626_v22 = vpop.f32.mrb[28].mxu0 }
 0xcbb   :  { %v1557_v25 = vadd.f32 %v11672_v43, %v1556_v13  ;;  %v1627_v27 = vadd.f32 %v11694_v0, %v1626_v22  ;;  %v9613_v28 = vpop.f32.mrb[19].mxu1  ;;  %v9624_v46 = vpop.f32.mrb[29].mxu0 }
 0xcbd   :  { %v1700_v30 = vadd.f32 %v1557_v25, %v11971_v23  ;;  %1708 = vrot.lane.b32.xlu1 %v1627_v27, %s11457_s18 }
 0xcbf   :  { %v8774_v31 = vmul.f32 -1.442695, %v1700_v30 }
 0xcc1   :  { %11141 = vpow2.f32 %v8774_v31 }
 0xcc2   :  { %v1696_v58 = vpop.f32.mrb[20].mxu1 }
 0xcc3   :  { %v9635_v59 = vpop.f32.mrb[21].mxu1  ;;  %v1697_v51 = vadd.f32 %v11688_v60, %v1696_v58 }
 0xccb   :  { %v11142_v1 = vpop.eup %11141 }
 0xccc   :  { %v1704_v34 = vadd.f32 1.0, %v11142_v1 }
 0xcce   :  { %11143 = vrcp.f32 %v1704_v34 }
 0xcd8   :  { %v11144_v2 = vpop.eup %11143 }
 0xcd9   :  { %v1718_v5 = vmul.f32 %v11144_v2, %v1697_v51 }
 0xcdb   :  { %1720 = vrot.lane.b32.xlu0 %v1718_v5, %s11456_s17 }
 0xcdf   :  { %1735 = vperm.xlu0 %11090, %v1733_v7  }
 0xd2f   :  { %v1709_v15 = vpop.permute.xlu1 %1708 }
 0xd30   :  { %v1711_v6 = vadd.f32 %v1709_v15, %v11971_v23 }
 0xd32   :  { %v8775_v17 = vmul.f32 -1.442695, %v1711_v6 }
 0xd4d   :  { %v1721_v10 = vpop.permute.xlu0 %1720 }
 0xd4e   :  { %v1723_v12 = vadd.f32 %v1721_v10, %v11971_v23 }
 0xd50   :  { %11145 = vtanh.f32 %v1723_v12 }
 0xd51   :  { %11147 = vpow2.f32 %v8775_v17 }
 0xd5a   :  { %v11146_v50 = vpop.eup %11145 }
 0xd5b   :  { %1727 = vrot.lane.b32.xlu1 %v11146_v50, %s11458_s26  ;;  %v11148_v18 = vpop.eup %11147 }
 0xd5c   :  { %v1715_v20 = vadd.f32 1.0, %v11148_v18 }
 0xd5e   :  { %11149 = vrcp.f32 %v1715_v20  ;;  %v11984_v25 = vpop.permute.xlu0 %1735 }
 0xd5f   :  { %vm1737_vm13 = vcmp.eq.s32.totalorder %v11984_v25, 1 }
 0xd68   :  { %v11150_v44 = vpop.eup %11149 }
 0xd69   :  { %v1725_v13 = vsub.f32 1.0, %v11150_v44  ;;  %v1731_v27 = vmul.f32 %v11150_v44, %v11944_v21 }
 0xdcd   :  { %v1728_v22 = vpop.permute.xlu1 %1727 }
 0xdce   :  { %v1730_v28 = vmul.f32 %v1728_v22, %v1725_v13 }
 0xdd0   :  { %v1732_v46 = vadd.f32 %v1731_v27, %v1730_v28 }
 0xdd2   :  { %v11991_v30 = vsel %vm1737_vm13, %v1732_v46, %v11944_v21 }
 0xdd3   :  { %1740 = vrot.lane.b32.xlu0 %v11991_v30, %s11458_s26 }
 0xe45   :  { %v1741_v31 = vpop.permute.xlu0 %1740 }
 0xe46   :  { %9645 = vmatmul.mubr.msk.f32.vlgmr.msra.gmra.mrb[30].mxu0 %vm86_vm1, %v1741_v31  ;;  %9656 = vmatmul.mubr.msk.f32.vlgmr.msra.gmra.mrb[22].mxu1 %vm86_vm1, %v1741_v31 }
 0xe47   :  { %10626 = vmatpush3.bf16.msra.mxu0 %v11624_v32  ;;  %9666 = vmatprep.mubr.msk.f32.mxu0 %vm11453_vm0, %v13398_v8 }
 0xe48   :  { %10627 = vmatprep.subr.bf16.mxu0 %v13396_v3  ;;  %10632 = vmatpush3.bf16.msra.mxu1 %v11556_v9 }
 0xe49   :  { %10633 = vmatprep.subr.bf16.mxu1 %v13396_v3  ;;  %9677 = vmatprep.mubr.msk.f32.mxu1 %vm11453_vm0, %v13398_v8 }
 0xe4b   :  { %10629 = vmatpush3.bf16.msra.mxu0 %v11637_v35 }
 0xe4c   :  { %10636 = vmatprep.subr.bf16.mxu0 %v13396_v3  ;;  %10635 = vmatpush3.bf16.msra.mxu1 %v11580_v19  ;;  %v12018_v19 = vadd.f32 %v11752_v54, %v11667_v42 }
 0xe4d   :  { %10642 = vmatprep.subr.bf16.mxu1 %v13396_v3 }
 0xe4e   :  { %9667 = vmatmul.mubr.msk.f32.vlgmr.msra.gmra.mrb[32].mxu0 %vm86_vm1, %v1741_v31 }
 0xe4f   :  { %10638 = vmatpush3.bf16.msra.mxu0 %v11596_v26  ;;  %9688 = vmatprep.mubr.msk.f32.mxu0 %vm11453_vm0, %v13398_v8 }
 0xe50   :  { %10639 = vmatprep.subr.bf16.mxu0 %v13396_v3 }
 0xe53   :  { %10641 = vmatpush3.bf16.msra.mxu0 %v11609_v29 }
 0xe54   :  { %10648 = vmatprep.subr.bf16.mxu0 %v13396_v3 }
 0xf19   :  { %v1810_v9 = vpop.f32.mrb[30].mxu0  ;;  %v1880_v21 = vpop.f32.mrb[22].mxu1 }
 0xf1a   :  { %v1811_v58 = vadd.f32 %v11672_v43, %v1810_v9  ;;  %v1881_v59 = vadd.f32 %v11694_v0, %v1880_v21  ;;  %v9646_v26 = vpop.f32.mrb[31].mxu0  ;;  %v9657_v1 = vpop.f32.mrb[23].mxu1  ;;  %v1987_v43 = vsel %vm178_vm14, 1, %v11455_v14  ;;  %v8786_v9 = vld [vmem:[%s13385_s6 + $0x60] sm:$0xff]  ;;  %v8787_v21 = vld [vmem:[%s13385_s6 + $0x68] sm:$0xff] }
 0xf1c   :  { %v1954_v34 = vadd.f32 %v1811_v58, %v12018_v19  ;;  %1962 = vrot.lane.b32.xlu0 %v1881_v59, %s11457_s18  ;;  %v12048_v58 = vpack.c.bf16 %v8787_v21, %v8786_v9  ;;  %v8788_v59 = vld [vmem:[%s13385_s6 + $0x70] sm:$0xff] }
 0xf1e   :  { %v8779_v51 = vmul.f32 -1.442695, %v1954_v34  ;;  %v8790_v34 = vld [vmem:[%s13385_s6 + $0x80] sm:$0xff] }
 0xf20   :  { %11151 = vpow2.f32 %v8779_v51  ;;  %v8791_v51 = vld [vmem:[%s13385_s6 + $0x88] sm:$0xff] }
 0xf21   :  { %v1950_v29 = vpop.f32.mrb[32].mxu0 }
 0xf22   :  { %v9668_v2 = vpop.f32.mrb[33].mxu0  ;;  %v1951_v54 = vadd.f32 %v11688_v60, %v1950_v29  ;;  %v8795_v29 = vld [vmem:[%s13385_s6 + $0xa8] sm:$0xff] }
 0xf23   :  { %v12082_v2 = vpack.c.bf16 %v8791_v51, %v8790_v34 }
 0xf2a   :  { %v11152_v5 = vpop.eup %11151 }
 0xf2b   :  { %v1958_v7 = vadd.f32 1.0, %v11152_v5 }
 0xf2d   :  { %11153 = vrcp.f32 %v1958_v7  ;;  %v8792_v7 = vld [vmem:[%s13385_s6 + $0x90] sm:$0xff] }
 0xf37   :  { %v11154_v10 = vpop.eup %11153 }
 0xf38   :  { %v1972_v12 = vmul.f32 %v11154_v10, %v1951_v54  ;;  %v8793_v54 = vld [vmem:[%s13385_s6 + $0x98] sm:$0xff] }
 0xf39   :  { %v8797_v10 = vld [vmem:[%s13385_s6 + $0xb8] sm:$0xff] }
 0xf3a   :  { %1974 = vrot.lane.b32.xlu1 %v1972_v12, %s11456_s17  ;;  %v12104_v12 = vpack.c.bf16 %v8793_v54, %v8792_v7  ;;  %v11417_v7 = vld [vmem:[%s13387_s8 + $0x2] ss:$0 sm:$0xff] }
 0xf3e   :  { %1989 = vperm.xlu1 %11089, %v1987_v43  }
 0xf8e   :  { %v1963_v6 = vpop.permute.xlu0 %1962 }
 0xf8f   :  { %v1965_v17 = vadd.f32 %v1963_v6, %v12018_v19  ;;  %v11415_v6 = vld [vmem:[%s13387_s8] ss:$0 sm:$0xff] }
 0xf91   :  { %v8780_v60 = vmul.f32 -1.442695, %v1965_v17 }
 0xfac   :  { %v1975_v0 = vpop.permute.xlu1 %1974 }
 0xfad   :  { %v1977_v50 = vadd.f32 %v1975_v0, %v12018_v19 }
 0xfaf   :  { %11155 = vtanh.f32 %v1977_v50 }
 0xfb0   :  { %11157 = vpow2.f32 %v8780_v60 }
 0xfb9   :  { %v11156_v15 = vpop.eup %11155 }
 0xfba   :  { %1981 = vrot.lane.b32.xlu0 %v11156_v15, %s11458_s26  ;;  %v11158_v18 = vpop.eup %11157  ;;  %v12136_v15 = vadd.f32 %v11756_v56, %v11667_v42 }
 0xfbb   :  { %v1969_v20 = vadd.f32 1.0, %v11158_v18 }
 0xfbd   :  { %11159 = vrcp.f32 %v1969_v20  ;;  %v12031_v22 = vpop.permute.xlu1 %1989 }
 0xfbe   :  { %vm1991_vm15 = vcmp.eq.s32.totalorder %v12031_v22, 1 }
 0xfc7   :  { %v11160_v36 = vpop.eup %11159 }
 0xfc8   :  { %v1979_v44 = vsub.f32 1.0, %v11160_v36  ;;  %v1985_v27 = vmul.f32 %v11160_v36, %v11991_v30 }
0x102c   :  { %v1982_v13 = vpop.permute.xlu0 %1981 }
0x102d   :  { %v1984_v28 = vmul.f32 %v1982_v13, %v1979_v44  ;;  %v12145_v44 = vld [vmem:[%s13387_s8 + $0x3] ss:$0 sm:$0xff] }
0x102f   :  { %v1986_v46 = vadd.f32 %v1985_v27, %v1984_v28 }
0x1031   :  { %v12038_v31 = vsel %vm1991_vm15, %v1986_v46, %v11991_v30  ;;  %v8789_v30 = vld [vmem:[%s13385_s6 + $0x78] sm:$0xff]  ;;  %v12152_v46 = vld [vmem:[%s13387_s8 + $0x5] ss:$0 sm:$0xff] }
0x1032   :  { %1994 = vrot.lane.b32.xlu1 %v12038_v31, %s11458_s26  ;;  %v12060_v1 = vpack.c.bf16 %v8789_v30, %v8788_v59 }
0x10a4   :  { %v1995_v26 = vpop.permute.xlu1 %1994 }
0x10a5   :  { %9678 = vmatmul.mubr.msk.f32.vlgmr.msra.gmra.mrb[24].mxu1 %vm86_vm1, %v1995_v26  ;;  %9689 = vmatmul.mubr.msk.f32.vlgmr.msra.gmra.mrb[34].mxu0 %vm86_vm1, %v1995_v26 }
0x10a6   :  { %10644 = vmatpush3.bf16.msra.mxu1 %v11624_v32  ;;  %10650 = vmatpush3.bf16.msra.mxu0 %v12048_v58  ;;  %v8794_v32 = vld [vmem:[%s13385_s6 + $0xa0] sm:$0xff] }
0x10a7   :  { %10645 = vmatprep.subr.bf16.mxu1 %v13396_v3  ;;  %10651 = vmatprep.subr.bf16.mxu0 %v13396_v3  ;;  %v12084_v5 = vpack.c.bf16 %v8795_v29, %v8794_v32 }
0x10a8   :  { %9699 = vmatprep.mubr.msk.f32.mxu1 %vm11453_vm0, %v13398_v8  ;;  %9710 = vmatprep.mubr.msk.f32.mxu0 %vm11453_vm0, %v13398_v8 }
0x10aa   :  { %10647 = vmatpush3.bf16.msra.mxu1 %v11637_v35  ;;  %10653 = vmatpush3.bf16.msra.mxu0 %v12060_v1  ;;  %v8796_v35 = vld [vmem:[%s13385_s6 + $0xb0] sm:$0xff] }
0x10ab   :  { %10654 = vmatprep.subr.bf16.mxu1 %v13396_v3  ;;  %10660 = vmatprep.subr.bf16.mxu0 %v13396_v3  ;;  %v12106_v43 = vpack.c.bf16 %v8797_v10, %v8796_v35 }
0x10ad   :  { %9700 = vmatmul.mubr.msk.f32.vlgmr.msra.gmra.mrb[26].mxu1 %vm86_vm1, %v1995_v26  ;;  %9711 = vmatmul.mubr.f32.vlgmr.msra.gmra.mrb[36].mxu0 %v13398_v8  ;;  %v11416_v26 = vld [vmem:[%s13381_s2] sm:$0xff] }
0x10ae   :  { %10656 = vmatpush3.bf16.msra.mxu1 %v12082_v2  ;;  %10662 = vmatpush3.bf16.msra.mxu0 %v12084_v5  ;;  %vm179_vm2 = vcmp.gt.s32.totalorder %v11416_v26, 7  ;;  %v12181_v26 = vld [vmem:[%s13387_s8 + $0x4] ss:$0 sm:$0xff] }
0x10af   :  { %10657 = vmatprep.subr.bf16.mxu1 %v13396_v3  ;;  %10663 = vmatprep.subr.bf16.mxu0 %v13396_v3  ;;  %v2241_v29 = vsel %vm179_vm2, 1, %v11455_v14 }
0x10b0   :  { %9721 = vmatprep.mubr.msk.f32.mxu1 %vm11453_vm0, %v13398_v8  ;;  %9732 = vmatprep.mubr.msk.f32.mxu0 %vm11453_vm0, %v13398_v8 }
0x10b2   :  { %10659 = vmatpush3.bf16.msra.mxu1 %v12104_v12  ;;  %10665 = vmatpush3.bf16.msra.mxu0 %v12106_v43 }
0x10b3   :  { %10666 = vmatprep.subr.bf16.mxu1 %v13396_v3  ;;  %10672 = vmatprep.subr.bf16.mxu0 %v13396_v3 }
0x10b5   :  { %9722 = vmatmul.mubr.f32.vlgmr.msra.gmra.mrb[28].mxu1 %v13398_v8  ;;  %9733 = vmatmul.mubr.f32.vlgmr.msra.gmra.mrb[38].mxu0 %v13398_v8 }
0x10b6   :  { %10668 = vmatpush3.bf16.msra.mxu1 %v12048_v58  ;;  %10674 = vmatpush3.bf16.msra.mxu0 %v12082_v2 }
0x10b7   :  { %10669 = vmatprep.subr.bf16.mxu1 %v13396_v3  ;;  %10675 = vmatprep.subr.bf16.mxu0 %v13396_v3 }
0x10b8   :  { %9743 = vmatprep.mubr.msk.f32.mxu1 %vm11453_vm0, %v13398_v8  ;;  %9754 = vmatprep.mubr.msk.f32.mxu0 %vm11453_vm0, %v13398_v8 }
0x10ba   :  { %10671 = vmatpush3.bf16.msra.mxu1 %v12060_v1  ;;  %10677 = vmatpush3.bf16.msra.mxu0 %v12104_v12 }
0x10bb   :  { %10678 = vmatprep.subr.bf16.mxu1 %v13396_v3  ;;  %10684 = vmatprep.subr.bf16.mxu0 %v13396_v3 }
0x1178   :  { %v2064_v0 = vpop.f32.mrb[24].mxu1  ;;  %v12132_v50 = vpop.f32.mrb[34].mxu0 }
0x1179   :  { %v2065_v17 = vadd.f32 %v11415_v6, %v2064_v0  ;;  %v9679_v60 = vpop.f32.mrb[25].mxu1  ;;  %v9690_v18 = vpop.f32.mrb[35].mxu0 }
0x117b   :  { %v2208_v20 = vadd.f32 %v2065_v17, %v12136_v15 }
0x117d   :  { %v8784_v36 = vmul.f32 -1.442695, %v2208_v20 }
0x117f   :  { %11161 = vpow2.f32 %v8784_v36 }
0x1180   :  { %v2204_v13 = vpop.f32.mrb[26].mxu1  ;;  %v2340_v27 = vpop.f32.mrb[36].mxu0 }
0x1181   :  { %v2341_v42 = vadd.f32 %v12145_v44, %v2340_v27  ;;  %v9701_v56 = vpop.f32.mrb[27].mxu1  ;;  %v9712_v28 = vpop.f32.mrb[37].mxu0  ;;  %v2205_v54 = vadd.f32 %v11417_v7, %v2204_v13  ;;  %v11418_v13 = vld [vmem:[%s13386_s7] sm:$0x3] }
0x1183   :  { %2497 = vrot.lane.b32.xlu0 %v2341_v42, %s11458_s26  ;;  %v13395_v42 = vsub.s32 1, %v11659_v39 }
0x1185   :  { %v12173_v56 = vrot.slane %v11418_v13, %v13395_v42 }
0x1187   :  { %v170_v28 = vadd.f32 %v11758_v57, %v12173_v56 }
0x1188   :  { %v2416_v9 = vpop.f32.mrb[28].mxu1  ;;  %v2492_v21 = vpop.f32.mrb[38].mxu0 }
0x1189   :  { %v11162_v59 = vpop.eup %11161  ;;  %v2493_v30 = vadd.f32 %v12152_v46, %v2492_v21  ;;  %v9734_v34 = vpop.f32.mrb[39].mxu0 }
0x118a   :  { %v9723_v51 = vpop.f32.mrb[29].mxu1  ;;  %v2212_v32 = vadd.f32 1.0, %v11162_v59  ;;  %v2417_v34 = vadd.f32 %v12181_v26, %v2416_v9 }
0x118b   :  { %2515 = vrot.lane.b32.xlu1 %v2493_v30, %s11458_s26 }
0x118c   :  { %11163 = vrcp.f32 %v2212_v32  ;;  %v2507_v51 = vadd.f32 %v2417_v34, %v170_v28 }
0x118e   :  { %v8805_v32 = vmul.f32 -1.442695, %v2507_v51 }
0x118f   :  { %2243 = vperm.xlu1 %11089, %v2241_v29  }
0x1196   :  { %v11164_v35 = vpop.eup %11163 }
0x1197   :  { %v12163_v10 = vmul.f32 %v11164_v35, %v2205_v54 }
0x11f5   :  { %v2498_v0 = vpop.permute.xlu0 %2497 }
0x11f6   :  { %v2500_v6 = vadd.f32 %v2498_v0, %v12136_v15 }
0x11f8   :  { %v8804_v17 = vmul.f32 -1.442695, %v2500_v6 }
0x11fa   :  { %11165 = vpow2.f32 %v8804_v17 }
0x11fd   :  { %v2516_v36 = vpop.permute.xlu1 %2515 }
0x1204   :  { %v11166_v60 = vpop.eup %11165 }
0x1205   :  { %v2504_v18 = vadd.f32 1.0, %v11166_v60 }
0x1207   :  { %11167 = vrcp.f32 %v2504_v18 }
0x120e   :  { %v12184_v0 = vpop.permute.xlu1 %2243 }
0x120f   :  { %vm2245_vm4 = vcmp.eq.s32.totalorder %v12184_v0, 1 }
0x1211   :  { %v11168_v20 = vpop.eup %11167 }
0x1212   :  { %v2518_v27 = vmul.f32 %v11168_v20, %v2516_v36 }
0x1214   :  { %2520 = vrot.lane.b32.xlu0 %v2518_v27, %s11456_s17 }
0x1286   :  { %v2521_v21 = vpop.permute.xlu0 %2520 }
0x1287   :  { %v2523_v59 = vadd.f32 %v2521_v21, %v170_v28 }
0x1289   :  { %11169 = vtanh.f32 %v2523_v59 }
0x128a   :  { %11171 = vpow2.f32 %v8805_v32 }
0x1293   :  { %v11170_v30 = vpop.eup %11169 }
0x1294   :  { %2527 = vrot.lane.b32.xlu0 %v11170_v30, %s11458_s26  ;;  %v11172_v29 = vpop.eup %11171 }
0x1295   :  { %v2511_v7 = vadd.f32 1.0, %v11172_v29 }
0x1297   :  { %11173 = vrcp.f32 %v2511_v7 }
0x12a1   :  { %v11174_v57 = vpop.eup %11173 }
0x12a2   :  { %v2525_v54 = vsub.f32 1.0, %v11174_v57  ;;  %v2531_v17 = vmul.f32 0.0, %v11174_v57 }
0x1306   :  { %v2528_v35 = vpop.permute.xlu0 %2527 }
0x1307   :  { %v2530_v6 = vmul.f32 %v2528_v35, %v2525_v54  ;;  %v166_v35 = vadd.f32 %v11754_v55, %v12173_v56 }
0x1309   :  { %v2532_v60 = vadd.f32 %v2531_v17, %v2530_v6 }
0x130b   :  { %v2533_v18 = vsel %vm2245_vm4, %v2532_v60, 0.0 }
0x130c   :  { %9744 = vmatmul.mubr.msk.f32.vlgmr.msra.gmra.mrb[30].mxu1 %vm86_vm1, %v2533_v18  ;;  %9755 = vmatmul.mubr.msk.f32.vlgmr.msra.gmra.mrb[40].mxu0 %vm86_vm1, %v2533_v18 }
0x130d   :  { %10680 = vmatpush3.bf16.msra.mxu1 %v12084_v5  ;;  %9765 = vmatprep.mubr.msk.f32.mxu1 %vm11453_vm0, %v13398_v8 }
0x130e   :  { %10681 = vmatprep.subr.bf16.mxu1 %v13396_v3  ;;  %10686 = vmatpush3.bf16.msra.mxu0 %v12048_v58 }
0x130f   :  { %10687 = vmatprep.subr.bf16.mxu0 %v13396_v3  ;;  %9776 = vmatprep.mubr.msk.f32.mxu0 %vm11453_vm0, %v13398_v8 }
0x1311   :  { %10683 = vmatpush3.bf16.msra.mxu1 %v12106_v43 }
0x1312   :  { %10690 = vmatprep.subr.bf16.mxu1 %v13396_v3  ;;  %10689 = vmatpush3.bf16.msra.mxu0 %v12060_v1 }
0x1313   :  { %10696 = vmatprep.subr.bf16.mxu0 %v13396_v3 }
0x1314   :  { %9766 = vmatmul.mubr.msk.f32.vlgmr.msra.gmra.mrb[32].mxu1 %vm86_vm1, %v2533_v18 }
0x1315   :  { %10692 = vmatpush3.bf16.msra.mxu1 %v12082_v2  ;;  %9787 = vmatprep.mubr.msk.f32.mxu1 %vm11453_vm0, %v13398_v8 }
0x1316   :  { %10693 = vmatprep.subr.bf16.mxu1 %v13396_v3 }
0x1319   :  { %10695 = vmatpush3.bf16.msra.mxu1 %v12104_v12 }
0x131a   :  { %10702 = vmatprep.subr.bf16.mxu1 %v13396_v3 }
0x13df   :  { %v2603_v9 = vpop.f32.mrb[30].mxu1  ;;  %v2673_v20 = vpop.f32.mrb[40].mxu0 }
0x13e0   :  { %v2604_v36 = vadd.f32 %v12145_v44, %v2603_v9  ;;  %v9745_v27 = vpop.f32.mrb[31].mxu1  ;;  %v9756_v13 = vpop.f32.mrb[41].mxu0 }
0x13e2   :  { %2748 = vrot.lane.b32.xlu1 %v2604_v36, %s11458_s26 }
0x13e7   :  { %v2743_v28 = vpop.f32.mrb[32].mxu1 }
0x13e8   :  { %v2744_v21 = vadd.f32 %v12152_v46, %v2743_v28  ;;  %v9767_v59 = vpop.f32.mrb[33].mxu1 }
0x13ea   :  { %2766 = vrot.lane.b32.xlu0 %v2744_v21, %s11458_s26 }
0x1454   :  { %v2749_v30 = vpop.permute.xlu1 %2748 }
0x1455   :  { %v2751_v34 = vadd.f32 %v2749_v30, %v12018_v19  ;;  %v2674_v19 = vadd.f32 %v12181_v26, %v2673_v20 }
0x1457   :  { %v8809_v51 = vmul.f32 -1.442695, %v2751_v34  ;;  %v2758_v9 = vadd.f32 %v2674_v19, %v166_v35 }
0x1459   :  { %11175 = vpow2.f32 %v8809_v51  ;;  %v8810_v36 = vmul.f32 -1.442695, %v2758_v9 }
0x145c   :  { %v2767_v57 = vpop.permute.xlu0 %2766 }
0x1463   :  { %v11176_v32 = vpop.eup %11175 }
0x1464   :  { %v2755_v29 = vadd.f32 1.0, %v11176_v32 }
0x1466   :  { %11177 = vrcp.f32 %v2755_v29 }
0x1470   :  { %v11178_v7 = vpop.eup %11177 }
0x1471   :  { %v2769_v54 = vmul.f32 %v11178_v7, %v2767_v57 }
0x1473   :  { %2771 = vrot.lane.b32.xlu1 %v2769_v54, %s11456_s17 }
0x14e5   :  { %v2772_v6 = vpop.permute.xlu1 %2771 }
0x14e6   :  { %v2774_v17 = vadd.f32 %v2772_v6, %v166_v35 }
0x14e8   :  { %11179 = vtanh.f32 %v2774_v17 }
0x14e9   :  { %11181 = vpow2.f32 %v8810_v36 }
0x14f2   :  { %v11180_v60 = vpop.eup %11179 }
0x14f3   :  { %2778 = vrot.lane.b32.xlu0 %v11180_v60, %s11458_s26  ;;  %v11182_v27 = vpop.eup %11181 }
0x14f4   :  { %v2762_v13 = vadd.f32 1.0, %v11182_v27 }
0x14f6   :  { %11183 = vrcp.f32 %v2762_v13  ;;  %v160_v13 = vadd.f32 %v11750_v53, %v12173_v56 }
0x1500   :  { %v11184_v28 = vpop.eup %11183 }
0x1501   :  { %v2776_v21 = vsub.f32 1.0, %v11184_v28  ;;  %v2782_v30 = vmul.f32 %v11184_v28, %v2533_v18 }
0x1565   :  { %v2779_v59 = vpop.permute.xlu0 %2778 }
0x1566   :  { %v2781_v34 = vmul.f32 %v2779_v59, %v2776_v21 }
0x1568   :  { %v2783_v55 = vadd.f32 %v2782_v30, %v2781_v34 }
0x156a   :  { %v2784_v51 = vsel %vm1991_vm15, %v2783_v55, %v2533_v18 }
0x156b   :  { %9777 = vmatmul.mubr.msk.f32.vlgmr.msra.gmra.mrb[42].mxu0 %vm86_vm1, %v2784_v51  ;;  %9788 = vmatmul.mubr.msk.f32.vlgmr.msra.gmra.mrb[34].mxu1 %vm86_vm1, %v2784_v51 }
0x156c   :  { %10698 = vmatpush3.bf16.msra.mxu0 %v12084_v5  ;;  %9798 = vmatprep.mubr.msk.f32.mxu0 %vm11453_vm0, %v13398_v8 }
0x156d   :  { %10699 = vmatprep.subr.bf16.mxu0 %v13396_v3  ;;  %10704 = vmatpush3.bf16.msra.mxu1 %v12048_v58 }
0x156e   :  { %10705 = vmatprep.subr.bf16.mxu1 %v13396_v3  ;;  %9809 = vmatprep.mubr.msk.f32.mxu1 %vm11453_vm0, %v13398_v8 }
0x1570   :  { %10701 = vmatpush3.bf16.msra.mxu0 %v12106_v43 }
0x1571   :  { %10708 = vmatprep.subr.bf16.mxu0 %v13396_v3  ;;  %10707 = vmatpush3.bf16.msra.mxu1 %v12060_v1 }
0x1572   :  { %10714 = vmatprep.subr.bf16.mxu1 %v13396_v3 }
0x1573   :  { %9799 = vmatmul.mubr.msk.f32.vlgmr.msra.gmra.mrb[44].mxu0 %vm86_vm1, %v2784_v51 }
0x1574   :  { %10710 = vmatpush3.bf16.msra.mxu0 %v12082_v2  ;;  %9820 = vmatprep.mubr.msk.f32.mxu0 %vm11453_vm0, %v13398_v8 }
0x1575   :  { %10711 = vmatprep.subr.bf16.mxu0 %v13396_v3 }
0x1578   :  { %10713 = vmatpush3.bf16.msra.mxu0 %v12104_v12 }
0x1579   :  { %10720 = vmatprep.subr.bf16.mxu0 %v13396_v3 }
0x163e   :  { %v2854_v22 = vpop.f32.mrb[42].mxu0  ;;  %v2924_v18 = vpop.f32.mrb[34].mxu1 }
0x163f   :  { %v2855_v20 = vadd.f32 %v12145_v44, %v2854_v22  ;;  %v9778_v32 = vpop.f32.mrb[43].mxu0  ;;  %v9789_v29 = vpop.f32.mrb[35].mxu1 }
0x1641   :  { %2999 = vrot.lane.b32.xlu1 %v2855_v20, %s11458_s26 }
0x1646   :  { %v2994_v7 = vpop.f32.mrb[44].mxu0 }
0x1647   :  { %v2995_v57 = vadd.f32 %v12152_v46, %v2994_v7  ;;  %v9800_v54 = vpop.f32.mrb[45].mxu0 }
0x1649   :  { %3017 = vrot.lane.b32.xlu0 %v2995_v57, %s11458_s26 }
0x16b3   :  { %v3000_v35 = vpop.permute.xlu1 %2999 }
0x16b4   :  { %v3002_v6 = vadd.f32 %v3000_v35, %v11971_v23  ;;  %v2925_v23 = vadd.f32 %v12181_v26, %v2924_v18 }
0x16b6   :  { %v8814_v17 = vmul.f32 -1.442695, %v3002_v6  ;;  %v3009_v30 = vadd.f32 %v2925_v23, %v160_v13 }
0x16b8   :  { %11185 = vpow2.f32 %v8814_v17  ;;  %v8815_v34 = vmul.f32 -1.442695, %v3009_v30  ;;  %v156_v30 = vadd.f32 %v11746_v48, %v12173_v56 }
0x16bb   :  { %v3018_v36 = vpop.permute.xlu0 %3017 }
0x16c2   :  { %v11186_v60 = vpop.eup %11185 }
0x16c3   :  { %v3006_v19 = vadd.f32 1.0, %v11186_v60 }
0x16c5   :  { %11187 = vrcp.f32 %v3006_v19 }
0x16cf   :  { %v11188_v9 = vpop.eup %11187 }
0x16d0   :  { %v3020_v27 = vmul.f32 %v11188_v9, %v3018_v36 }
0x16d2   :  { %3022 = vrot.lane.b32.xlu1 %v3020_v27, %s11456_s17 }
0x1744   :  { %v3023_v28 = vpop.permute.xlu1 %3022 }
0x1745   :  { %v3025_v21 = vadd.f32 %v3023_v28, %v160_v13 }
0x1747   :  { %11189 = vtanh.f32 %v3025_v21 }
0x1748   :  { %11191 = vpow2.f32 %v8815_v34 }
0x1751   :  { %v11190_v59 = vpop.eup %11189 }
0x1752   :  { %3029 = vrot.lane.b32.xlu0 %v11190_v59, %s11458_s26  ;;  %v11192_v55 = vpop.eup %11191 }
0x1753   :  { %v3013_v22 = vadd.f32 1.0, %v11192_v55 }
0x1755   :  { %11193 = vrcp.f32 %v3013_v22 }
0x175f   :  { %v11194_v20 = vpop.eup %11193 }
0x1760   :  { %v3027_v32 = vsub.f32 1.0, %v11194_v20  ;;  %v3033_v57 = vmul.f32 %v11194_v20, %v2784_v51 }
0x17c4   :  { %v3030_v29 = vpop.permute.xlu0 %3029 }
0x17c5   :  { %v3032_v7 = vmul.f32 %v3030_v29, %v3027_v32 }
0x17c7   :  { %v3034_v53 = vadd.f32 %v3033_v57, %v3032_v7 }
0x17c9   :  { %v3035_v54 = vsel %vm1737_vm13, %v3034_v53, %v2784_v51 }
0x17ca   :  { %9810 = vmatmul.mubr.msk.f32.vlgmr.msra.gmra.mrb[36].mxu1 %vm86_vm1, %v3035_v54  ;;  %9821 = vmatmul.mubr.msk.f32.vlgmr.msra.gmra.mrb[46].mxu0 %vm86_vm1, %v3035_v54 }
0x17cb   :  { %10716 = vmatpush3.bf16.msra.mxu1 %v12084_v5  ;;  %9831 = vmatprep.mubr.msk.f32.mxu1 %vm11453_vm0, %v13398_v8 }
0x17cc   :  { %10717 = vmatprep.subr.bf16.mxu1 %v13396_v3  ;;  %10722 = vmatpush3.bf16.msra.mxu0 %v12048_v58 }
0x17cd   :  { %10723 = vmatprep.subr.bf16.mxu0 %v13396_v3  ;;  %9842 = vmatprep.mubr.msk.f32.mxu0 %vm11453_vm0, %v13398_v8 }
0x17cf   :  { %10719 = vmatpush3.bf16.msra.mxu1 %v12106_v43 }
0x17d0   :  { %10726 = vmatprep.subr.bf16.mxu1 %v13396_v3  ;;  %10725 = vmatpush3.bf16.msra.mxu0 %v12060_v1 }
0x17d1   :  { %10732 = vmatprep.subr.bf16.mxu0 %v13396_v3 }
0x17d2   :  { %9832 = vmatmul.mubr.msk.f32.vlgmr.msra.gmra.mrb[38].mxu1 %vm86_vm1, %v3035_v54 }
0x17d3   :  { %10728 = vmatpush3.bf16.msra.mxu1 %v12082_v2  ;;  %9853 = vmatprep.mubr.msk.f32.mxu1 %vm11453_vm0, %v13398_v8 }
0x17d4   :  { %10729 = vmatprep.subr.bf16.mxu1 %v13396_v3 }
0x17d7   :  { %10731 = vmatpush3.bf16.msra.mxu1 %v12104_v12 }
0x17d8   :  { %10738 = vmatprep.subr.bf16.mxu1 %v13396_v3 }
0x189d   :  { %v3105_v25 = vpop.f32.mrb[36].mxu1  ;;  %v3175_v51 = vpop.f32.mrb[46].mxu0 }
0x189e   :  { %v3106_v18 = vadd.f32 %v12145_v44, %v3105_v25  ;;  %v9811_v35 = vpop.f32.mrb[37].mxu1  ;;  %v9822_v6 = vpop.f32.mrb[47].mxu0 }
0x18a0   :  { %3250 = vrot.lane.b32.xlu1 %v3106_v18, %s11458_s26 }
0x18a5   :  { %v3245_v17 = vpop.f32.mrb[38].mxu1 }
0x18a6   :  { %v3246_v60 = vadd.f32 %v12152_v46, %v3245_v17  ;;  %v9833_v19 = vpop.f32.mrb[39].mxu1 }
0x18a8   :  { %3268 = vrot.lane.b32.xlu0 %v3246_v60, %s11458_s26 }
0x1912   :  { %v3251_v9 = vpop.permute.xlu1 %3250 }
0x1913   :  { %v3253_v36 = vadd.f32 %v3251_v9, %v11924_v37  ;;  %v3176_v37 = vadd.f32 %v12181_v26, %v3175_v51 }
0x1915   :  { %v8819_v27 = vmul.f32 -1.442695, %v3253_v36  ;;  %v3260_v20 = vadd.f32 %v3176_v37, %v156_v30 }
0x1917   :  { %11195 = vpow2.f32 %v8819_v27  ;;  %v8820_v32 = vmul.f32 -1.442695, %v3260_v20 }
0x191a   :  { %v3269_v59 = vpop.permute.xlu0 %3268 }
0x1921   :  { %v11196_v13 = vpop.eup %11195 }
0x1922   :  { %v3257_v28 = vadd.f32 1.0, %v11196_v13 }
0x1924   :  { %11197 = vrcp.f32 %v3257_v28 }
0x192e   :  { %v11198_v21 = vpop.eup %11197 }
0x192f   :  { %v3271_v23 = vmul.f32 %v11198_v21, %v3269_v59 }
0x1931   :  { %3273 = vrot.lane.b32.xlu1 %v3271_v23, %s11456_s17 }
0x19a3   :  { %v3274_v34 = vpop.permute.xlu1 %3273 }
0x19a4   :  { %v3276_v55 = vadd.f32 %v3274_v34, %v156_v30 }
0x19a6   :  { %11199 = vtanh.f32 %v3276_v55  ;;  %v150_v55 = vadd.f32 %v11742_v45, %v12173_v56 }
0x19a7   :  { %11201 = vpow2.f32 %v8820_v32 }
0x19b0   :  { %v11200_v22 = vpop.eup %11199 }
0x19b1   :  { %3280 = vrot.lane.b32.xlu0 %v11200_v22, %s11458_s26  ;;  %v11202_v29 = vpop.eup %11201 }
0x19b2   :  { %v3264_v7 = vadd.f32 1.0, %v11202_v29 }
0x19b4   :  { %11203 = vrcp.f32 %v3264_v7 }
0x19be   :  { %v11204_v57 = vpop.eup %11203 }
0x19bf   :  { %v3278_v53 = vsub.f32 1.0, %v11204_v57  ;;  %v3284_v18 = vmul.f32 %v11204_v57, %v3035_v54 }
0x1a23   :  { %v3281_v25 = vpop.permute.xlu0 %3280 }
0x1a24   :  { %v3283_v35 = vmul.f32 %v3281_v25, %v3278_v53 }
0x1a26   :  { %v3285_v48 = vadd.f32 %v3284_v18, %v3283_v35 }
0x1a28   :  { %v3286_v6 = vsel %vm1483_vm11, %v3285_v48, %v3035_v54 }
0x1a29   :  { %9843 = vmatmul.mubr.msk.f32.vlgmr.msra.gmra.mrb[48].mxu0 %vm86_vm1, %v3286_v6  ;;  %9854 = vmatmul.mubr.msk.f32.vlgmr.msra.gmra.mrb[40].mxu1 %vm86_vm1, %v3286_v6 }
0x1a2a   :  { %10734 = vmatpush3.bf16.msra.mxu0 %v12084_v5  ;;  %9864 = vmatprep.mubr.msk.f32.mxu0 %vm11453_vm0, %v13398_v8 }
0x1a2b   :  { %10735 = vmatprep.subr.bf16.mxu0 %v13396_v3  ;;  %10740 = vmatpush3.bf16.msra.mxu1 %v12048_v58 }
0x1a2c   :  { %10741 = vmatprep.subr.bf16.mxu1 %v13396_v3  ;;  %9875 = vmatprep.mubr.msk.f32.mxu1 %vm11453_vm0, %v13398_v8 }
0x1a2e   :  { %10737 = vmatpush3.bf16.msra.mxu0 %v12106_v43 }
0x1a2f   :  { %10744 = vmatprep.subr.bf16.mxu0 %v13396_v3  ;;  %10743 = vmatpush3.bf16.msra.mxu1 %v12060_v1 }
0x1a30   :  { %10750 = vmatprep.subr.bf16.mxu1 %v13396_v3 }
0x1a31   :  { %9865 = vmatmul.mubr.msk.f32.vlgmr.msra.gmra.mrb[50].mxu0 %vm86_vm1, %v3286_v6 }
0x1a32   :  { %10746 = vmatpush3.bf16.msra.mxu0 %v12082_v2  ;;  %9886 = vmatprep.mubr.msk.f32.mxu0 %vm11453_vm0, %v13398_v8 }
0x1a33   :  { %10747 = vmatprep.subr.bf16.mxu0 %v13396_v3 }
0x1a36   :  { %10749 = vmatpush3.bf16.msra.mxu0 %v12104_v12 }
0x1a37   :  { %10756 = vmatprep.subr.bf16.mxu0 %v13396_v3 }
0x1afc   :  { %v3356_v16 = vpop.f32.mrb[48].mxu0  ;;  %v3426_v54 = vpop.f32.mrb[40].mxu1 }
0x1afd   :  { %v3357_v51 = vadd.f32 %v12145_v44, %v3356_v16  ;;  %v9844_v17 = vpop.f32.mrb[49].mxu0  ;;  %v9855_v60 = vpop.f32.mrb[41].mxu1 }
0x1aff   :  { %3501 = vrot.lane.b32.xlu1 %v3357_v51, %s11458_s26 }
0x1b04   :  { %v3496_v19 = vpop.f32.mrb[50].mxu0 }
0x1b05   :  { %v3497_v9 = vadd.f32 %v12152_v46, %v3496_v19  ;;  %v9866_v36 = vpop.f32.mrb[51].mxu0 }
0x1b07   :  { %3519 = vrot.lane.b32.xlu0 %v3497_v9, %s11458_s26 }
0x1b71   :  { %v3502_v27 = vpop.permute.xlu1 %3501 }
0x1b72   :  { %v3504_v13 = vadd.f32 %v3502_v27, %v11877_v11  ;;  %v3427_v11 = vadd.f32 %v12181_v26, %v3426_v54 }
0x1b74   :  { %v8824_v28 = vmul.f32 -1.442695, %v3504_v13  ;;  %v3511_v32 = vadd.f32 %v3427_v11, %v150_v55 }
0x1b76   :  { %11205 = vpow2.f32 %v8824_v28  ;;  %v8825_v29 = vmul.f32 -1.442695, %v3511_v32 }
0x1b79   :  { %v3520_v30 = vpop.permute.xlu0 %3519 }
0x1b80   :  { %v11206_v21 = vpop.eup %11205 }
0x1b81   :  { %v3508_v59 = vadd.f32 1.0, %v11206_v21 }
0x1b83   :  { %11207 = vrcp.f32 %v3508_v59 }
0x1b8d   :  { %v11208_v23 = vpop.eup %11207 }
0x1b8e   :  { %v3522_v34 = vmul.f32 %v11208_v23, %v3520_v30 }
0x1b90   :  { %3524 = vrot.lane.b32.xlu1 %v3522_v34, %s11456_s17  ;;  %v146_v34 = vadd.f32 %v11738_v41, %v12173_v56 }
0x1c02   :  { %v3525_v22 = vpop.permute.xlu1 %3524 }
0x1c03   :  { %v3527_v37 = vadd.f32 %v3525_v22, %v150_v55 }
0x1c05   :  { %11209 = vtanh.f32 %v3527_v37 }
0x1c06   :  { %11211 = vpow2.f32 %v8825_v29 }
0x1c0f   :  { %v11210_v20 = vpop.eup %11209 }
0x1c10   :  { %3531 = vrot.lane.b32.xlu0 %v11210_v20, %s11458_s26  ;;  %v11212_v7 = vpop.eup %11211 }
0x1c11   :  { %v3515_v57 = vadd.f32 1.0, %v11212_v7 }
0x1c13   :  { %11213 = vrcp.f32 %v3515_v57 }
0x1c1d   :  { %v11214_v53 = vpop.eup %11213 }
0x1c1e   :  { %v3529_v25 = vsub.f32 1.0, %v11214_v53  ;;  %v3535_v48 = vmul.f32 %v11214_v53, %v3286_v6 }
0x1c82   :  { %v3532_v18 = vpop.permute.xlu0 %3531 }
0x1c83   :  { %v3534_v35 = vmul.f32 %v3532_v18, %v3529_v25 }
0x1c85   :  { %v3536_v45 = vadd.f32 %v3535_v48, %v3534_v35 }
0x1c87   :  { %v3537_v16 = vsel %vm1229_vm9, %v3536_v45, %v3286_v6 }
0x1c88   :  { %9876 = vmatmul.mubr.msk.f32.vlgmr.msra.gmra.mrb[42].mxu1 %vm86_vm1, %v3537_v16  ;;  %9887 = vmatmul.mubr.msk.f32.vlgmr.msra.gmra.mrb[52].mxu0 %vm86_vm1, %v3537_v16 }
0x1c89   :  { %10752 = vmatpush3.bf16.msra.mxu1 %v12084_v5  ;;  %9897 = vmatprep.mubr.msk.f32.mxu1 %vm11453_vm0, %v13398_v8 }
0x1c8a   :  { %10753 = vmatprep.subr.bf16.mxu1 %v13396_v3  ;;  %10758 = vmatpush3.bf16.msra.mxu0 %v12048_v58 }
0x1c8b   :  { %10759 = vmatprep.subr.bf16.mxu0 %v13396_v3  ;;  %9908 = vmatprep.mubr.msk.f32.mxu0 %vm11453_vm0, %v13398_v8 }
0x1c8d   :  { %10755 = vmatpush3.bf16.msra.mxu1 %v12106_v43 }
0x1c8e   :  { %10762 = vmatprep.subr.bf16.mxu1 %v13396_v3  ;;  %10761 = vmatpush3.bf16.msra.mxu0 %v12060_v1 }
0x1c8f   :  { %10768 = vmatprep.subr.bf16.mxu0 %v13396_v3 }
0x1c90   :  { %9898 = vmatmul.mubr.msk.f32.vlgmr.msra.gmra.mrb[44].mxu1 %vm86_vm1, %v3537_v16 }
0x1c91   :  { %10764 = vmatpush3.bf16.msra.mxu1 %v12082_v2  ;;  %9919 = vmatprep.mubr.msk.f32.mxu1 %vm11453_vm0, %v13398_v8 }
0x1c92   :  { %10765 = vmatprep.subr.bf16.mxu1 %v13396_v3 }
0x1c95   :  { %10767 = vmatpush3.bf16.msra.mxu1 %v12104_v12 }
0x1c96   :  { %10774 = vmatprep.subr.bf16.mxu1 %v13396_v3 }
0x1d5b   :  { %v3607_v63 = vpop.f32.mrb[42].mxu1  ;;  %v3677_v6 = vpop.f32.mrb[52].mxu0 }
0x1d5c   :  { %v3608_v54 = vadd.f32 %v12145_v44, %v3607_v63  ;;  %v9877_v51 = vpop.f32.mrb[43].mxu1  ;;  %v9888_v17 = vpop.f32.mrb[53].mxu0 }
0x1d5e   :  { %3752 = vrot.lane.b32.xlu1 %v3608_v54, %s11458_s26 }
0x1d63   :  { %v3747_v60 = vpop.f32.mrb[44].mxu1 }
0x1d64   :  { %v3748_v19 = vadd.f32 %v12152_v46, %v3747_v60  ;;  %v9899_v9 = vpop.f32.mrb[45].mxu1 }
0x1d65   :  { %v140_v9 = vadd.f32 %v11683_v52, %v12173_v56 }
0x1d66   :  { %3770 = vrot.lane.b32.xlu0 %v3748_v19, %s11458_s26 }
0x1dd0   :  { %v3753_v36 = vpop.permute.xlu1 %3752 }
0x1dd1   :  { %v3755_v27 = vadd.f32 %v3753_v36, %v11830_v4  ;;  %v3678_v4 = vadd.f32 %v12181_v26, %v3677_v6 }
0x1dd3   :  { %v8829_v13 = vmul.f32 -1.442695, %v3755_v27  ;;  %v3762_v20 = vadd.f32 %v3678_v4, %v146_v34  ;;  %v4307_v27 = vld [vmem:[%s13388_s9 + $0x18] sm:$0xff]  ;;  %v4306_v4 = vld [vmem:[%s13388_s9 + $0x10] sm:$0xff] }
0x1dd5   :  { %11215 = vpow2.f32 %v8829_v13  ;;  %v8830_v11 = vmul.f32 -1.442695, %v3762_v20 }
0x1dd8   :  { %v3771_v23 = vpop.permute.xlu0 %3770 }
0x1ddf   :  { %v11216_v28 = vpop.eup %11215 }
0x1de0   :  { %v3759_v21 = vadd.f32 1.0, %v11216_v28 }
0x1de2   :  { %11217 = vrcp.f32 %v3759_v21 }
0x1dec   :  { %v11218_v59 = vpop.eup %11217 }
0x1ded   :  { %v3773_v30 = vmul.f32 %v11218_v59, %v3771_v23 }
0x1def   :  { %3775 = vrot.lane.b32.xlu1 %v3773_v30, %s11456_s17 }
0x1e61   :  { %v3776_v55 = vpop.permute.xlu1 %3775 }
0x1e62   :  { %v3778_v22 = vadd.f32 %v3776_v55, %v146_v34 }
0x1e64   :  { %11219 = vtanh.f32 %v3778_v22 }
0x1e65   :  { %11221 = vpow2.f32 %v8830_v11  ;;  %v4309_v11 = vld [vmem:[%s13388_s9 + $0x28] sm:$0xff] }
0x1e6e   :  { %v11220_v37 = vpop.eup %11219 }
0x1e6f   :  { %3782 = vrot.lane.b32.xlu0 %v11220_v37, %s11458_s26  ;;  %v11222_v32 = vpop.eup %11221  ;;  %v4304_v37 = vld [vmem:[%s13388_s9] sm:$0xff] }
0x1e70   :  { %v3766_v29 = vadd.f32 1.0, %v11222_v32  ;;  %v4311_v32 = vld [vmem:[%s13388_s9 + $0x38] sm:$0xff] }
0x1e72   :  { %11223 = vrcp.f32 %v3766_v29 }
0x1e7c   :  { %v11224_v7 = vpop.eup %11223 }
0x1e7d   :  { %v3780_v57 = vsub.f32 1.0, %v11224_v7  ;;  %v3786_v25 = vmul.f32 %v11224_v7, %v3537_v16  ;;  %v4312_v7 = vpack.c.bf16 %v4306_v4, %v4304_v37 }
0x1ee1   :  { %v3783_v53 = vpop.permute.xlu0 %3782 }
0x1ee2   :  { %v3785_v18 = vmul.f32 %v3783_v53, %v3780_v57  ;;  %v4308_v57 = vld [vmem:[%s13388_s9 + $0x20] sm:$0xff]  ;;  %v4310_v53 = vld [vmem:[%s13388_s9 + $0x30] sm:$0xff] }
0x1ee4   :  { %v3787_v41 = vadd.f32 %v3786_v25, %v3785_v18  ;;  %v4315_v18 = vpack.c.bf16 %v4311_v32, %v4309_v11 }
0x1ee6   :  { %v12354_v35 = vsel %vm975_vm7, %v3787_v41, %v3537_v16  ;;  %v4314_v41 = vpack.c.bf16 %v4310_v53, %v4308_v57 }
0x1ee7   :  { %9909 = vmatmul.mubr.msk.f32.vlgmr.msra.gmra.mrb[54].mxu0 %vm86_vm1, %v12354_v35  ;;  %9920 = vmatmul.mubr.msk.f32.vlgmr.msra.gmra.mrb[46].mxu1 %vm86_vm1, %v12354_v35 }
0x1ee8   :  { %10770 = vmatpush3.bf16.msra.mxu0 %v12084_v5  ;;  %9930 = vmatprep.mubr.msk.f32.mxu0 %vm11453_vm0, %v13398_v8 }
0x1ee9   :  { %10771 = vmatprep.subr.bf16.mxu0 %v13396_v3  ;;  %10776 = vmatpush3.bf16.msra.mxu1 %v12048_v58 }
0x1eea   :  { %10777 = vmatprep.subr.bf16.mxu1 %v13396_v3  ;;  %9941 = vmatprep.mubr.msk.f32.mxu1 %vm11453_vm0, %v13398_v8 }
0x1eec   :  { %10773 = vmatpush3.bf16.msra.mxu0 %v12106_v43 }
0x1eed   :  { %10780 = vmatprep.subr.bf16.mxu0 %v13396_v3  ;;  %10779 = vmatpush3.bf16.msra.mxu1 %v12060_v1 }
0x1eee   :  { %10786 = vmatprep.subr.bf16.mxu1 %v13396_v3 }
0x1eef   :  { %9931 = vmatmul.mubr.msk.f32.vlgmr.msra.gmra.mrb[56].mxu0 %vm86_vm1, %v12354_v35 }
0x1ef0   :  { %10782 = vmatpush3.bf16.msra.mxu0 %v12082_v2  ;;  %9952 = vmatprep.mubr.msk.f32.mxu0 %vm11453_vm0, %v13398_v8 }
0x1ef1   :  { %10783 = vmatprep.subr.bf16.mxu0 %v13396_v3 }
0x1ef4   :  { %10785 = vmatpush3.bf16.msra.mxu0 %v12104_v12 }
0x1fba   :  { %v3858_v61 = vpop.f32.mrb[54].mxu0  ;;  %v3928_v58 = vpop.f32.mrb[46].mxu1 }
0x1fbb   :  { %v3859_v48 = vadd.f32 %v12145_v44, %v3858_v61  ;;  %v9910_v45 = vpop.f32.mrb[55].mxu0  ;;  %v9921_v1 = vpop.f32.mrb[47].mxu1  ;;  %v3929_v21 = vadd.f32 %v12181_v26, %v3928_v58  ;;  %v4291_v61 = vld [vmem:[%s13380_s1] sm:$0xff] }
0x1fbc   :  { %v4300_v58 = vpack.c.bf16 %v4292_v33, %v4291_v61  ;;  %v4423_v45 = vld [vmem:[%s13389_s10 + $0x10] sm:$0xff]  ;;  %v4424_v1 = vld [vmem:[%s13389_s10 + $0x18] sm:$0xff]  ;;  %v12559_v61 = vld [vmem:[%s13391_s12 + $0x2] ss:$0 sm:$0xff] }
0x1fbd   :  { %4003 = vrot.lane.b32.xlu1 %v3859_v48, %s11458_s26  ;;  %v4013_v59 = vadd.f32 %v3929_v21, %v140_v9 }
0x1fbf   :  { %v8835_v52 = vmul.f32 -1.442695, %v4013_v59 }
0x1fc2   :  { %v3998_v16 = vpop.f32.mrb[56].mxu0 }
0x1fc3   :  { %v3999_v63 = vadd.f32 %v12152_v46, %v3998_v16  ;;  %v9932_v6 = vpop.f32.mrb[57].mxu0  ;;  %v8845_v16 = vld [vmem:[%s13389_s10 + $0x20] sm:$0xff] }
0x1fc5   :  { %4021 = vrot.lane.b32.xlu0 %v3999_v63, %s11458_s26  ;;  %v12461_v63 = vpack.c.bf16 %v4424_v1, %v4423_v45 }
0x202f   :  { %v4004_v2 = vpop.permute.xlu1 %4003 }
0x2030   :  { %v4006_v54 = vadd.f32 %v4004_v2, %v11783_v62  ;;  %v4305_v62 = vld [vmem:[%s13388_s9 + $0x8] sm:$0xff]  ;;  %v8847_v2 = vld [vmem:[%s13389_s10 + $0x30] sm:$0xff] }
0x2031   :  { %v4313_v13 = vpack.c.bf16 %v4307_v27, %v4305_v62 }
0x2032   :  { %v8834_v51 = vmul.f32 -1.442695, %v4006_v54  ;;  %v8848_v54 = vld [vmem:[%s13389_s10 + $0x38] sm:$0xff] }
0x2033   :  { %4340 = vmatprep.subr.bf16.mxu0 %v4313_v13 }
0x2034   :  { %11225 = vpow2.f32 %v8834_v51  ;;  %v12478_v51 = vpack.c.bf16 %v8848_v54, %v8847_v2  ;;  %v4294_v2 = vld [vmem:[%s13380_s1 + $0x18] sm:$0xff] }
0x2037   :  { %v4022_v44 = vpop.permute.xlu0 %4021 }
0x203e   :  { %v11226_v12 = vpop.eup %11225 }
0x203f   :  { %v4010_v17 = vadd.f32 1.0, %v11226_v12  ;;  %v8849_v12 = vld [vmem:[%s13389_s10 + $0x40] sm:$0xff] }
0x2041   :  { %11227 = vrcp.f32 %v4010_v17  ;;  %v8850_v17 = vld [vmem:[%s13389_s10 + $0x48] sm:$0xff] }
0x204b   :  { %v11228_v60 = vpop.eup %11227 }
0x204c   :  { %v4024_v19 = vmul.f32 %v11228_v60, %v4022_v44  ;;  %v12495_v60 = vpack.c.bf16 %v8850_v17, %v8849_v12  ;;  %v8851_v44 = vld [vmem:[%s13389_s10 + $0x50] sm:$0xff]  ;;  %v4295_v12 = vld [vmem:[%s13380_s1 + $0x20] sm:$0xff]  ;;  %v4296_v17 = vld [vmem:[%s13380_s1 + $0x28] sm:$0xff] }
0x204e   :  { %4026 = vrot.lane.b32.xlu1 %v4024_v19, %s11456_s17  ;;  %v8852_v19 = vld [vmem:[%s13389_s10 + $0x58] sm:$0xff] }
0x20c0   :  { %v4027_v46 = vpop.permute.xlu1 %4026 }
0x20c1   :  { %v4029_v36 = vadd.f32 %v4027_v46, %v140_v9  ;;  %v12506_v9 = vpack.c.bf16 %v8852_v19, %v8851_v44  ;;  %v4302_v19 = vpack.c.bf16 %v4296_v17, %v4295_v12 }
0x20c3   :  { %11229 = vtanh.f32 %v4029_v36 }
0x20c4   :  { %11231 = vpow2.f32 %v8835_v52 }
0x20cd   :  { %v11230_v28 = vpop.eup %11229 }
0x20ce   :  { %4033 = vrot.lane.b32.xlu0 %v11230_v28, %s11458_s26  ;;  %v11232_v23 = vpop.eup %11231  ;;  %v4316_v28 = vld [vmem:[%s13390_s11] sm:$0x3] }
0x20cf   :  { %v4017_v30 = vadd.f32 1.0, %v11232_v23 }
0x20d1   :  { %11233 = vrcp.f32 %v4017_v30  ;;  %v12535_v30 = vrot.slane %v4316_v28, %v78_v40  ;;  %v12552_v40 = vld [vmem:[%s13391_s12 + $0x1] ss:$0 sm:$0xff] }
0x20db   :  { %v11234_v34 = vpop.eup %11233 }
0x20dc   :  { %v4031_v55 = vsub.f32 1.0, %v11234_v34  ;;  %v4037_v26 = vmul.f32 %v11234_v34, %v12354_v35 }
0x2140   :  { %v4034_v22 = vpop.permute.xlu0 %4033 }
0x2141   :  { %v4036_v20 = vmul.f32 %v4034_v22, %v4031_v55  ;;  %v12542_v55 = vld [vmem:[%s13391_s12] ss:$0 sm:$0xff] }
0x2143   :  { %v4038_v29 = vadd.f32 %v4037_v26, %v4036_v20 }
0x2145   :  { %v12417_v25 = vsel %vm721_vm5, %v4038_v29, %v12354_v35  ;;  %v4421_v35 = vld [vmem:[%s13389_s10] sm:$0xff] }
0x2146   :  { %9942 = vmatmul.mubr.msk.f32.vlgmr.msra.gmra.mrb[48].mxu1 %vm86_vm1, %v12417_v25  ;;  %9953 = vmatmul.mubr.msk.f32.vlgmr.msra.gmra.mrb[58].mxu0 %vm86_vm1, %v12417_v25 }
0x2147   :  { %10788 = vmatpush3.bf16.msra.mxu1 %v12084_v5  ;;  %4341 = vmatpush1.bf16.msra.mxu0 %v4312_v7  ;;  %v4422_v5 = vld [vmem:[%s13389_s10 + $0x8] sm:$0xff] }
0x2148   :  { %10789 = vmatprep.subr.bf16.mxu1 %v13396_v3  ;;  %9963 = vmatprep.mubr.msk.f32.mxu1 %vm11453_vm0, %v13398_v8  ;;  %v12441_v48 = vpack.c.bf16 %v4422_v5, %v4421_v35  ;;  %v12565_v35 = vld [vmem:[%s13382_s3] sm:$0xff] }
0x2149   :  { %4342 = vmatprep.subr.bf16.mxu0 %v4315_v18  ;;  %4372 = vmatprep.mubr.bf16.mxu0 %v11455_v14  ;;  %vm4413_vm5 = vcmp.gt.s32.totalorder %v12565_v35, 0  ;;  %vm4414_vm7 = vcmp.gt.s32.totalorder %v12565_v35, 1  ;;  %vm4415_vm9 = vcmp.gt.s32.totalorder %v12565_v35, 2  ;;  %vm4416_vm11 = vcmp.gt.s32.totalorder %v12565_v35, 3 }
0x214a   :  { %v4701_v45 = vsel %vm4413_vm5, 1, %v11455_v14  ;;  %vm4417_vm13 = vcmp.gt.s32.totalorder %v12565_v35, 4  ;;  %vm4418_vm15 = vcmp.gt.s32.totalorder %v12565_v35, 5  ;;  %vm4419_vm5 = vcmp.gt.s32.totalorder %v12565_v35, 6 }
0x214b   :  { %10791 = vmatpush3.bf16.msra.mxu1 %v12106_v43  ;;  %4343 = vmatpush1.bf16.msra.mxu0 %v4314_v41  ;;  %v8846_v43 = vld [vmem:[%s13389_s10 + $0x28] sm:$0xff] }
0x214c   :  { %10792 = vmatprep.subr.bf16.mxu1 %v13396_v3  ;;  %10816 = vmatprep.subr.bf16.mxu0 %v13396_v3  ;;  %v12465_v6 = vpack.c.bf16 %v8846_v43, %v8845_v16  ;;  %v4293_v43 = vld [vmem:[%s13380_s1 + $0x10] sm:$0xff] }
0x214d   :  { %v4301_v54 = vpack.c.bf16 %v4294_v2, %v4293_v43 }
0x214e   :  { %9964 = vmatmul.mubr.msk.f32.vlgmr.msra.gmra.mrb[50].mxu1 %vm86_vm1, %v12417_v25  ;;  %8841 = vmatmul.mubr.msk.bf16.vlgmr.msra.gmra.mrb[60].mxu0 %vm86_vm1, %v4300_v58 }
0x214f   :  { %10794 = vmatpush3.bf16.msra.mxu1 %v12441_v48  ;;  %9974 = vmatprep.mubr.msk.f32.mxu1 %vm11453_vm0, %v13398_v8 }
0x2150   :  { %10795 = vmatprep.subr.bf16.mxu1 %v13396_v3  ;;  %4382 = vmatprep.mubr.bf16.mxu0 %v11455_v14 }
0x2151   :  { %10818 = vmatpush3.bf16.msra.mxu0 %v12465_v6 }
0x2152   :  { %10819 = vmatprep.subr.bf16.mxu0 %v13396_v3 }
0x2153   :  { %10797 = vmatpush3.bf16.msra.mxu1 %v12461_v63 }
0x2154   :  { %10798 = vmatprep.subr.bf16.mxu1 %v13396_v3 }
0x2155   :  { %10821 = vmatpush3.bf16.msra.mxu0 %v12478_v51 }
0x2156   :  { %9975 = vmatmul.mubr.f32.vlgmr.msra.gmra.mrb[52].mxu1 %v13398_v8  ;;  %10828 = vmatprep.subr.bf16.mxu0 %v13396_v3 }
0x2157   :  { %10800 = vmatpush3.bf16.msra.mxu1 %v12465_v6  ;;  %9985 = vmatprep.mubr.msk.f32.mxu1 %vm11453_vm0, %v13398_v8 }
0x2158   :  { %10801 = vmatprep.subr.bf16.mxu1 %v13396_v3  ;;  %8842 = vmatmul.mubr.msk.bf16.gmra.mrb[64].mxu0 %vm86_vm1, %v4301_v54 }
0x2159   :  { %4392 = vmatprep.mubr.bf16.mxu0 %v11455_v14 }
0x215b   :  { %10803 = vmatpush3.bf16.msra.mxu1 %v12478_v51 }
0x215c   :  { %10804 = vmatprep.subr.bf16.mxu1 %v13396_v3 }
0x215e   :  { %9986 = vmatmul.mubr.f32.vlgmr.msra.gmra.mrb[54].mxu1 %v13398_v8 }
0x215f   :  { %10806 = vmatpush3.bf16.msra.mxu1 %v12495_v60  ;;  %9996 = vmatprep.mubr.msk.f32.mxu1 %vm11453_vm0, %v13398_v8 }
0x2160   :  { %10807 = vmatprep.subr.bf16.mxu1 %v13396_v3  ;;  %8843 = vmatmul.mubr.msk.bf16.gmra.mrb[68].mxu0 %vm86_vm1, %v4302_v19 }
0x2161   :  { %4402 = vmatprep.mubr.bf16.mxu0 %v11455_v14 }
0x2163   :  { %10809 = vmatpush3.bf16.msra.mxu1 %v12506_v9 }
0x2164   :  { %10810 = vmatprep.subr.bf16.mxu1 %v13396_v3 }
0x2166   :  { %9997 = vmatmul.mubr.f32.vlgmr.msra.gmra.mrb[56].mxu1 %v13398_v8 }
0x2167   :  { %10812 = vmatpush3.bf16.msra.mxu1 %v12441_v48  ;;  %10007 = vmatprep.mubr.msk.f32.mxu1 %vm11453_vm0, %v13398_v8 }
0x2168   :  { %10813 = vmatprep.subr.bf16.mxu1 %v13396_v3 }
0x216b   :  { %10815 = vmatpush3.bf16.msra.mxu1 %v12461_v63 }
0x216c   :  { %10822 = vmatprep.subr.bf16.mxu1 %v13396_v3 }
0x2219   :  { %v12520_v46 = vpop.f32.mrb[48].mxu1  ;;  %v12522_v36 = vpop.f32.mrb[58].mxu0 }
0x221a   :  { %v9943_v62 = vpop.f32.mrb[49].mxu1  ;;  %v9954_v27 = vpop.f32.mrb[59].mxu0 }
0x221b   :  { %v4297_v62 = vld [vmem:[%s13380_s1 + $0x30] sm:$0xff]  ;;  %v4298_v27 = vld [vmem:[%s13380_s1 + $0x38] sm:$0xff] }
0x221c   :  { %v4303_v28 = vpack.c.bf16 %v4298_v27, %v4297_v62 }
0x221e   :  { %8844 = vmatmul.mubr.msk.bf16.gmra.mrb[72].mxu0 %vm86_vm1, %v4303_v28 }
0x221f   :  { %10018 = vmatprep.mubr.msk.f32.mxu0 %vm11453_vm0, %v13398_v8 }
0x2221   :  { %v12524_v13 = vpop.f32.mrb[50].mxu1  ;;  %v4374_v21 = vpop.f32.mrb[60].mxu0 }
0x2222   :  { %v9965_v59 = vpop.f32.mrb[51].mxu1  ;;  %v12529_v52 = vpop.f32.mrb[61].mxu0  ;;  %v12545_v22 = vadd.f32 %v4374_v21, %v12535_v30 }
0x2223   :  { %v12531_v23 = vpop.f32.mrb[62].mxu0 }
0x2224   :  { %v12537_v34 = vpop.f32.mrb[63].mxu0  ;;  %v12654_v27 = vadd.f32 %v12531_v23, %v12535_v30 }
0x2229   :  { %v4512_v37 = vpop.f32.mrb[52].mxu1 }
0x222a   :  { %v4513_v4 = vadd.f32 %v12542_v55, %v4512_v37  ;;  %v9976_v20 = vpop.f32.mrb[53].mxu1 }
0x222c   :  { %v4668_v26 = vadd.f32 %v4513_v4, %v12545_v22 }
0x222e   :  { %v8858_v11 = vmul.f32 -1.442695, %v4668_v26 }
0x2230   :  { %11235 = vpow2.f32 %v8858_v11 }
0x2231   :  { %v4588_v32 = vpop.f32.mrb[54].mxu1 }
0x2232   :  { %v4589_v29 = vadd.f32 %v12552_v40, %v4588_v32  ;;  %v9987_v7 = vpop.f32.mrb[55].mxu1 }
0x2234   :  { %4676 = vrot.lane.b32.xlu0 %v4589_v29, %s11457_s18 }
0x2239   :  { %v4664_v57 = vpop.f32.mrb[56].mxu1 }
0x223a   :  { %v11236_v53 = vpop.eup %11235  ;;  %v9998_v18 = vpop.f32.mrb[57].mxu1  ;;  %v4665_v33 = vadd.f32 %v12559_v61, %v4664_v57 }
0x223b   :  { %v4672_v41 = vadd.f32 1.0, %v11236_v53 }
0x223d   :  { %11237 = vrcp.f32 %v4672_v41  ;;  %v12607_v41 = vpop.f32.mrb[64].mxu0 }
0x2247   :  { %v11238_v5 = vpop.eup %11237 }
0x2248   :  { %v4686_v58 = vmul.f32 %v11238_v5, %v4665_v33  ;;  %v12609_v33 = vpop.f32.mrb[65].mxu0 }
0x2249   :  { %v12611_v5 = vpop.f32.mrb[66].mxu0 }
0x224a   :  { %4688 = vrot.lane.b32.xlu1 %v4686_v58, %s11456_s17  ;;  %v12613_v58 = vpop.f32.mrb[67].mxu0 }
0x224e   :  { %4703 = vperm.xlu1 %11089, %v4701_v45   ;;  %v12615_v45 = vpop.f32.mrb[68].mxu0 }
0x22a6   :  { %v4677_v21 = vpop.permute.xlu0 %4676 }
0x22a7   :  { %v4679_v59 = vadd.f32 %v4677_v21, %v12545_v22 }
0x22a9   :  { %v8859_v37 = vmul.f32 -1.442695, %v4679_v59 }
0x22bc   :  { %v4689_v1 = vpop.permute.xlu1 %4688 }
0x22bd   :  { %v4691_v16 = vadd.f32 %v4689_v1, %v12545_v22  ;;  %v12617_v1 = vpop.f32.mrb[69].mxu0 }
0x22bf   :  { %11239 = vtanh.f32 %v4691_v16  ;;  %v12619_v16 = vpop.f32.mrb[70].mxu0 }
0x22c0   :  { %11241 = vpow2.f32 %v8859_v37  ;;  %v12621_v43 = vpop.f32.mrb[71].mxu0 }
0x22c9   :  { %v11240_v44 = vpop.eup %11239 }
0x22ca   :  { %4695 = vrot.lane.b32.xlu0 %v11240_v44, %s11458_s26  ;;  %v11242_v4 = vpop.eup %11241 }
0x22cb   :  { %v4683_v20 = vadd.f32 1.0, %v11242_v4 }
0x22cd   :  { %11243 = vrcp.f32 %v4683_v20  ;;  %v12598_v29 = vpop.permute.xlu1 %4703 }
0x22ce   :  { %13403 = vst [vmem:[#allocation7_spill] sm:$0xff] %v12598_v29  ;;  %vm4705_vm6 = vcmp.eq.s32.totalorder %v12598_v29, 1 }
0x22d7   :  { %v11244_v26 = vpop.eup %11243 }
0x22d8   :  { %v4693_v11 = vsub.f32 1.0, %v11244_v26  ;;  %v4699_v7 = vmul.f32 0.0, %v11244_v26 }
0x22f1   :  { %v12623_v2 = vpop.f32.mrb[72].mxu0 }
0x22f2   :  { %v12625_v54 = vpop.f32.mrb[73].mxu0 }
0x22f3   :  { %v12627_v12 = vpop.f32.mrb[74].mxu0 }
0x22f4   :  { %v12629_v17 = vpop.f32.mrb[75].mxu0 }
0x233c   :  { %v4696_v32 = vpop.permute.xlu0 %4695 }
0x233d   :  { %v4698_v57 = vmul.f32 %v4696_v32, %v4693_v11 }
0x233f   :  { %v4700_v53 = vadd.f32 %v4699_v7, %v4698_v57 }
0x2341   :  { %v12603_v18 = vsel %vm4705_vm6, %v4700_v53, 0.0 }
0x2342   :  { %4708 = vrot.lane.b32.xlu1 %v12603_v18, %s11458_s26 }
0x23b4   :  { %v4709_v44 = vpop.permute.xlu1 %4708 }
0x23b5   :  { %10008 = vmatmul.mubr.msk.f32.vlgmr.msra.gmra.mrb[58].mxu1 %vm86_vm1, %v4709_v44  ;;  %10019 = vmatmul.mubr.msk.f32.vlgmr.msra.gmra.mrb[76].mxu0 %vm86_vm1, %v4709_v44 }
0x23b6   :  { %10824 = vmatpush3.bf16.msra.mxu1 %v12495_v60  ;;  %10029 = vmatprep.mubr.msk.f32.mxu1 %vm11453_vm0, %v13398_v8 }
0x23b7   :  { %10825 = vmatprep.subr.bf16.mxu1 %v13396_v3  ;;  %10830 = vmatpush3.bf16.msra.mxu0 %v12441_v48 }
0x23b8   :  { %10831 = vmatprep.subr.bf16.mxu0 %v13396_v3  ;;  %10040 = vmatprep.mubr.msk.f32.mxu0 %vm11453_vm0, %v13398_v8 }
0x23ba   :  { %10827 = vmatpush3.bf16.msra.mxu1 %v12506_v9 }
0x23bb   :  { %10834 = vmatprep.subr.bf16.mxu1 %v13396_v3  ;;  %10833 = vmatpush3.bf16.msra.mxu0 %v12461_v63 }
0x23bc   :  { %10840 = vmatprep.subr.bf16.mxu0 %v13396_v3 }
0x23bd   :  { %10030 = vmatmul.mubr.msk.f32.vlgmr.msra.gmra.mrb[60].mxu1 %vm86_vm1, %v4709_v44  ;;  %v4955_v44 = vsel %vm4414_vm7, 1, %v11455_v14 }
0x23be   :  { %10836 = vmatpush3.bf16.msra.mxu1 %v12465_v6  ;;  %10051 = vmatprep.mubr.msk.f32.mxu1 %vm11453_vm0, %v13398_v8 }
0x23bf   :  { %10837 = vmatprep.subr.bf16.mxu1 %v13396_v3 }
0x23c2   :  { %10839 = vmatpush3.bf16.msra.mxu1 %v12478_v51 }
0x23c3   :  { %10846 = vmatprep.subr.bf16.mxu1 %v13396_v3 }
0x2488   :  { %v4778_v19 = vpop.f32.mrb[58].mxu1  ;;  %v4848_v62 = vpop.f32.mrb[76].mxu0 }
0x2489   :  { %v4779_v28 = vadd.f32 %v12542_v55, %v4778_v19  ;;  %v4849_v21 = vadd.f32 %v12552_v40, %v4848_v62  ;;  %v10009_v59 = vpop.f32.mrb[59].mxu1  ;;  %v10020_v37 = vpop.f32.mrb[77].mxu0 }
0x248b   :  { %v4922_v4 = vadd.f32 %v4779_v28, %v12654_v27  ;;  %4930 = vrot.lane.b32.xlu1 %v4849_v21, %s11457_s18 }
0x248d   :  { %v8863_v20 = vmul.f32 -1.442695, %v4922_v4 }
0x248f   :  { %11245 = vpow2.f32 %v8863_v20 }
0x2490   :  { %v4918_v26 = vpop.f32.mrb[60].mxu1 }
0x2491   :  { %v10031_v11 = vpop.f32.mrb[61].mxu1  ;;  %v4919_v23 = vadd.f32 %v12559_v61, %v4918_v26 }
0x2499   :  { %v11246_v32 = vpop.eup %11245 }
0x249a   :  { %v4926_v7 = vadd.f32 1.0, %v11246_v32 }
0x249c   :  { %11247 = vrcp.f32 %v4926_v7 }
0x24a6   :  { %v11248_v57 = vpop.eup %11247 }
0x24a7   :  { %v4940_v53 = vmul.f32 %v11248_v57, %v4919_v23 }
0x24a9   :  { %4942 = vrot.lane.b32.xlu0 %v4940_v53, %s11456_s17 }
0x24ad   :  { %4957 = vperm.xlu0 %11090, %v4955_v44  }
0x24fd   :  { %v4931_v21 = vpop.permute.xlu1 %4930 }
0x24fe   :  { %v4933_v59 = vadd.f32 %v4931_v21, %v12654_v27 }
0x2500   :  { %v8864_v37 = vmul.f32 -1.442695, %v4933_v59 }
0x251b   :  { %v4943_v19 = vpop.permute.xlu0 %4942 }
0x251c   :  { %v4945_v62 = vadd.f32 %v4943_v19, %v12654_v27 }
0x251e   :  { %11249 = vtanh.f32 %v4945_v62 }
0x251f   :  { %11251 = vpow2.f32 %v8864_v37 }
0x2528   :  { %v11250_v28 = vpop.eup %11249 }
0x2529   :  { %4949 = vrot.lane.b32.xlu1 %v11250_v28, %s11458_s26  ;;  %v11252_v4 = vpop.eup %11251  ;;  %v12701_v28 = vadd.f32 %v12607_v41, %v12535_v30 }
0x252a   :  { %v4937_v20 = vadd.f32 1.0, %v11252_v4 }
0x252c   :  { %11253 = vrcp.f32 %v4937_v20  ;;  %v12667_v7 = vpop.permute.xlu0 %4957 }
0x252d   :  { %vm4959_vm8 = vcmp.eq.s32.totalorder %v12667_v7, 1 }
0x2536   :  { %v11254_v26 = vpop.eup %11253 }
0x2537   :  { %v4947_v11 = vsub.f32 1.0, %v11254_v26  ;;  %v4953_v23 = vmul.f32 %v11254_v26, %v12603_v18 }
0x259b   :  { %v4950_v32 = vpop.permute.xlu1 %4949 }
0x259c   :  { %v4952_v57 = vmul.f32 %v4950_v32, %v4947_v11 }
0x259e   :  { %v4954_v53 = vadd.f32 %v4953_v23, %v4952_v57 }
0x25a0   :  { %v12674_v44 = vsel %vm4959_vm8, %v4954_v53, %v12603_v18 }
0x25a1   :  { %4962 = vrot.lane.b32.xlu0 %v12674_v44, %s11458_s26 }
0x2613   :  { %v4963_v19 = vpop.permute.xlu0 %4962 }
0x2614   :  { %10041 = vmatmul.mubr.msk.f32.vlgmr.msra.gmra.mrb[78].mxu0 %vm86_vm1, %v4963_v19  ;;  %10052 = vmatmul.mubr.msk.f32.vlgmr.msra.gmra.mrb[62].mxu1 %vm86_vm1, %v4963_v19 }
0x2615   :  { %10842 = vmatpush3.bf16.msra.mxu0 %v12495_v60  ;;  %10062 = vmatprep.mubr.msk.f32.mxu0 %vm11453_vm0, %v13398_v8 }
0x2616   :  { %10843 = vmatprep.subr.bf16.mxu0 %v13396_v3  ;;  %10848 = vmatpush3.bf16.msra.mxu1 %v12441_v48 }
0x2617   :  { %10849 = vmatprep.subr.bf16.mxu1 %v13396_v3  ;;  %10073 = vmatprep.mubr.msk.f32.mxu1 %vm11453_vm0, %v13398_v8 }
0x2619   :  { %10845 = vmatpush3.bf16.msra.mxu0 %v12506_v9 }
0x261a   :  { %10852 = vmatprep.subr.bf16.mxu0 %v13396_v3  ;;  %10851 = vmatpush3.bf16.msra.mxu1 %v12461_v63 }
0x261b   :  { %10858 = vmatprep.subr.bf16.mxu1 %v13396_v3 }
0x261c   :  { %10063 = vmatmul.mubr.msk.f32.vlgmr.msra.gmra.mrb[80].mxu0 %vm86_vm1, %v4963_v19 }
0x261d   :  { %10854 = vmatpush3.bf16.msra.mxu0 %v12465_v6  ;;  %10084 = vmatprep.mubr.msk.f32.mxu0 %vm11453_vm0, %v13398_v8 }
0x261e   :  { %10855 = vmatprep.subr.bf16.mxu0 %v13396_v3 }
0x2621   :  { %10857 = vmatpush3.bf16.msra.mxu0 %v12478_v51 }
0x2622   :  { %10864 = vmatprep.subr.bf16.mxu0 %v13396_v3 }
0x26e7   :  { %v5032_v18 = vpop.f32.mrb[78].mxu0  ;;  %v5102_v62 = vpop.f32.mrb[62].mxu1 }
0x26e8   :  { %v5033_v21 = vadd.f32 %v12542_v55, %v5032_v18  ;;  %v5103_v59 = vadd.f32 %v12552_v40, %v5102_v62  ;;  %v10042_v37 = vpop.f32.mrb[79].mxu0  ;;  %v10053_v4 = vpop.f32.mrb[63].mxu1  ;;  %v5209_v18 = vsel %vm4415_vm9, 1, %v11455_v14 }
0x26ea   :  { %v5176_v20 = vadd.f32 %v5033_v21, %v12701_v28  ;;  %5184 = vrot.lane.b32.xlu0 %v5103_v59, %s11457_s18 }
0x26ec   :  { %v8868_v26 = vmul.f32 -1.442695, %v5176_v20 }
0x26ee   :  { %11255 = vpow2.f32 %v8868_v26 }
0x26ef   :  { %v5172_v11 = vpop.f32.mrb[80].mxu0 }
0x26f0   :  { %v10064_v32 = vpop.f32.mrb[81].mxu0  ;;  %v5173_v41 = vadd.f32 %v12559_v61, %v5172_v11 }
0x26f8   :  { %v11256_v23 = vpop.eup %11255 }
0x26f9   :  { %v5180_v57 = vadd.f32 1.0, %v11256_v23 }
0x26fb   :  { %11257 = vrcp.f32 %v5180_v57 }
0x2705   :  { %v11258_v53 = vpop.eup %11257 }
0x2706   :  { %v5194_v19 = vmul.f32 %v11258_v53, %v5173_v41 }
0x2708   :  { %5196 = vrot.lane.b32.xlu1 %v5194_v19, %s11456_s17 }
0x270c   :  { %5211 = vperm.xlu1 %11089, %v5209_v18  }
0x275c   :  { %v5185_v37 = vpop.permute.xlu0 %5184 }
0x275d   :  { %v5187_v4 = vadd.f32 %v5185_v37, %v12701_v28  ;;  %v12748_v37 = vadd.f32 %v12611_v5, %v12535_v30 }
0x275f   :  { %v8869_v20 = vmul.f32 -1.442695, %v5187_v4 }
0x277a   :  { %v5197_v62 = vpop.permute.xlu1 %5196 }
0x277b   :  { %v5199_v21 = vadd.f32 %v5197_v62, %v12701_v28 }
0x277d   :  { %11259 = vtanh.f32 %v5199_v21 }
0x277e   :  { %11261 = vpow2.f32 %v8869_v20 }
0x2787   :  { %v11260_v59 = vpop.eup %11259 }
0x2788   :  { %5203 = vrot.lane.b32.xlu0 %v11260_v59, %s11458_s26  ;;  %v11262_v26 = vpop.eup %11261 }
0x2789   :  { %v5191_v11 = vadd.f32 1.0, %v11262_v26 }
0x278b   :  { %11263 = vrcp.f32 %v5191_v11  ;;  %v12714_v41 = vpop.permute.xlu1 %5211 }
0x278c   :  { %vm5213_vm10 = vcmp.eq.s32.totalorder %v12714_v41, 1 }
0x2795   :  { %v11264_v32 = vpop.eup %11263 }
0x2796   :  { %v5201_v23 = vsub.f32 1.0, %v11264_v32  ;;  %v5207_v53 = vmul.f32 %v11264_v32, %v12674_v44 }
0x27fa   :  { %v5204_v57 = vpop.permute.xlu0 %5203 }
0x27fb   :  { %v5206_v19 = vmul.f32 %v5204_v57, %v5201_v23 }
0x27fd   :  { %v5208_v18 = vadd.f32 %v5207_v53, %v5206_v19 }
0x27ff   :  { %v12721_v62 = vsel %vm5213_vm10, %v5208_v18, %v12674_v44 }
0x2800   :  { %5216 = vrot.lane.b32.xlu1 %v12721_v62, %s11458_s26 }
0x2872   :  { %v5217_v21 = vpop.permute.xlu1 %5216 }
0x2873   :  { %10074 = vmatmul.mubr.msk.f32.vlgmr.msra.gmra.mrb[64].mxu1 %vm86_vm1, %v5217_v21  ;;  %10085 = vmatmul.mubr.msk.f32.vlgmr.msra.gmra.mrb[82].mxu0 %vm86_vm1, %v5217_v21 }
0x2874   :  { %10860 = vmatpush3.bf16.msra.mxu1 %v12495_v60  ;;  %10095 = vmatprep.mubr.msk.f32.mxu1 %vm11453_vm0, %v13398_v8 }
0x2875   :  { %10861 = vmatprep.subr.bf16.mxu1 %v13396_v3  ;;  %10866 = vmatpush3.bf16.msra.mxu0 %v12441_v48 }
0x2876   :  { %10867 = vmatprep.subr.bf16.mxu0 %v13396_v3  ;;  %10106 = vmatprep.mubr.msk.f32.mxu0 %vm11453_vm0, %v13398_v8 }
0x2878   :  { %10863 = vmatpush3.bf16.msra.mxu1 %v12506_v9 }
0x2879   :  { %10870 = vmatprep.subr.bf16.mxu1 %v13396_v3  ;;  %10869 = vmatpush3.bf16.msra.mxu0 %v12461_v63 }
0x287a   :  { %10876 = vmatprep.subr.bf16.mxu0 %v13396_v3 }
0x287b   :  { %10096 = vmatmul.mubr.msk.f32.vlgmr.msra.gmra.mrb[66].mxu1 %vm86_vm1, %v5217_v21 }
0x287c   :  { %10872 = vmatpush3.bf16.msra.mxu1 %v12465_v6  ;;  %10117 = vmatprep.mubr.msk.f32.mxu1 %vm11453_vm0, %v13398_v8 }
0x287d   :  { %10873 = vmatprep.subr.bf16.mxu1 %v13396_v3 }
0x2880   :  { %10875 = vmatpush3.bf16.msra.mxu1 %v12478_v51 }
0x2881   :  { %10882 = vmatprep.subr.bf16.mxu1 %v13396_v3 }
0x2946   :  { %v5286_v44 = vpop.f32.mrb[64].mxu1  ;;  %v5356_v59 = vpop.f32.mrb[82].mxu0 }
0x2947   :  { %v5287_v4 = vadd.f32 %v12542_v55, %v5286_v44  ;;  %v5357_v20 = vadd.f32 %v12552_v40, %v5356_v59  ;;  %v10075_v26 = vpop.f32.mrb[65].mxu1  ;;  %v10086_v11 = vpop.f32.mrb[83].mxu0  ;;  %v5463_v44 = vsel %vm4416_vm11, 1, %v11455_v14 }
0x2949   :  { %v5430_v32 = vadd.f32 %v5287_v4, %v12748_v37  ;;  %5438 = vrot.lane.b32.xlu1 %v5357_v20, %s11457_s18 }
0x294b   :  { %v8873_v23 = vmul.f32 -1.442695, %v5430_v32 }
0x294d   :  { %11265 = vpow2.f32 %v8873_v23 }
0x294e   :  { %v5426_v57 = vpop.f32.mrb[66].mxu1 }
0x294f   :  { %v10097_v53 = vpop.f32.mrb[67].mxu1  ;;  %v5427_v5 = vadd.f32 %v12559_v61, %v5426_v57 }
0x2957   :  { %v11266_v19 = vpop.eup %11265 }
0x2958   :  { %v5434_v18 = vadd.f32 1.0, %v11266_v19 }
0x295a   :  { %11267 = vrcp.f32 %v5434_v18 }
0x2964   :  { %v11268_v21 = vpop.eup %11267 }
0x2965   :  { %v5448_v38 = vmul.f32 %v11268_v21, %v5427_v5 }
0x2967   :  { %5450 = vrot.lane.b32.xlu0 %v5448_v38, %s11456_s17 }
0x296b   :  { %5465 = vperm.xlu0 %11090, %v5463_v44  }
0x29bb   :  { %v5439_v26 = vpop.permute.xlu1 %5438 }
0x29bc   :  { %v5441_v11 = vadd.f32 %v5439_v26, %v12748_v37  ;;  %v12795_v26 = vadd.f32 %v12615_v45, %v12535_v30 }
0x29be   :  { %v8874_v32 = vmul.f32 -1.442695, %v5441_v11 }
0x29d9   :  { %v5451_v59 = vpop.permute.xlu0 %5450 }
0x29da   :  { %v5453_v4 = vadd.f32 %v5451_v59, %v12748_v37 }
0x29dc   :  { %11269 = vtanh.f32 %v5453_v4 }
0x29dd   :  { %11271 = vpow2.f32 %v8874_v32 }
0x29e6   :  { %v11270_v20 = vpop.eup %11269 }
0x29e7   :  { %5457 = vrot.lane.b32.xlu1 %v11270_v20, %s11458_s26  ;;  %v11272_v23 = vpop.eup %11271 }
0x29e8   :  { %v5445_v57 = vadd.f32 1.0, %v11272_v23 }
0x29ea   :  { %11273 = vrcp.f32 %v5445_v57  ;;  %v12761_v18 = vpop.permute.xlu0 %5465 }
0x29eb   :  { %vm5467_vm12 = vcmp.eq.s32.totalorder %v12761_v18, 1 }
0x29f4   :  { %v11274_v53 = vpop.eup %11273 }
0x29f5   :  { %v5455_v38 = vsub.f32 1.0, %v11274_v53  ;;  %v5461_v5 = vmul.f32 %v11274_v53, %v12721_v62 }
0x2a59   :  { %v5458_v19 = vpop.permute.xlu1 %5457 }
0x2a5a   :  { %v5460_v21 = vmul.f32 %v5458_v19, %v5455_v38 }
0x2a5c   :  { %v5462_v44 = vadd.f32 %v5461_v5, %v5460_v21 }
0x2a5e   :  { %v12768_v59 = vsel %vm5467_vm12, %v5462_v44, %v12721_v62 }
0x2a5f   :  { %5470 = vrot.lane.b32.xlu0 %v12768_v59, %s11458_s26 }
0x2ad1   :  { %v5471_v4 = vpop.permute.xlu0 %5470 }
0x2ad2   :  { %10107 = vmatmul.mubr.msk.f32.vlgmr.msra.gmra.mrb[84].mxu0 %vm86_vm1, %v5471_v4  ;;  %10118 = vmatmul.mubr.msk.f32.vlgmr.msra.gmra.mrb[68].mxu1 %vm86_vm1, %v5471_v4 }
0x2ad3   :  { %10878 = vmatpush3.bf16.msra.mxu0 %v12495_v60  ;;  %10128 = vmatprep.mubr.msk.f32.mxu0 %vm11453_vm0, %v13398_v8 }
0x2ad4   :  { %10879 = vmatprep.subr.bf16.mxu0 %v13396_v3  ;;  %10884 = vmatpush3.bf16.msra.mxu1 %v12441_v48 }
0x2ad5   :  { %10885 = vmatprep.subr.bf16.mxu1 %v13396_v3  ;;  %10139 = vmatprep.mubr.msk.f32.mxu1 %vm11453_vm0, %v13398_v8 }
0x2ad7   :  { %10881 = vmatpush3.bf16.msra.mxu0 %v12506_v9 }
0x2ad8   :  { %10888 = vmatprep.subr.bf16.mxu0 %v13396_v3  ;;  %10887 = vmatpush3.bf16.msra.mxu1 %v12461_v63 }
0x2ad9   :  { %10894 = vmatprep.subr.bf16.mxu1 %v13396_v3 }
0x2ada   :  { %10129 = vmatmul.mubr.msk.f32.vlgmr.msra.gmra.mrb[86].mxu0 %vm86_vm1, %v5471_v4 }
0x2adb   :  { %10890 = vmatpush3.bf16.msra.mxu0 %v12465_v6  ;;  %10150 = vmatprep.mubr.msk.f32.mxu0 %vm11453_vm0, %v13398_v8 }
0x2adc   :  { %10891 = vmatprep.subr.bf16.mxu0 %v13396_v3 }
0x2adf   :  { %10893 = vmatpush3.bf16.msra.mxu0 %v12478_v51 }
0x2ae0   :  { %10900 = vmatprep.subr.bf16.mxu0 %v13396_v3 }
0x2ba5   :  { %v5540_v62 = vpop.f32.mrb[84].mxu0  ;;  %v5610_v20 = vpop.f32.mrb[68].mxu1 }
0x2ba6   :  { %v5541_v11 = vadd.f32 %v12542_v55, %v5540_v62  ;;  %v5611_v32 = vadd.f32 %v12552_v40, %v5610_v20  ;;  %v10108_v23 = vpop.f32.mrb[85].mxu0  ;;  %v10119_v57 = vpop.f32.mrb[69].mxu1  ;;  %v5717_v62 = vsel %vm4417_vm13, 1, %v11455_v14 }
0x2ba8   :  { %v5684_v53 = vadd.f32 %v5541_v11, %v12795_v26  ;;  %5692 = vrot.lane.b32.xlu0 %v5611_v32, %s11457_s18 }
0x2baa   :  { %v8878_v38 = vmul.f32 -1.442695, %v5684_v53 }
0x2bac   :  { %11275 = vpow2.f32 %v8878_v38 }
0x2bad   :  { %v5680_v19 = vpop.f32.mrb[86].mxu0 }
0x2bae   :  { %v10130_v5 = vpop.f32.mrb[87].mxu0  ;;  %v5681_v45 = vadd.f32 %v12559_v61, %v5680_v19 }
0x2bb6   :  { %v11276_v21 = vpop.eup %11275 }
0x2bb7   :  { %v5688_v44 = vadd.f32 1.0, %v11276_v21 }
0x2bb9   :  { %11277 = vrcp.f32 %v5688_v44 }
0x2bc3   :  { %v11278_v4 = vpop.eup %11277 }
0x2bc4   :  { %v5702_v42 = vmul.f32 %v11278_v4, %v5681_v45 }
0x2bc6   :  { %5704 = vrot.lane.b32.xlu1 %v5702_v42, %s11456_s17 }
0x2bca   :  { %5719 = vperm.xlu1 %11089, %v5717_v62  }
0x2c1a   :  { %v5693_v23 = vpop.permute.xlu0 %5692 }
0x2c1b   :  { %v5695_v57 = vadd.f32 %v5693_v23, %v12795_v26  ;;  %v12842_v23 = vadd.f32 %v12619_v16, %v12535_v30 }
0x2c1d   :  { %v8879_v53 = vmul.f32 -1.442695, %v5695_v57 }
0x2c38   :  { %v5705_v20 = vpop.permute.xlu1 %5704 }
0x2c39   :  { %v5707_v11 = vadd.f32 %v5705_v20, %v12795_v26 }
0x2c3b   :  { %11279 = vtanh.f32 %v5707_v11 }
0x2c3c   :  { %11281 = vpow2.f32 %v8879_v53 }
0x2c45   :  { %v11280_v32 = vpop.eup %11279 }
0x2c46   :  { %5711 = vrot.lane.b32.xlu0 %v11280_v32, %s11458_s26  ;;  %v11282_v38 = vpop.eup %11281 }
0x2c47   :  { %v5699_v19 = vadd.f32 1.0, %v11282_v38 }
0x2c49   :  { %11283 = vrcp.f32 %v5699_v19  ;;  %v12808_v44 = vpop.permute.xlu1 %5719 }
0x2c4a   :  { %vm5721_vm14 = vcmp.eq.s32.totalorder %v12808_v44, 1 }
0x2c53   :  { %v11284_v5 = vpop.eup %11283 }
0x2c54   :  { %v5709_v42 = vsub.f32 1.0, %v11284_v5  ;;  %v5715_v45 = vmul.f32 %v11284_v5, %v12768_v59 }
0x2cb8   :  { %v5712_v21 = vpop.permute.xlu0 %5711 }
0x2cb9   :  { %v5714_v4 = vmul.f32 %v5712_v21, %v5709_v42 }
0x2cbb   :  { %v5716_v62 = vadd.f32 %v5715_v45, %v5714_v4 }
0x2cbd   :  { %v12815_v20 = vsel %vm5721_vm14, %v5716_v62, %v12768_v59 }
0x2cbe   :  { %5724 = vrot.lane.b32.xlu1 %v12815_v20, %s11458_s26 }
0x2d30   :  { %v5725_v11 = vpop.permute.xlu1 %5724 }
0x2d31   :  { %10140 = vmatmul.mubr.msk.f32.vlgmr.msra.gmra.mrb[70].mxu1 %vm86_vm1, %v5725_v11  ;;  %10151 = vmatmul.mubr.msk.f32.vlgmr.msra.gmra.mrb[88].mxu0 %vm86_vm1, %v5725_v11 }
0x2d32   :  { %10896 = vmatpush3.bf16.msra.mxu1 %v12495_v60  ;;  %10161 = vmatprep.mubr.msk.f32.mxu1 %vm11453_vm0, %v13398_v8 }
0x2d33   :  { %10897 = vmatprep.subr.bf16.mxu1 %v13396_v3  ;;  %10902 = vmatpush3.bf16.msra.mxu0 %v12441_v48 }
0x2d34   :  { %10903 = vmatprep.subr.bf16.mxu0 %v13396_v3  ;;  %10172 = vmatprep.mubr.msk.f32.mxu0 %vm11453_vm0, %v13398_v8 }
0x2d36   :  { %10899 = vmatpush3.bf16.msra.mxu1 %v12506_v9 }
0x2d37   :  { %10906 = vmatprep.subr.bf16.mxu1 %v13396_v3  ;;  %10905 = vmatpush3.bf16.msra.mxu0 %v12461_v63 }
0x2d38   :  { %10912 = vmatprep.subr.bf16.mxu0 %v13396_v3 }
0x2d39   :  { %10162 = vmatmul.mubr.msk.f32.vlgmr.msra.gmra.mrb[72].mxu1 %vm86_vm1, %v5725_v11 }
0x2d3a   :  { %10908 = vmatpush3.bf16.msra.mxu1 %v12465_v6  ;;  %10183 = vmatprep.mubr.msk.f32.mxu1 %vm11453_vm0, %v13398_v8 }
0x2d3b   :  { %10909 = vmatprep.subr.bf16.mxu1 %v13396_v3 }
0x2d3e   :  { %10911 = vmatpush3.bf16.msra.mxu1 %v12478_v51 }
0x2d3f   :  { %10918 = vmatprep.subr.bf16.mxu1 %v13396_v3 }
0x2e04   :  { %v5794_v59 = vpop.f32.mrb[70].mxu1  ;;  %v5864_v32 = vpop.f32.mrb[88].mxu0 }
0x2e05   :  { %v5795_v57 = vadd.f32 %v12542_v55, %v5794_v59  ;;  %v5865_v53 = vadd.f32 %v12552_v40, %v5864_v32  ;;  %v10141_v38 = vpop.f32.mrb[71].mxu1  ;;  %v10152_v19 = vpop.f32.mrb[89].mxu0  ;;  %v5971_v59 = vsel %vm4418_vm15, 1, %v11455_v14 }
0x2e07   :  { %v5938_v5 = vadd.f32 %v5795_v57, %v12842_v23  ;;  %5946 = vrot.lane.b32.xlu1 %v5865_v53, %s11457_s18 }
0x2e09   :  { %v8883_v42 = vmul.f32 -1.442695, %v5938_v5 }
0x2e0b   :  { %11285 = vpow2.f32 %v8883_v42 }
0x2e0c   :  { %v5934_v21 = vpop.f32.mrb[72].mxu1 }
0x2e0d   :  { %v10163_v45 = vpop.f32.mrb[73].mxu1  ;;  %v5935_v16 = vadd.f32 %v12559_v61, %v5934_v21 }
0x2e15   :  { %v11286_v4 = vpop.eup %11285 }
0x2e16   :  { %v5942_v62 = vadd.f32 1.0, %v11286_v4 }
0x2e18   :  { %11287 = vrcp.f32 %v5942_v62 }
0x2e22   :  { %v11288_v11 = vpop.eup %11287 }
0x2e23   :  { %v5956_v3 = vmul.f32 %v11288_v11, %v5935_v16 }
0x2e25   :  { %5958 = vrot.lane.b32.xlu0 %v5956_v3, %s11456_s17 }
0x2e29   :  { %5973 = vperm.xlu0 %11090, %v5971_v59  }
0x2e79   :  { %v5947_v38 = vpop.permute.xlu1 %5946 }
0x2e7a   :  { %v5949_v19 = vadd.f32 %v5947_v38, %v12842_v23 }
0x2e7c   :  { %v8884_v5 = vmul.f32 -1.442695, %v5949_v19 }
0x2e97   :  { %v5959_v32 = vpop.permute.xlu0 %5958 }
0x2e98   :  { %v5961_v57 = vadd.f32 %v5959_v32, %v12842_v23 }
0x2e9a   :  { %11289 = vtanh.f32 %v5961_v57 }
0x2e9b   :  { %11291 = vpow2.f32 %v8884_v5 }
0x2ea4   :  { %v11290_v53 = vpop.eup %11289 }
0x2ea5   :  { %5965 = vrot.lane.b32.xlu1 %v11290_v53, %s11458_s26  ;;  %v11292_v42 = vpop.eup %11291  ;;  %v13404_v53 = vmov 0.0|0.0  }
0x2ea6   :  { %v5953_v21 = vadd.f32 1.0, %v11292_v42 }
0x2ea8   :  { %11293 = vrcp.f32 %v5953_v21  ;;  %v12855_v62 = vpop.permute.xlu0 %5973 }
0x2ea9   :  { %vm5975_vm2 = vcmp.eq.s32.totalorder %v12855_v62, 1 }
0x2eb2   :  { %v11294_v45 = vpop.eup %11293 }
0x2eb3   :  { %v5963_v3 = vsub.f32 1.0, %v11294_v45  ;;  %v5969_v16 = vmul.f32 %v11294_v45, %v12815_v20 }
0x2f17   :  { %v5966_v4 = vpop.permute.xlu1 %5965 }
0x2f18   :  { %v5968_v11 = vmul.f32 %v5966_v4, %v5963_v3 }
0x2f1a   :  { %v5970_v59 = vadd.f32 %v5969_v16, %v5968_v11 }
0x2f1c   :  { %v12862_v32 = vsel %vm5975_vm2, %v5970_v59, %v12815_v20 }
0x2f1d   :  { %5978 = vrot.lane.b32.xlu0 %v12862_v32, %s11458_s26 }
0x2f8f   :  { %v5979_v57 = vpop.permute.xlu0 %5978 }
0x2f90   :  { %10173 = vmatmul.mubr.msk.f32.vlgmr.msra.gmra.mrb[90].mxu0 %vm86_vm1, %v5979_v57  ;;  %10184 = vmatmul.mubr.msk.f32.vlgmr.msra.gmra.mrb[74].mxu1 %vm86_vm1, %v5979_v57 }
0x2f91   :  { %10914 = vmatpush3.bf16.msra.mxu0 %v12495_v60  ;;  %10194 = vmatprep.mubr.msk.f32.mxu0 %vm11453_vm0, %v13398_v8 }
0x2f92   :  { %10915 = vmatprep.subr.bf16.mxu0 %v13404_v53  ;;  %10920 = vmatpush3.bf16.msra.mxu1 %v12441_v48 }
0x2f93   :  { %10921 = vmatprep.subr.bf16.mxu1 %v13404_v53  ;;  %10205 = vmatprep.mubr.msk.f32.mxu1 %vm11453_vm0, %v13398_v8 }
0x2f95   :  { %10917 = vmatpush3.bf16.msra.mxu0 %v12506_v9 }
0x2f96   :  { %10924 = vmatprep.subr.bf16.mxu0 %v13404_v53  ;;  %10923 = vmatpush3.bf16.msra.mxu1 %v12461_v63  ;;  %v12889_v63 = vadd.f32 %v12623_v2, %v12535_v30 }
0x2f97   :  { %10930 = vmatprep.subr.bf16.mxu1 %v13404_v53 }
0x2f98   :  { %10195 = vmatmul.mubr.msk.f32.vlgmr.msra.gmra.mrb[92].mxu0 %vm86_vm1, %v5979_v57 }
0x2f99   :  { %10926 = vmatpush3.bf16.msra.mxu0 %v12465_v6  ;;  %10216 = vmatprep.mubr.msk.f32.mxu0 %vm11453_vm0, %v13398_v8 }
0x2f9a   :  { %10927 = vmatprep.subr.bf16.mxu0 %v13404_v53 }
0x2f9d   :  { %10929 = vmatpush3.bf16.msra.mxu0 %v12478_v51 }
0x2f9e   :  { %10936 = vmatprep.subr.bf16.mxu0 %v13404_v53 }
0x3063   :  { %v6048_v48 = vpop.f32.mrb[90].mxu0  ;;  %v6118_v20 = vpop.f32.mrb[74].mxu1 }
0x3064   :  { %v6049_v38 = vadd.f32 %v12542_v55, %v6048_v48  ;;  %v6119_v19 = vadd.f32 %v12552_v40, %v6118_v20  ;;  %v10174_v6 = vpop.f32.mrb[91].mxu0  ;;  %v10185_v5 = vpop.f32.mrb[75].mxu1  ;;  %v6225_v55 = vsel %vm4419_vm5, 1, %v11455_v14 }
0x3066   :  { %v6192_v42 = vadd.f32 %v6049_v38, %v12889_v63  ;;  %6200 = vrot.lane.b32.xlu0 %v6119_v19, %s11457_s18 }
0x3068   :  { %v8888_v21 = vmul.f32 -1.442695, %v6192_v42 }
0x306a   :  { %11295 = vpow2.f32 %v8888_v21 }
0x306b   :  { %v6188_v51 = vpop.f32.mrb[92].mxu0 }
0x306c   :  { %v10196_v45 = vpop.f32.mrb[93].mxu0  ;;  %v6189_v2 = vadd.f32 %v12559_v61, %v6188_v51 }
0x3074   :  { %v11296_v3 = vpop.eup %11295 }
0x3075   :  { %v6196_v4 = vadd.f32 1.0, %v11296_v3 }
0x3077   :  { %11297 = vrcp.f32 %v6196_v4  ;;  %v8895_v4 = vld [vmem:[%s13389_s10 + $0x60] sm:$0xff] }
0x3081   :  { %v11298_v16 = vpop.eup %11297 }
0x3082   :  { %v6210_v11 = vmul.f32 %v11298_v16, %v6189_v2  ;;  %v8896_v2 = vld [vmem:[%s13389_s10 + $0x68] sm:$0xff] }
0x3083   :  { %v12919_v16 = vpack.c.bf16 %v8896_v2, %v8895_v4  ;;  %v11419_v4 = vld [vmem:[%s13391_s12] ss:$0 sm:$0xff] }
0x3084   :  { %6212 = vrot.lane.b32.xlu1 %v6210_v11, %s11456_s17  ;;  %v8897_v11 = vld [vmem:[%s13389_s10 + $0x70] sm:$0xff] }
0x3088   :  { %6227 = vperm.xlu1 %11089, %v6225_v55  }
0x30d8   :  { %v6201_v48 = vpop.permute.xlu0 %6200 }
0x30d9   :  { %v6203_v20 = vadd.f32 %v6201_v48, %v12889_v63  ;;  %v8904_v48 = vld [vmem:[%s13389_s10 + $0xa8] sm:$0xff] }
0x30db   :  { %v8889_v61 = vmul.f32 -1.442695, %v6203_v20 }
0x30f6   :  { %v6213_v40 = vpop.permute.xlu1 %6212 }
0x30f7   :  { %v6215_v59 = vadd.f32 %v6213_v40, %v12889_v63 }
0x30f9   :  { %11299 = vtanh.f32 %v6215_v59  ;;  %v8899_v59 = vld [vmem:[%s13389_s10 + $0x80] sm:$0xff] }
0x30fa   :  { %11301 = vpow2.f32 %v8889_v61 }
0x3103   :  { %v11300_v57 = vpop.eup %11299 }
0x3104   :  { %6219 = vrot.lane.b32.xlu0 %v11300_v57, %s11458_s26  ;;  %v11302_v38 = vpop.eup %11301  ;;  %v8900_v57 = vld [vmem:[%s13389_s10 + $0x88] sm:$0xff] }
0x3105   :  { %v6207_v19 = vadd.f32 1.0, %v11302_v38  ;;  %v12953_v20 = vpack.c.bf16 %v8900_v57, %v8899_v59  ;;  %v8901_v38 = vld [vmem:[%s13389_s10 + $0x90] sm:$0xff]  ;;  %v13016_v57 = vld [vmem:[%s13391_s12 + $0x3] ss:$0 sm:$0xff] }
0x3107   :  { %11303 = vrcp.f32 %v6207_v19  ;;  %v12902_v42 = vpop.permute.xlu1 %6227  ;;  %v8902_v19 = vld [vmem:[%s13389_s10 + $0x98] sm:$0xff] }
0x3108   :  { %vm6229_vm7 = vcmp.eq.s32.totalorder %v12902_v42, 1 }
0x3111   :  { %v11304_v35 = vpop.eup %11303 }
0x3112   :  { %v6217_v6 = vsub.f32 1.0, %v11304_v35  ;;  %v6223_v21 = vmul.f32 %v11304_v35, %v12862_v32  ;;  %v8906_v35 = vld [vmem:[%s13389_s10 + $0xb8] sm:$0xff] }
0x3176   :  { %v6220_v5 = vpop.permute.xlu0 %6219 }
0x3177   :  { %v6222_v51 = vmul.f32 %v6220_v5, %v6217_v6  ;;  %v12975_v6 = vpack.c.bf16 %v8902_v19, %v8901_v38  ;;  %v13023_v19 = vld [vmem:[%s13391_s12 + $0x5] ss:$0 sm:$0xff] }
0x3179   :  { %v6224_v45 = vadd.f32 %v6223_v21, %v6222_v51 }
0x317b   :  { %v12909_v3 = vsel %vm6229_vm7, %v6224_v45, %v12862_v32  ;;  %v8898_v32 = vld [vmem:[%s13389_s10 + $0x78] sm:$0xff]  ;;  %v13007_v45 = vadd.f32 %v12627_v12, %v12535_v30 }
0x317c   :  { %6232 = vrot.lane.b32.xlu1 %v12909_v3, %s11458_s26  ;;  %v12931_v40 = vpack.c.bf16 %v8898_v32, %v8897_v11 }
0x31ee   :  { %v6233_v55 = vpop.permute.xlu1 %6232 }
0x31ef   :  { %10206 = vmatmul.mubr.msk.f32.vlgmr.msra.gmra.mrb[76].mxu1 %vm86_vm1, %v6233_v55  ;;  %10217 = vmatmul.mubr.msk.f32.vlgmr.msra.gmra.mrb[94].mxu0 %vm86_vm1, %v6233_v55 }
0x31f0   :  { %10932 = vmatpush3.bf16.msra.mxu1 %v12495_v60  ;;  %10938 = vmatpush3.bf16.msra.mxu0 %v12919_v16  ;;  %v8903_v60 = vld [vmem:[%s13389_s10 + $0xa0] sm:$0xff] }
0x31f1   :  { %10933 = vmatprep.subr.bf16.mxu1 %v13404_v53  ;;  %10939 = vmatprep.subr.bf16.mxu0 %v13404_v53  ;;  %v12955_v61 = vpack.c.bf16 %v8904_v48, %v8903_v60 }
0x31f2   :  { %10227 = vmatprep.mubr.msk.f32.mxu1 %vm11453_vm0, %v13398_v8  ;;  %10238 = vmatprep.mubr.msk.f32.mxu0 %vm11453_vm0, %v13398_v8 }
0x31f4   :  { %10935 = vmatpush3.bf16.msra.mxu1 %v12506_v9  ;;  %10941 = vmatpush3.bf16.msra.mxu0 %v12931_v40  ;;  %v8905_v9 = vld [vmem:[%s13389_s10 + $0xb0] sm:$0xff]  ;;  %s11459_s10 = smov [#allocation3]  }
0x31f5   :  { %10942 = vmatprep.subr.bf16.mxu1 %v13404_v53  ;;  %10948 = vmatprep.subr.bf16.mxu0 %v13404_v53  ;;  %v12977_v5 = vpack.c.bf16 %v8906_v35, %v8905_v9  ;;  %s8722_s15 = sshll.u32 %s11459_s10, 4  ;;  %s8723_s15 = int_to_ptr.vmem [resolvable:$true] %s8722_s15 }
0x31f6   :  { %s11432_s16 = scalar_lea.vmem %s8723_s15, 32  ;;  %p11433_p1 = scmp.lt.s32.totalorder %s8723_s15, %s8723_s15 }
0x31f7   :  { %10228 = vmatmul.mubr.msk.f32.vlgmr.msra.gmra.mrb[78].mxu1 %vm86_vm1, %v6233_v55  ;;  %10239 = vmatmul.mubr.f32.vlgmr.msra.gmra.mrb[96].mxu0 %v13398_v8 }
0x31f8   :  { %10944 = vmatpush3.bf16.msra.mxu1 %v12953_v20  ;;  %10950 = vmatpush3.bf16.msra.mxu0 %v12955_v61 }
0x31f9   :  { %10945 = vmatprep.subr.bf16.mxu1 %v13404_v53  ;;  %10951 = vmatprep.subr.bf16.mxu0 %v13404_v53 }
0x31fa   :  { %10249 = vmatprep.mubr.msk.f32.mxu1 %vm11453_vm0, %v13398_v8  ;;  %10260 = vmatprep.mubr.msk.f32.mxu0 %vm11453_vm0, %v13398_v8 }
0x31fc   :  { %10947 = vmatpush3.bf16.msra.mxu1 %v12975_v6  ;;  %10953 = vmatpush3.bf16.msra.mxu0 %v12977_v5 }
0x31fd   :  { %10954 = vmatprep.subr.bf16.mxu1 %v13404_v53  ;;  %10960 = vmatprep.subr.bf16.mxu0 %v13404_v53 }
0x31ff   :  { %10250 = vmatmul.mubr.f32.vlgmr.msra.gmra.mrb[80].mxu1 %v13398_v8  ;;  %10261 = vmatmul.mubr.f32.vlgmr.msra.gmra.mrb[98].mxu0 %v13398_v8 }
0x3200   :  { %10956 = vmatpush3.bf16.msra.mxu1 %v12919_v16  ;;  %10962 = vmatpush3.bf16.msra.mxu0 %v12953_v20 }
0x3201   :  { %10957 = vmatprep.subr.bf16.mxu1 %v13404_v53  ;;  %10963 = vmatprep.subr.bf16.mxu0 %v13404_v53 }
0x3202   :  { %10271 = vmatprep.mubr.msk.f32.mxu1 %vm11453_vm0, %v13398_v8  ;;  %10282 = vmatprep.mubr.msk.f32.mxu0 %vm11453_vm0, %v13398_v8 }
0x3204   :  { %10959 = vmatpush3.bf16.msra.mxu1 %v12931_v40  ;;  %10965 = vmatpush3.bf16.msra.mxu0 %v12975_v6 }
0x3205   :  { %10966 = vmatprep.subr.bf16.mxu1 %v13404_v53  ;;  %10972 = vmatprep.subr.bf16.mxu0 %v13404_v53 }
0x32c2   :  { %v6302_v21 = vpop.f32.mrb[76].mxu1  ;;  %v13003_v51 = vpop.f32.mrb[94].mxu0 }
0x32c3   :  { %v6303_v2 = vadd.f32 %v11419_v4, %v6302_v21  ;;  %v10207_v11 = vpop.f32.mrb[77].mxu1  ;;  %v10218_v32 = vpop.f32.mrb[95].mxu0 }
0x32c5   :  { %v6446_v55 = vadd.f32 %v6303_v2, %v13007_v45  ;;  %v11420_v2 = vld [vmem:[%s13382_s3] sm:$0xff] }
0x32c6   :  { %vm4420_vm9 = vcmp.gt.s32.totalorder %v11420_v2, 7 }
0x32c7   :  { %v8893_v59 = vmul.f32 -1.442695, %v6446_v55 }
0x32c9   :  { %11305 = vpow2.f32 %v8893_v59  ;;  %v6479_v59 = vsel %vm4420_vm9, 1, %v11455_v14 }
0x32ca   :  { %v6442_v60 = vpop.f32.mrb[78].mxu1  ;;  %v6578_v48 = vpop.f32.mrb[96].mxu0 }
0x32cb   :  { %v6579_v30 = vadd.f32 %v13016_v57, %v6578_v48  ;;  %v10229_v12 = vpop.f32.mrb[79].mxu1  ;;  %v10240_v38 = vpop.f32.mrb[97].mxu0  ;;  %v11421_v48 = vld [vmem:[%s13391_s12 + $0x2] ss:$0 sm:$0xff] }
0x32cd   :  { %6735 = vrot.lane.b32.xlu0 %v6579_v30, %s11458_s26  ;;  %v6443_v30 = vadd.f32 %v11421_v48, %v6442_v60  ;;  %v11422_v60 = vld [vmem:[%s13390_s11] sm:$0x3] }
0x32d2   :  { %v6654_v9 = vpop.f32.mrb[80].mxu1  ;;  %v6730_v35 = vpop.f32.mrb[98].mxu0 }
0x32d3   :  { %v11306_v21 = vpop.eup %11305  ;;  %v6731_v4 = vadd.f32 %v13023_v19, %v6730_v35  ;;  %v10262_v11 = vpop.f32.mrb[99].mxu0 }
0x32d4   :  { %v10251_v32 = vpop.f32.mrb[81].mxu1  ;;  %v6450_v55 = vadd.f32 1.0, %v11306_v21 }
0x32d5   :  { %6753 = vrot.lane.b32.xlu1 %v6731_v4, %s11458_s26 }
0x32d6   :  { %11307 = vrcp.f32 %v6450_v55 }
0x32d9   :  { %6481 = vperm.xlu1 %11089, %v6479_v59   ;;  %v13405_v59 = vsub.s32 1, %v11659_v39 }
0x32db   :  { %v13043_v48 = vrot.slane %v11422_v60, %v13405_v59 }
0x32e0   :  { %v11308_v12 = vpop.eup %11307 }
0x32e1   :  { %v13034_v38 = vmul.f32 %v11308_v12, %v6443_v30  ;;  %v4411_v30 = vadd.f32 %v12629_v17, %v13043_v48 }
0x333f   :  { %v6736_v35 = vpop.permute.xlu0 %6735 }
0x3340   :  { %v6738_v2 = vadd.f32 %v6736_v35, %v13007_v45 }
0x3342   :  { %v8913_v11 = vmul.f32 -1.442695, %v6738_v2 }
0x3344   :  { %11309 = vpow2.f32 %v8913_v11  ;;  %v13051_v11 = vld [vmem:[%s13391_s12 + $0x4] ss:$0 sm:$0xff] }
0x3347   :  { %v6754_v55 = vpop.permute.xlu1 %6753 }
0x334e   :  { %v11310_v21 = vpop.eup %11309 }
0x334f   :  { %v6742_v32 = vadd.f32 1.0, %v11310_v21  ;;  %v6655_v21 = vadd.f32 %v13051_v11, %v6654_v9  ;;  %v13406_v9 = vmov 0.0  }
0x3351   :  { %11311 = vrcp.f32 %v6742_v32  ;;  %v6745_v32 = vadd.f32 %v6655_v21, %v4411_v30 }
0x3353   :  { %v8914_v39 = vmul.f32 -1.442695, %v6745_v32 }
0x3358   :  { %v13054_v59 = vpop.permute.xlu1 %6481 }
0x3359   :  { %vm6483_vm11 = vcmp.eq.s32.totalorder %v13054_v59, 1 }
0x335b   :  { %v11312_v4 = vpop.eup %11311 }
0x335c   :  { %v6756_v14 = vmul.f32 %v11312_v4, %v6754_v55 }
0x335e   :  { %6758 = vrot.lane.b32.xlu0 %v6756_v14, %s11456_s17 }
0x33d0   :  { %v6759_v12 = vpop.permute.xlu0 %6758 }
0x33d1   :  { %v6761_v35 = vadd.f32 %v6759_v12, %v4411_v30 }
0x33d3   :  { %11313 = vtanh.f32 %v6761_v35 }
0x33d4   :  { %11315 = vpow2.f32 %v8914_v39 }
0x33dd   :  { %v11314_v2 = vpop.eup %11313 }
0x33de   :  { %6765 = vrot.lane.b32.xlu0 %v11314_v2, %s11458_s26  ;;  %v11316_v4 = vpop.eup %11315 }
0x33df   :  { %v6749_v55 = vadd.f32 1.0, %v11316_v4 }
0x33e1   :  { %11317 = vrcp.f32 %v6749_v55 }
0x33eb   :  { %v11318_v17 = vpop.eup %11317 }
0x33ec   :  { %v6763_v14 = vsub.f32 1.0, %v11318_v17  ;;  %v6769_v35 = vmul.f32 0.0, %v11318_v17 }
0x3450   :  { %v6766_v60 = vpop.permute.xlu0 %6765 }
0x3451   :  { %v6768_v12 = vmul.f32 %v6766_v60, %v6763_v14 }
0x3453   :  { %v6770_v2 = vadd.f32 %v6769_v35, %v6768_v12 }
0x3455   :  { %v6771_v8 = vsel %vm6483_vm11, %v6770_v2, 0.0 }
0x3456   :  { %10272 = vmatmul.mubr.msk.f32.vlgmr.msra.gmra.mrb[82].mxu1 %vm86_vm1, %v6771_v8  ;;  %10283 = vmatmul.mubr.msk.f32.vlgmr.msra.gmra.mrb[100].mxu0 %vm86_vm1, %v6771_v8 }
0x3457   :  { %10968 = vmatpush3.bf16.msra.mxu1 %v12955_v61  ;;  %10293 = vmatprep.mubr.msk.f32.mxu1 %vm11453_vm0, %v13406_v9 }
0x3458   :  { %10969 = vmatprep.subr.bf16.mxu1 %v13404_v53  ;;  %10974 = vmatpush3.bf16.msra.mxu0 %v12919_v16 }
0x3459   :  { %10975 = vmatprep.subr.bf16.mxu0 %v13404_v53  ;;  %10304 = vmatprep.mubr.msk.f32.mxu0 %vm11453_vm0, %v13406_v9 }
0x345b   :  { %10971 = vmatpush3.bf16.msra.mxu1 %v12977_v5 }
0x345c   :  { %10978 = vmatprep.subr.bf16.mxu1 %v13404_v53  ;;  %10977 = vmatpush3.bf16.msra.mxu0 %v12931_v40 }
0x345d   :  { %10984 = vmatprep.subr.bf16.mxu0 %v13404_v53 }
0x345e   :  { %10294 = vmatmul.mubr.msk.f32.vlgmr.msra.gmra.mrb[84].mxu1 %vm86_vm1, %v6771_v8 }
0x345f   :  { %10980 = vmatpush3.bf16.msra.mxu1 %v12953_v20  ;;  %10315 = vmatprep.mubr.msk.f32.mxu1 %vm11453_vm0, %v13406_v9 }
0x3460   :  { %10981 = vmatprep.subr.bf16.mxu1 %v13404_v53 }
0x3463   :  { %10983 = vmatpush3.bf16.msra.mxu1 %v12975_v6 }
0x3464   :  { %10990 = vmatprep.subr.bf16.mxu1 %v13404_v53 }
0x3529   :  { %v6841_v30 = vpop.f32.mrb[82].mxu1  ;;  %v6911_v21 = vpop.f32.mrb[100].mxu0 }
0x352a   :  { %v6842_v32 = vadd.f32 %v13016_v57, %v6841_v30  ;;  %v10273_v39 = vpop.f32.mrb[83].mxu1  ;;  %v10284_v4 = vpop.f32.mrb[101].mxu0 }
0x352c   :  { %6986 = vrot.lane.b32.xlu1 %v6842_v32, %s11458_s26  ;;  %v4407_v32 = vadd.f32 %v12625_v54, %v13043_v48 }
0x3531   :  { %v6981_v55 = vpop.f32.mrb[84].mxu1 }
0x3532   :  { %v6982_v17 = vadd.f32 %v13023_v19, %v6981_v55  ;;  %v10295_v14 = vpop.f32.mrb[85].mxu1 }
0x3534   :  { %7004 = vrot.lane.b32.xlu0 %v6982_v17, %s11458_s26 }
0x359e   :  { %v6987_v60 = vpop.permute.xlu1 %6986 }
0x359f   :  { %v6989_v12 = vadd.f32 %v6987_v60, %v12889_v63  ;;  %v6912_v63 = vadd.f32 %v13051_v11, %v6911_v21 }
0x35a1   :  { %v8918_v35 = vmul.f32 -1.442695, %v6989_v12  ;;  %v6996_v14 = vadd.f32 %v6912_v63, %v4407_v32 }
0x35a3   :  { %11319 = vpow2.f32 %v8918_v35  ;;  %v8919_v60 = vmul.f32 -1.442695, %v6996_v14 }
0x35a6   :  { %v7005_v30 = vpop.permute.xlu0 %7004 }
0x35ad   :  { %v11320_v2 = vpop.eup %11319 }
0x35ae   :  { %v6993_v24 = vadd.f32 1.0, %v11320_v2 }
0x35b0   :  { %11321 = vrcp.f32 %v6993_v24 }
0x35ba   :  { %v11322_v29 = vpop.eup %11321 }
0x35bb   :  { %v7007_v39 = vmul.f32 %v11322_v29, %v7005_v30 }
0x35bd   :  { %7009 = vrot.lane.b32.xlu1 %v7007_v39, %s11456_s17 }
0x362f   :  { %v7010_v4 = vpop.permute.xlu1 %7009 }
0x3630   :  { %v7012_v55 = vadd.f32 %v7010_v4, %v4407_v32 }
0x3632   :  { %11323 = vtanh.f32 %v7012_v55 }
0x3633   :  { %11325 = vpow2.f32 %v8919_v60 }
0x363c   :  { %v11324_v17 = vpop.eup %11323 }
0x363d   :  { %7016 = vrot.lane.b32.xlu0 %v11324_v17, %s11458_s26  ;;  %v11326_v24 = vpop.eup %11325 }
0x363e   :  { %v7000_v12 = vadd.f32 1.0, %v11326_v24 }
0x3640   :  { %11327 = vrcp.f32 %v7000_v12 }
0x364a   :  { %v11328_v29 = vpop.eup %11327 }
0x364b   :  { %v7014_v35 = vsub.f32 1.0, %v11328_v29  ;;  %v7020_v30 = vmul.f32 %v11328_v29, %v6771_v8 }
0x36af   :  { %v7017_v2 = vpop.permute.xlu0 %7016 }
0x36b0   :  { %v7019_v39 = vmul.f32 %v7017_v2, %v7014_v35 }
0x36b2   :  { %v7021_v54 = vadd.f32 %v7020_v30, %v7019_v39 }
0x36b4   :  { %v7022_v4 = vsel %vm6229_vm7, %v7021_v54, %v6771_v8  ;;  %v4401_v54 = vadd.f32 %v12621_v43, %v13043_v48 }
0x36b5   :  { %10305 = vmatmul.mubr.msk.f32.vlgmr.msra.gmra.mrb[102].mxu0 %vm86_vm1, %v7022_v4  ;;  %10316 = vmatmul.mubr.msk.f32.vlgmr.msra.gmra.mrb[86].mxu1 %vm86_vm1, %v7022_v4 }
0x36b6   :  { %10986 = vmatpush3.bf16.msra.mxu0 %v12955_v61  ;;  %10326 = vmatprep.mubr.msk.f32.mxu0 %vm11453_vm0, %v13406_v9 }
0x36b7   :  { %10987 = vmatprep.subr.bf16.mxu0 %v13404_v53  ;;  %10992 = vmatpush3.bf16.msra.mxu1 %v12919_v16 }
0x36b8   :  { %10993 = vmatprep.subr.bf16.mxu1 %v13404_v53  ;;  %10337 = vmatprep.mubr.msk.f32.mxu1 %vm11453_vm0, %v13406_v9 }
0x36ba   :  { %10989 = vmatpush3.bf16.msra.mxu0 %v12977_v5 }
0x36bb   :  { %10996 = vmatprep.subr.bf16.mxu0 %v13404_v53  ;;  %10995 = vmatpush3.bf16.msra.mxu1 %v12931_v40 }
0x36bc   :  { %11002 = vmatprep.subr.bf16.mxu1 %v13404_v53 }
0x36bd   :  { %10327 = vmatmul.mubr.msk.f32.vlgmr.msra.gmra.mrb[104].mxu0 %vm86_vm1, %v7022_v4 }
0x36be   :  { %10998 = vmatpush3.bf16.msra.mxu0 %v12953_v20  ;;  %10348 = vmatprep.mubr.msk.f32.mxu0 %vm11453_vm0, %v13406_v9 }
0x36bf   :  { %10999 = vmatprep.subr.bf16.mxu0 %v13404_v53 }
0x36c2   :  { %11001 = vmatpush3.bf16.msra.mxu0 %v12975_v6 }
0x36c3   :  { %11008 = vmatprep.subr.bf16.mxu0 %v13404_v53 }
0x3788   :  { %v7092_v8 = vpop.f32.mrb[102].mxu0  ;;  %v7162_v42 = vpop.f32.mrb[86].mxu1 }
0x3789   :  { %v7093_v21 = vadd.f32 %v13016_v57, %v7092_v8  ;;  %v10306_v32 = vpop.f32.mrb[103].mxu0  ;;  %v10317_v55 = vpop.f32.mrb[87].mxu1 }
0x378b   :  { %7237 = vrot.lane.b32.xlu1 %v7093_v21, %s11458_s26 }
0x3790   :  { %v7232_v17 = vpop.f32.mrb[104].mxu0 }
0x3791   :  { %v7233_v63 = vadd.f32 %v13023_v19, %v7232_v17  ;;  %v10328_v14 = vpop.f32.mrb[105].mxu0 }
0x3793   :  { %7255 = vrot.lane.b32.xlu0 %v7233_v63, %s11458_s26 }
0x37fd   :  { %v7238_v60 = vpop.permute.xlu1 %7237 }
0x37fe   :  { %v7240_v24 = vadd.f32 %v7238_v60, %v12842_v23  ;;  %v7163_v23 = vadd.f32 %v13051_v11, %v7162_v42 }
0x3800   :  { %v8923_v12 = vmul.f32 -1.442695, %v7240_v24  ;;  %v7247_v55 = vadd.f32 %v7163_v23, %v4401_v54 }
0x3802   :  { %11329 = vpow2.f32 %v8923_v12  ;;  %v8924_v17 = vmul.f32 -1.442695, %v7247_v55 }
0x3805   :  { %v7256_v30 = vpop.permute.xlu0 %7255 }
0x380c   :  { %v11330_v29 = vpop.eup %11329 }
0x380d   :  { %v7244_v35 = vadd.f32 1.0, %v11330_v29 }
0x380f   :  { %11331 = vrcp.f32 %v7244_v35 }
0x3819   :  { %v11332_v2 = vpop.eup %11331 }
0x381a   :  { %v7258_v39 = vmul.f32 %v11332_v2, %v7256_v30 }
0x381c   :  { %7260 = vrot.lane.b32.xlu1 %v7258_v39, %s11456_s17 }
0x388e   :  { %v7261_v8 = vpop.permute.xlu1 %7260 }
0x388f   :  { %v7263_v21 = vadd.f32 %v7261_v8, %v4401_v54 }
0x3891   :  { %11333 = vtanh.f32 %v7263_v21 }
0x3892   :  { %11335 = vpow2.f32 %v8924_v17 }
0x389b   :  { %v11334_v32 = vpop.eup %11333 }
0x389c   :  { %7267 = vrot.lane.b32.xlu0 %v11334_v32, %s11458_s26  ;;  %v11336_v63 = vpop.eup %11335 }
0x389d   :  { %v7251_v14 = vadd.f32 1.0, %v11336_v63 }
0x389f   :  { %11337 = vrcp.f32 %v7251_v14 }
0x38a9   :  { %v11338_v60 = vpop.eup %11337 }
0x38aa   :  { %v7265_v24 = vsub.f32 1.0, %v11338_v60  ;;  %v7271_v35 = vmul.f32 %v11338_v60, %v7022_v4 }
0x390e   :  { %v7268_v12 = vpop.permute.xlu0 %7267 }
0x390f   :  { %v7270_v29 = vmul.f32 %v7268_v12, %v7265_v24  ;;  %v4397_v12 = vadd.f32 %v12617_v1, %v13043_v48 }
0x3911   :  { %v7272_v43 = vadd.f32 %v7271_v35, %v7270_v29 }
0x3913   :  { %v7273_v2 = vsel %vm5975_vm2, %v7272_v43, %v7022_v4 }
0x3914   :  { %10338 = vmatmul.mubr.msk.f32.vlgmr.msra.gmra.mrb[88].mxu1 %vm86_vm1, %v7273_v2  ;;  %10349 = vmatmul.mubr.msk.f32.vlgmr.msra.gmra.mrb[106].mxu0 %vm86_vm1, %v7273_v2 }
0x3915   :  { %11004 = vmatpush3.bf16.msra.mxu1 %v12955_v61  ;;  %10359 = vmatprep.mubr.msk.f32.mxu1 %vm11453_vm0, %v13406_v9 }
0x3916   :  { %11005 = vmatprep.subr.bf16.mxu1 %v13404_v53  ;;  %11010 = vmatpush3.bf16.msra.mxu0 %v12919_v16 }
0x3917   :  { %11011 = vmatprep.subr.bf16.mxu0 %v13404_v53  ;;  %10370 = vmatprep.mubr.msk.f32.mxu0 %vm11453_vm0, %v13406_v9 }
0x3919   :  { %11007 = vmatpush3.bf16.msra.mxu1 %v12977_v5 }
0x391a   :  { %11014 = vmatprep.subr.bf16.mxu1 %v13404_v53  ;;  %11013 = vmatpush3.bf16.msra.mxu0 %v12931_v40 }
0x391b   :  { %11020 = vmatprep.subr.bf16.mxu0 %v13404_v53 }
0x391c   :  { %10360 = vmatmul.mubr.msk.f32.vlgmr.msra.gmra.mrb[90].mxu1 %vm86_vm1, %v7273_v2 }
0x391d   :  { %11016 = vmatpush3.bf16.msra.mxu1 %v12953_v20  ;;  %10381 = vmatprep.mubr.msk.f32.mxu1 %vm11453_vm0, %v13406_v9 }
0x391e   :  { %11017 = vmatprep.subr.bf16.mxu1 %v13404_v53 }
0x3921   :  { %11019 = vmatpush3.bf16.msra.mxu1 %v12975_v6 }
0x3922   :  { %11026 = vmatprep.subr.bf16.mxu1 %v13404_v53 }
0x39e7   :  { %v7343_v62 = vpop.f32.mrb[88].mxu1  ;;  %v7413_v4 = vpop.f32.mrb[106].mxu0 }
0x39e8   :  { %v7344_v42 = vadd.f32 %v13016_v57, %v7343_v62  ;;  %v10339_v30 = vpop.f32.mrb[89].mxu1  ;;  %v10350_v39 = vpop.f32.mrb[107].mxu0 }
0x39ea   :  { %7488 = vrot.lane.b32.xlu1 %v7344_v42, %s11458_s26 }
0x39ef   :  { %v7483_v54 = vpop.f32.mrb[90].mxu1 }
0x39f0   :  { %v7484_v8 = vadd.f32 %v13023_v19, %v7483_v54  ;;  %v10361_v21 = vpop.f32.mrb[91].mxu1 }
0x39f2   :  { %7506 = vrot.lane.b32.xlu0 %v7484_v8, %s11458_s26 }
0x3a5c   :  { %v7489_v32 = vpop.permute.xlu1 %7488 }
0x3a5d   :  { %v7491_v23 = vadd.f32 %v7489_v32, %v12795_v26  ;;  %v7414_v26 = vadd.f32 %v13051_v11, %v7413_v4 }
0x3a5f   :  { %v8928_v55 = vmul.f32 -1.442695, %v7491_v23  ;;  %v7498_v62 = vadd.f32 %v7414_v26, %v4397_v12 }
0x3a61   :  { %11339 = vpow2.f32 %v8928_v55  ;;  %v8929_v42 = vmul.f32 -1.442695, %v7498_v62 }
0x3a64   :  { %v7507_v60 = vpop.permute.xlu0 %7506 }
0x3a6b   :  { %v11340_v17 = vpop.eup %11339 }
0x3a6c   :  { %v7495_v63 = vadd.f32 1.0, %v11340_v17 }
0x3a6e   :  { %11341 = vrcp.f32 %v7495_v63 }
0x3a78   :  { %v11342_v14 = vpop.eup %11341 }
0x3a79   :  { %v7509_v24 = vmul.f32 %v11342_v14, %v7507_v60 }
0x3a7b   :  { %7511 = vrot.lane.b32.xlu1 %v7509_v24, %s11456_s17 }
0x3aed   :  { %v7512_v29 = vpop.permute.xlu1 %7511 }
0x3aee   :  { %v7514_v35 = vadd.f32 %v7512_v29, %v4397_v12 }
0x3af0   :  { %11343 = vtanh.f32 %v7514_v35 }
0x3af1   :  { %11345 = vpow2.f32 %v8929_v42 }
0x3afa   :  { %v11344_v43 = vpop.eup %11343 }
0x3afb   :  { %7518 = vrot.lane.b32.xlu0 %v11344_v43, %s11458_s26  ;;  %v11346_v30 = vpop.eup %11345 }
0x3afc   :  { %v7502_v39 = vadd.f32 1.0, %v11346_v30 }
0x3afe   :  { %11347 = vrcp.f32 %v7502_v39  ;;  %v4391_v39 = vadd.f32 %v12613_v58, %v13043_v48 }
0x3b08   :  { %v11348_v54 = vpop.eup %11347 }
0x3b09   :  { %v7516_v8 = vsub.f32 1.0, %v11348_v54  ;;  %v7522_v32 = vmul.f32 %v11348_v54, %v7273_v2 }
0x3b6d   :  { %v7519_v21 = vpop.permute.xlu0 %7518 }
0x3b6e   :  { %v7521_v23 = vmul.f32 %v7519_v21, %v7516_v8 }
0x3b70   :  { %v7523_v1 = vadd.f32 %v7522_v32, %v7521_v23 }
0x3b72   :  { %v7524_v55 = vsel %vm5721_vm14, %v7523_v1, %v7273_v2 }
0x3b73   :  { %10371 = vmatmul.mubr.msk.f32.vlgmr.msra.gmra.mrb[108].mxu0 %vm86_vm1, %v7524_v55  ;;  %10382 = vmatmul.mubr.msk.f32.vlgmr.msra.gmra.mrb[92].mxu1 %vm86_vm1, %v7524_v55 }
0x3b74   :  { %11022 = vmatpush3.bf16.msra.mxu0 %v12955_v61  ;;  %10392 = vmatprep.mubr.msk.f32.mxu0 %vm11453_vm0, %v13406_v9 }
0x3b75   :  { %11023 = vmatprep.subr.bf16.mxu0 %v13404_v53  ;;  %11028 = vmatpush3.bf16.msra.mxu1 %v12919_v16 }
0x3b76   :  { %11029 = vmatprep.subr.bf16.mxu1 %v13404_v53  ;;  %10403 = vmatprep.mubr.msk.f32.mxu1 %vm11453_vm0, %v13406_v9 }
0x3b78   :  { %11025 = vmatpush3.bf16.msra.mxu0 %v12977_v5 }
0x3b79   :  { %11032 = vmatprep.subr.bf16.mxu0 %v13404_v53  ;;  %11031 = vmatpush3.bf16.msra.mxu1 %v12931_v40 }
0x3b7a   :  { %11038 = vmatprep.subr.bf16.mxu1 %v13404_v53 }
0x3b7b   :  { %10393 = vmatmul.mubr.msk.f32.vlgmr.msra.gmra.mrb[110].mxu0 %vm86_vm1, %v7524_v55 }
0x3b7c   :  { %11034 = vmatpush3.bf16.msra.mxu0 %v12953_v20  ;;  %10414 = vmatprep.mubr.msk.f32.mxu0 %vm11453_vm0, %v13406_v9 }
0x3b7d   :  { %11035 = vmatprep.subr.bf16.mxu0 %v13404_v53 }
0x3b80   :  { %11037 = vmatpush3.bf16.msra.mxu0 %v12975_v6 }
0x3b81   :  { %11044 = vmatprep.subr.bf16.mxu0 %v13404_v53 }
0x3c46   :  { %v7594_v44 = vpop.f32.mrb[108].mxu0  ;;  %v7664_v2 = vpop.f32.mrb[92].mxu1 }
0x3c47   :  { %v7595_v4 = vadd.f32 %v13016_v57, %v7594_v44  ;;  %v10372_v17 = vpop.f32.mrb[109].mxu0  ;;  %v10383_v63 = vpop.f32.mrb[93].mxu1 }
0x3c49   :  { %7739 = vrot.lane.b32.xlu1 %v7595_v4, %s11458_s26 }
0x3c4e   :  { %v7734_v14 = vpop.f32.mrb[110].mxu0 }
0x3c4f   :  { %v7735_v60 = vadd.f32 %v13023_v19, %v7734_v14  ;;  %v10394_v24 = vpop.f32.mrb[111].mxu0 }
0x3c51   :  { %7757 = vrot.lane.b32.xlu0 %v7735_v60, %s11458_s26 }
0x3cbb   :  { %v7740_v12 = vpop.permute.xlu1 %7739 }
0x3cbc   :  { %v7742_v29 = vadd.f32 %v7740_v12, %v12748_v37  ;;  %v7665_v37 = vadd.f32 %v13051_v11, %v7664_v2 }
0x3cbe   :  { %v8933_v35 = vmul.f32 -1.442695, %v7742_v29  ;;  %v7749_v32 = vadd.f32 %v7665_v37, %v4391_v39 }
0x3cc0   :  { %11349 = vpow2.f32 %v8933_v35  ;;  %v8934_v23 = vmul.f32 -1.442695, %v7749_v32  ;;  %v4387_v32 = vadd.f32 %v12609_v33, %v13043_v48 }
0x3cc3   :  { %v7758_v42 = vpop.permute.xlu0 %7757 }
0x3cca   :  { %v11350_v43 = vpop.eup %11349 }
0x3ccb   :  { %v7746_v26 = vadd.f32 1.0, %v11350_v43 }
0x3ccd   :  { %11351 = vrcp.f32 %v7746_v26 }
0x3cd7   :  { %v11352_v62 = vpop.eup %11351 }
0x3cd8   :  { %v7760_v30 = vmul.f32 %v11352_v62, %v7758_v42 }
0x3cda   :  { %7762 = vrot.lane.b32.xlu1 %v7760_v30, %s11456_s17 }
0x3d4c   :  { %v7763_v54 = vpop.permute.xlu1 %7762 }
0x3d4d   :  { %v7765_v8 = vadd.f32 %v7763_v54, %v4391_v39 }
0x3d4f   :  { %11353 = vtanh.f32 %v7765_v8 }
0x3d50   :  { %11355 = vpow2.f32 %v8934_v23 }
0x3d59   :  { %v11354_v21 = vpop.eup %11353 }
0x3d5a   :  { %7769 = vrot.lane.b32.xlu0 %v11354_v21, %s11458_s26  ;;  %v11356_v1 = vpop.eup %11355 }
0x3d5b   :  { %v7753_v44 = vadd.f32 1.0, %v11356_v1 }
0x3d5d   :  { %11357 = vrcp.f32 %v7753_v44 }
0x3d67   :  { %v11358_v4 = vpop.eup %11357 }
0x3d68   :  { %v7767_v17 = vsub.f32 1.0, %v11358_v4  ;;  %v7773_v60 = vmul.f32 %v11358_v4, %v7524_v55 }
0x3dcc   :  { %v7770_v63 = vpop.permute.xlu0 %7769 }
0x3dcd   :  { %v7772_v14 = vmul.f32 %v7770_v63, %v7767_v17 }
0x3dcf   :  { %v7774_v58 = vadd.f32 %v7773_v60, %v7772_v14 }
0x3dd1   :  { %v7775_v24 = vsel %vm5467_vm12, %v7774_v58, %v7524_v55 }
0x3dd2   :  { %10404 = vmatmul.mubr.msk.f32.vlgmr.msra.gmra.mrb[94].mxu1 %vm86_vm1, %v7775_v24  ;;  %10415 = vmatmul.mubr.msk.f32.vlgmr.msra.gmra.mrb[112].mxu0 %vm86_vm1, %v7775_v24 }
0x3dd3   :  { %11040 = vmatpush3.bf16.msra.mxu1 %v12955_v61  ;;  %10425 = vmatprep.mubr.msk.f32.mxu1 %vm11453_vm0, %v13406_v9 }
0x3dd4   :  { %11041 = vmatprep.subr.bf16.mxu1 %v13404_v53  ;;  %11046 = vmatpush3.bf16.msra.mxu0 %v12919_v16 }
0x3dd5   :  { %11047 = vmatprep.subr.bf16.mxu0 %v13404_v53  ;;  %10436 = vmatprep.mubr.msk.f32.mxu0 %vm11453_vm0, %v13406_v9 }
0x3dd7   :  { %11043 = vmatpush3.bf16.msra.mxu1 %v12977_v5 }
0x3dd8   :  { %11050 = vmatprep.subr.bf16.mxu1 %v13404_v53  ;;  %11049 = vmatpush3.bf16.msra.mxu0 %v12931_v40 }
0x3dd9   :  { %11056 = vmatprep.subr.bf16.mxu0 %v13404_v53 }
0x3dda   :  { %10426 = vmatmul.mubr.msk.f32.vlgmr.msra.gmra.mrb[96].mxu1 %vm86_vm1, %v7775_v24 }
0x3ddb   :  { %11052 = vmatpush3.bf16.msra.mxu1 %v12953_v20  ;;  %10447 = vmatprep.mubr.msk.f32.mxu1 %vm11453_vm0, %v13406_v9 }
0x3ddc   :  { %11053 = vmatprep.subr.bf16.mxu1 %v13404_v53 }
0x3ddf   :  { %11055 = vmatpush3.bf16.msra.mxu1 %v12975_v6 }
0x3de0   :  { %11062 = vmatprep.subr.bf16.mxu1 %v13404_v53 }
0x3ea5   :  { %v7845_v18 = vpop.f32.mrb[94].mxu1  ;;  %v7915_v55 = vpop.f32.mrb[112].mxu0 }
0x3ea6   :  { %v7846_v2 = vadd.f32 %v13016_v57, %v7845_v18  ;;  %v10405_v12 = vpop.f32.mrb[95].mxu1  ;;  %v10416_v29 = vpop.f32.mrb[113].mxu0 }
0x3ea8   :  { %7990 = vrot.lane.b32.xlu1 %v7846_v2, %s11458_s26 }
0x3ead   :  { %v7985_v35 = vpop.f32.mrb[96].mxu1 }
0x3eae   :  { %v7986_v43 = vadd.f32 %v13023_v19, %v7985_v35  ;;  %v10427_v26 = vpop.f32.mrb[97].mxu1 }
0x3eb0   :  { %8008 = vrot.lane.b32.xlu0 %v7986_v43, %s11458_s26 }
0x3f1a   :  { %v7991_v62 = vpop.permute.xlu1 %7990 }
0x3f1b   :  { %v7993_v42 = vadd.f32 %v7991_v62, %v12701_v28  ;;  %v7916_v28 = vadd.f32 %v13051_v11, %v7915_v55 }
0x3f1d   :  { %v8938_v30 = vmul.f32 -1.442695, %v7993_v42  ;;  %v8000_v4 = vadd.f32 %v7916_v28, %v4387_v32 }
0x3f1f   :  { %11359 = vpow2.f32 %v8938_v30  ;;  %v8939_v17 = vmul.f32 -1.442695, %v8000_v4 }
0x3f22   :  { %v8009_v21 = vpop.permute.xlu0 %8008 }
0x3f29   :  { %v11360_v39 = vpop.eup %11359 }
0x3f2a   :  { %v7997_v54 = vadd.f32 1.0, %v11360_v39 }
0x3f2c   :  { %11361 = vrcp.f32 %v7997_v54 }
0x3f36   :  { %v11362_v8 = vpop.eup %11361 }
0x3f37   :  { %v8011_v37 = vmul.f32 %v11362_v8, %v8009_v21  ;;  %v4381_v21 = vadd.f32 %v12537_v34, %v13043_v48  ;;  %v11424_v34 = vld [vmem:[%s13387_s8 + $0x1] ss:$0 sm:$0xff] }
0x3f39   :  { %8013 = vrot.lane.b32.xlu1 %v8011_v37, %s11456_s17 }
0x3fab   :  { %v8014_v23 = vpop.permute.xlu1 %8013 }
0x3fac   :  { %v8016_v1 = vadd.f32 %v8014_v23, %v4387_v32 }
0x3fae   :  { %11363 = vtanh.f32 %v8016_v1 }
0x3faf   :  { %11365 = vpow2.f32 %v8939_v17 }
0x3fb8   :  { %v11364_v44 = vpop.eup %11363 }
0x3fb9   :  { %8020 = vrot.lane.b32.xlu0 %v11364_v44, %s11458_s26  ;;  %v11366_v63 = vpop.eup %11365  ;;  %v2135_v44 = vadd.f32 %v11424_v34, %v12132_v50 }
0x3fba   :  { %v8004_v14 = vadd.f32 1.0, %v11366_v63 }
0x3fbc   :  { %11367 = vrcp.f32 %v8004_v14 }
0x3fc6   :  { %v11368_v60 = vpop.eup %11367 }
0x3fc7   :  { %v8018_v58 = vsub.f32 1.0, %v11368_v60  ;;  %v8024_v2 = vmul.f32 %v11368_v60, %v7775_v24 }
0x402b   :  { %v8021_v18 = vpop.permute.xlu0 %8020 }
0x402c   :  { %v8023_v12 = vmul.f32 %v8021_v18, %v8018_v58 }
0x402e   :  { %v8025_v33 = vadd.f32 %v8024_v2, %v8023_v12 }
0x4030   :  { %v13224_v29 = vsel %vm5213_vm10, %v8025_v33, %v7775_v24 }
0x4031   :  { %10437 = vmatmul.mubr.msk.f32.vlgmr.msra.gmra.mrb[114].mxu0 %vm86_vm1, %v13224_v29  ;;  %10448 = vmatmul.mubr.msk.f32.vlgmr.msra.gmra.mrb[98].mxu1 %vm86_vm1, %v13224_v29 }
0x4032   :  { %11058 = vmatpush3.bf16.msra.mxu0 %v12955_v61  ;;  %10458 = vmatprep.mubr.msk.f32.mxu0 %vm11453_vm0, %v13406_v9 }
0x4033   :  { %11059 = vmatprep.subr.bf16.mxu0 %v13404_v53  ;;  %11064 = vmatpush3.bf16.msra.mxu1 %v12919_v16 }
0x4034   :  { %11065 = vmatprep.subr.bf16.mxu1 %v13404_v53  ;;  %10469 = vmatprep.mubr.msk.f32.mxu1 %vm11453_vm0, %v13406_v9 }
0x4036   :  { %11061 = vmatpush3.bf16.msra.mxu0 %v12977_v5 }
0x4037   :  { %11068 = vmatprep.subr.bf16.mxu0 %v13404_v53  ;;  %11067 = vmatpush3.bf16.msra.mxu1 %v12931_v40 }
0x4038   :  { %11074 = vmatprep.subr.bf16.mxu1 %v13404_v53 }
0x4039   :  { %10459 = vmatmul.mubr.msk.f32.vlgmr.msra.gmra.mrb[116].mxu0 %vm86_vm1, %v13224_v29 }
0x403a   :  { %11070 = vmatpush3.bf16.msra.mxu0 %v12953_v20  ;;  %10480 = vmatprep.mubr.msk.f32.mxu0 %vm11453_vm0, %v13406_v9 }
0x403b   :  { %11071 = vmatprep.subr.bf16.mxu0 %v13404_v53 }
0x403e   :  { %11073 = vmatpush3.bf16.msra.mxu0 %v12975_v6 }
0x403f   :  { %10499 = vmatprep.subr.mxu0 %v13406_v9 }
0x4104   :  { %v8096_v41 = vpop.f32.mrb[114].mxu0  ;;  %v8166_v16 = vpop.f32.mrb[98].mxu1 }
0x4105   :  { %v8097_v40 = vadd.f32 %v13016_v57, %v8096_v41  ;;  %v10438_v24 = vpop.f32.mrb[115].mxu0  ;;  %v10449_v55 = vpop.f32.mrb[99].mxu1  ;;  %v8167_v28 = vadd.f32 %v13051_v11, %v8166_v16  ;;  %v11425_v41 = vld [vmem:[%s13387_s8 + $0x5] ss:$0 sm:$0xff] }
0x4107   :  { %8241 = vrot.lane.b32.xlu1 %v8097_v40, %s11458_s26  ;;  %v8251_v4 = vadd.f32 %v8167_v28, %v4381_v21 }
0x410c   :  { %v8236_v35 = vpop.f32.mrb[116].mxu0 }
0x410d   :  { %v8237_v20 = vadd.f32 %v13023_v19, %v8236_v35  ;;  %v10460_v43 = vpop.f32.mrb[117].mxu0 }
0x410f   :  { %8259 = vrot.lane.b32.xlu0 %v8237_v20, %s11458_s26 }
0x4179   :  { %v8242_v26 = vpop.permute.xlu1 %8241 }
0x417a   :  { %v8244_v62 = vadd.f32 %v8242_v26, %v12654_v27  ;;  %v11423_v27 = vld [vmem:[%s13387_s8 + $0x3] ss:$0 sm:$0xff] }
0x417b   :  { %v4110_v1 = vadd.f32 %v11423_v27, %v12520_v46  ;;  %v8944_v46 = vmul.f32 -1.442695, %v8251_v4 }
0x417c   :  { %v8943_v6 = vmul.f32 -1.442695, %v8244_v62 }
0x417e   :  { %11369 = vpow2.f32 %v8943_v6 }
0x4181   :  { %v8260_v54 = vpop.permute.xlu0 %8259 }
0x4188   :  { %v11370_v42 = vpop.eup %11369 }
0x4189   :  { %v8248_v30 = vadd.f32 1.0, %v11370_v42 }
0x418b   :  { %11371 = vrcp.f32 %v8248_v30 }
0x4195   :  { %v11372_v39 = vpop.eup %11371 }
0x4196   :  { %v8262_v8 = vmul.f32 %v11372_v39, %v8260_v54 }
0x4198   :  { %8264 = vrot.lane.b32.xlu1 %v8262_v8, %s11456_s17 }
0x420a   :  { %v8265_v37 = vpop.permute.xlu1 %8264 }
0x420b   :  { %v8267_v32 = vadd.f32 %v8265_v37, %v4381_v21 }
0x420d   :  { %11373 = vtanh.f32 %v8267_v32 }
0x420e   :  { %11375 = vpow2.f32 %v8944_v46 }
0x4217   :  { %v11374_v23 = vpop.eup %11373 }
0x4218   :  { %8271 = vrot.lane.b32.xlu0 %v11374_v23, %s11458_s26  ;;  %v11376_v17 = vpop.eup %11375 }
0x4219   :  { %v8255_v63 = vadd.f32 1.0, %v11376_v17  ;;  %v136_v17 = vadd.f32 %v11678_v49, %v12173_v56 }
0x421b   :  { %11377 = vrcp.f32 %v8255_v63 }
0x421c   :  { %4254 = vrot.lane.b32.xlu0 %v4110_v1, %s11458_s26 }
0x4220   :  { %6466 = vrot.lane.b32.xlu0 %v13034_v38, %s11456_s17 }
0x4224   :  { %2228 = vrot.lane.b32.xlu0 %v12163_v10, %s11456_s17 }
0x4225   :  { %v11378_v38 = vpop.eup %11377 }
0x4226   :  { %v8269_v14 = vsub.f32 1.0, %v11378_v38  ;;  %v8275_v58 = vmul.f32 %v11378_v38, %v13224_v29 }
0x4228   :  { %2216 = vrot.lane.b32.xlu0 %v2135_v44, %s11457_s18 }
0x428a   :  { %v8272_v60 = vpop.permute.xlu0 %8271 }
0x428b   :  { %v8274_v10 = vmul.f32 %v8272_v60, %v8269_v14 }
0x428d   :  { %v8276_v18 = vadd.f32 %v8275_v58, %v8274_v10 }
0x428f   :  { %v13278_v50 = vsel %vm4959_vm8, %v8276_v18, %v13224_v29 }
0x4290   :  { %10470 = vmatmul.mubr.msk.f32.vlgmr.msra.gmra.mrb[100].mxu1 %vm86_vm1, %v13278_v50  ;;  %10481 = vmatmul.mubr.msk.f32.vlgmr.msra.gmra.mrb[118].mxu0 %vm86_vm1, %v13278_v50 }
0x4291   :  { %11076 = vmatpush3.bf16.msra.mxu1 %v12955_v61  ;;  %10491 = vmatprep.mubr.msk.f32.mxu1 %vm11453_vm0, %v13406_v9 }
0x4292   :  { %11077 = vmatprep.subr.bf16.mxu1 %v13404_v53  ;;  %10501 = vmatprep.mubr.msk.f32.mxu0 %vm11453_vm0, %v13406_v9 }
0x4295   :  { %11079 = vmatpush3.bf16.msra.mxu1 %v12977_v5 }
0x4296   :  { %10494 = vmatprep.subr.mxu1 %v13406_v9 }
0x4298   :  { %10492 = vmatmul.mubr.msk.f32.vlgmr.msra.gmra.mrb[102].mxu1 %vm86_vm1, %v13278_v50 }
0x4299   :  { %10496 = vmatprep.mubr.msk.f32.mxu1 %vm11453_vm0, %v13406_v9  ;;  %v4250_v9 = vadd.f32 %v11425_v41, %v12524_v13 }
0x4363   :  { %v8347_v7 = vpop.f32.mrb[100].mxu1  ;;  %v13296_v61 = vpop.f32.mrb[118].mxu0 }
0x4364   :  { %v8348_v2 = vadd.f32 %v13016_v57, %v8347_v7  ;;  %v10471_v12 = vpop.f32.mrb[101].mxu1  ;;  %v10482_v53 = vpop.f32.mrb[119].mxu0  ;;  %v11426_v57 = vld [vmem:[%s13391_s12 + $0x1] ss:$0 sm:$0xff] }
0x4365   :  { %v6373_v16 = vadd.f32 %v11426_v57, %v13003_v51  ;;  %v4377_v12 = vadd.f32 %v12529_v52, %v13043_v48  ;;  %v8418_v48 = vadd.f32 %v13051_v11, %v13296_v61 }
0x4366   :  { %8492 = vrot.lane.b32.xlu1 %v8348_v2, %s11458_s26 }
0x436b   :  { %v8487_v33 = vpop.f32.mrb[102].mxu1 }
0x436c   :  { %v8488_v5 = vadd.f32 %v13023_v19, %v8487_v33  ;;  %v10493_v29 = vpop.f32.mrb[103].mxu1  ;;  %v4255_v19 = vpop.permute.xlu0 %4254 }
0x436d   :  { %v4257_v40 = vadd.f32 %v4255_v19, %v11676_v47 }
0x436e   :  { %8510 = vrot.lane.b32.xlu1 %v8488_v5, %s11458_s26 }
0x436f   :  { %v8839_v24 = vmul.f32 -1.442695, %v4257_v40  ;;  %v8502_v40 = vadd.f32 %v8418_v48, %v4377_v12 }
0x4370   :  { %v6467_v35 = vpop.permute.xlu0 %6466 }
0x4371   :  { %11379 = vpow2.f32 %v8839_v24 }
0x4372   :  { %4272 = vrot.lane.b32.xlu1 %v4250_v9, %s11458_s26 }
0x4374   :  { %v2229_v13 = vpop.permute.xlu0 %2228 }
0x4375   :  { %v2231_v6 = vadd.f32 %v2229_v13, %v12136_v15 }
0x4376   :  { %6454 = vrot.lane.b32.xlu1 %v6373_v16, %s11457_s18 }
0x4378   :  { %v2217_v23 = vpop.permute.xlu0 %2216 }
0x4379   :  { %v2219_v27 = vadd.f32 %v2217_v23, %v12136_v15 }
0x437b   :  { %v11380_v55 = vpop.eup %11379  ;;  %v8785_v1 = vmul.f32 -1.442695, %v2219_v27 }
0x437c   :  { %v4261_v20 = vadd.f32 1.0, %v11380_v55  ;;  %v8949_v55 = vmul.f32 -1.442695, %v8502_v40 }
0x437e   :  { %11381 = vrcp.f32 %v4261_v20 }
0x4388   :  { %v11382_v42 = vpop.eup %11381 }
0x43d8   :  { %v8493_v43 = vpop.permute.xlu1 %8492 }
0x43d9   :  { %v8495_v26 = vadd.f32 %v8493_v43, %v12545_v22  ;;  %v6469_v22 = vadd.f32 %v6467_v35, %v13007_v45 }
0x43db   :  { %v8948_v62 = vmul.f32 -1.442695, %v8495_v26 }
0x43dd   :  { %11383 = vpow2.f32 %v8948_v62 }
0x43de   :  { %11385 = vtanh.f32 %v2231_v6 }
0x43e0   :  { %v8511_v51 = vpop.permute.xlu1 %8510 }
0x43e4   :  { %v4273_v30 = vpop.permute.xlu1 %4272 }
0x43e5   :  { %v4275_v39 = vmul.f32 %v11382_v42, %v4273_v30 }
0x43e7   :  { %v11384_v47 = vpop.eup %11383  ;;  %4277 = vrot.lane.b32.xlu0 %v4275_v39, %s11456_s17 }
0x43e8   :  { %v8499_v54 = vadd.f32 1.0, %v11384_v47  ;;  %v11386_v8 = vpop.eup %11385  ;;  %v6455_v34 = vpop.permute.xlu1 %6454 }
0x43e9   :  { %v6457_v44 = vadd.f32 %v6455_v34, %v13007_v45 }
0x43ea   :  { %11387 = vrcp.f32 %v8499_v54 }
0x43eb   :  { %2235 = vrot.lane.b32.xlu0 %v11386_v8, %s11458_s26  ;;  %11389 = vtanh.f32 %v6469_v22  ;;  %v8894_v4 = vmul.f32 -1.442695, %v6457_v44 }
0x43ec   :  { %11391 = vpow2.f32 %v8785_v1 }
0x43ed   :  { %11393 = vpow2.f32 %v8894_v4 }
0x43f4   :  { %v11388_v21 = vpop.eup %11387 }
0x43f5   :  { %v8513_v37 = vmul.f32 %v11388_v21, %v8511_v51  ;;  %v11390_v32 = vpop.eup %11389 }
0x43f6   :  { %v11392_v28 = vpop.eup %11391 }
0x43f7   :  { %8515 = vrot.lane.b32.xlu1 %v8513_v37, %s11456_s17  ;;  %v2223_v46 = vadd.f32 1.0, %v11392_v28  ;;  %v11394_v14 = vpop.eup %11393 }
0x43f8   :  { %v6461_v10 = vadd.f32 1.0, %v11394_v14 }
0x43f9   :  { %11395 = vrcp.f32 %v2223_v46 }
0x43fb   :  { %6473 = vrot.lane.b32.xlu1 %v11390_v32, %s11458_s26  ;;  %v13409_v32 = vlaneseq }
0x43fd   :  { %v8686_v23 = vand.u32 127, %v13409_v32 }
0x43ff   :  { %vm8687_vm0 = vcmp.lt.s32.totalorder %v8686_v23, 6 }
0x4403   :  { %v11396_v60 = vpop.eup %11395 }
0x4404   :  { %v2233_v58 = vsub.f32 1.0, %v11396_v60  ;;  %v2239_v45 = vmul.f32 %v11396_v60, %v12038_v31 }
0x4459   :  { %v4278_v63 = vpop.permute.xlu0 %4277 }
0x445a   :  { %v4280_v38 = vadd.f32 %v4278_v63, %v136_v17 }
0x445c   :  { %11397 = vtanh.f32 %v4280_v38 }
0x445d   :  { %v2236_v15 = vpop.permute.xlu0 %2235  ;;  %11399 = vrcp.f32 %v6461_v10 }
0x445e   :  { %v2238_v18 = vmul.f32 %v2236_v15, %v2233_v58  ;;  %v8705_v15 = vstv %s13383_s4  ;;  %s11428_s4 = scalar_lea.vmem %s8723_s15, 16 }
0x445f   :  { %p11429_p0 = scmp.ne.s32.totalorder %s8723_s15, %s11428_s4  ;;  %p11434_p2 = scmp.lt.s32.totalorder %s11432_s16, %s11428_s4 }
0x4460   :  { %v2240_v2 = vadd.f32 %v2239_v45, %v2238_v18 }
0x4461   :  { %p11435_p3 = por %p11434_p2, %p11433_p1 }
0x4462   :  { %v2246_v53 = vsel %vm2245_vm4, %v2240_v2, %v12038_v31  ;;  %v11427_v31 = vld [vmem:[%s13387_s8 + $0x4] ss:$0 sm:$0xff]  ;;  %vm8689_vm4 = vcmask 57344  }
0x4463   :  { %v4180_v0 = vadd.f32 %v11427_v31, %v12522_v36  ;;  %p11436_p4 = pnand %p11435_p3, %p11429_p0 }
0x4465   :  { %v4264_v19 = vadd.f32 %v4180_v0, %v136_v17 }
0x4466   :  { %v11398_v7 = vpop.eup %11397 }
0x4467   :  { %4284 = vrot.lane.b32.xlu0 %v11398_v7, %s11458_s26  ;;  %v11400_v33 = vpop.eup %11399  ;;  %v8840_v24 = vmul.f32 -1.442695, %v4264_v19 }
0x4468   :  { %v6471_v29 = vsub.f32 1.0, %v11400_v33  ;;  %v6477_v9 = vmul.f32 %v11400_v33, %v12909_v3 }
0x4469   :  { %v8516_v49 = vpop.permute.xlu1 %8515 }
0x446a   :  { %v8518_v56 = vadd.f32 %v8516_v49, %v4377_v12 }
0x446b   :  { %8606 = vrot.lane.b32.xlu0 %v2246_v53, %s11458_s26 }
0x446c   :  { %11401 = vtanh.f32 %v8518_v56 }
0x446d   :  { %v6474_v5 = vpop.permute.xlu1 %6473  ;;  %11403 = vpow2.f32 %v8840_v24 }
0x446e   :  { %v6476_v41 = vmul.f32 %v6474_v5, %v6471_v29  ;;  %11405 = vpow2.f32 %v8949_v55 }
0x4470   :  { %v6478_v16 = vadd.f32 %v6477_v9, %v6476_v41 }
0x4472   :  { %v6484_v52 = vsel %vm6483_vm11, %v6478_v16, %v12909_v3 }
0x4476   :  { %v11402_v57 = vpop.eup %11401 }
0x4477   :  { %8522 = vrot.lane.b32.xlu1 %v11402_v57, %s11458_s26  ;;  %v11404_v35 = vpop.eup %11403 }
0x4478   :  { %v11406_v59 = vpop.eup %11405  ;;  %v4268_v3 = vadd.f32 1.0, %v11404_v35 }
0x4479   :  { %v8506_v20 = vadd.f32 1.0, %v11406_v59 }
0x447a   :  { %11407 = vrcp.f32 %v4268_v3 }
0x447b   :  { %8609 = vrot.lane.b32.xlu1 %v6484_v52, %s11458_s26  ;;  %11409 = vrcp.f32 %v8506_v20 }
0x4484   :  { %v11408_v43 = vpop.eup %11407 }
0x4485   :  { %v11410_v13 = vpop.eup %11409  ;;  %v4282_v62 = vsub.f32 1.0, %v11408_v43  ;;  %v4288_v42 = vmul.f32 %v11408_v43, %v12417_v25 }
0x4486   :  { %v8520_v36 = vsub.f32 1.0, %v11410_v13  ;;  %v8526_v11 = vmul.f32 %v11410_v13, %v13278_v50 }
0x44d9   :  { %v4285_v26 = vpop.permute.xlu0 %4284 }
0x44da   :  { %v4287_v6 = vmul.f32 %v4285_v26, %v4282_v62 }
0x44dc   :  { %v4289_v39 = vadd.f32 %v4288_v42, %v4287_v6 }
0x44dd   :  { %v8607_v22 = vpop.permute.xlu0 %8606 }
0x44de   :  { %v4290_v37 = vsel %vm467_vm3, %v4289_v39, %v12417_v25  ;;  %vm8712_vm3 = vcmask 0  }
0x44e9   :  { %v8523_v51 = vpop.permute.xlu1 %8522 }
0x44ea   :  { %v8525_v61 = vmul.f32 %v8523_v51, %v8520_v36 }
0x44ec   :  { %v8527_v30 = vadd.f32 %v8526_v11, %v8525_v61 }
0x44ed   :  { %v8610_v47 = vpop.permute.xlu1 %8609 }
0x44ee   :  { %10500 = vmatpush3.xpose.msk.msra.mxu0 %vm86_vm1, %v8610_v47  ;;  %v8528_v8 = vsel %vm4705_vm6, %v8527_v30, %v13278_v50 }
0x44ef   :  { %10495 = vmatpush3.xpose.msk.msra.mxu1 %vm86_vm1, %v8528_v8 }
0x44f1   :  { %10502 = vmatmul.mubr.msk.f32.vlgmr.msra.gmra.mrb[120].mxu0 %vm86_vm1, %v8607_v22 }
0x44f2   :  { %10497 = vmatmul.mubr.msk.f32.vlgmr.msra.gmra.mrb[104].mxu1 %vm86_vm1, %v4290_v37  ;;  %vm8706_vm1 = vcmp.eq.s32.totalorder %v8686_v23, %v8705_v15 }
0x45c4   :  { %v8681_v27 = vpop.f32.mrb[120].mxu0 }
0x45c5   :  { %v8601_v1 = vpop.f32.mrb[104].mxu1  ;;  %v10503_v34 = vpop.f32.mrb[121].mxu0 }
0x45c6   :  { %v8682_v44 = vadd.f32 %v8681_v27, %v8601_v1  ;;  %v10498_v28 = vpop.f32.mrb[105].mxu1 }
0x45c8   :  { %v8688_v50 = vsel %vm8687_vm0, %v8682_v44, -1e+30 }
0x45c9   :  { %v8690_v4 = vsel %vm8689_vm4, %v8688_v50, -inf }
0x45ca   :  { %8691 = vmax.xlane.f32.xlu1 %v8690_v4 }
0x4657   :  { %v8692_v46 = vpop.xlane.xlu1 %8691 }
0x4658   :  { %v8693_v17 = vsub.f32 %v8688_v50, %v8692_v46 }
0x465a   :  { %v8694_v63 = vmul.f32 1.442695, %v8693_v17 }
0x465c   :  { %11411 = vpow2.f32 %v8694_v63 }
0x4666   :  { %v11412_v25 = vpop.eup %11411 }
0x4667   :  { %v8696_v38 = vsel %vm8689_vm4, %v11412_v25, 0.0 }
0x4668   :  { %8697 = vadd.xlane.f32.xlu0 %v8696_v38 }
0x46f5   :  { %v8698_v14 = vpop.xlane.xlu0 %8697 }
0x46f6   :  { %11413 = vlog2.f32 %v8698_v14 }
0x4700   :  { %v11414_v60 = vpop.eup %11413 }
0x4701   :  { %v8700_v10 = vmul.f32 0.6931472, %v11414_v60 }
0x4703   :  { %v8701_v58 = vadd.f32 %v8700_v10, %v8692_v46 }
0x4705   :  { %v8702_v18 = vsub.f32 %v8688_v50, %v8701_v58 }
0x4707   :  { %v8707_v45 = vsel %vm8706_vm1, %v8702_v18, 0.0  ;;  %8703 = vst.msk [vmem:[%s13392_s13] sm:$0x1] %vm8689_vm4, %v8702_v18 }
0x4708   :  { %v8708_v7 = vsel %vm8689_vm4, %v8707_v45, 0.0 }
0x4709   :  { %8709 = vadd.xlane.f32.xlu0 %v8708_v7 }
0x4796   :  { %v8710_v2 = vpop.xlane.xlu0 %8709 }
0x4797   :  { %v8711_v12 = vsub.f32 0.0, %v8710_v2 }
0x4799   :  { %8713 = vst.msk [vmem:[#allocation3] sm:$0x1] %vm8712_vm3, %v8711_v12 }
0x479a   :  { %11439 = shalt.err (!%p11436_p4)
}
0x479b   :  { %s11440_s19 = scalar_lea.hbm %s13393_s14, 16 }
0x479c   :  { %p11441_p5 = scmp.ne.s32.totalorder %s13393_s14, %s11440_s19  ;;  %p11444_p6 = scmp.lt.u32.totalorder %s11440_s19, %s13393_s14 }
0x479e   :  { %p11446_p7 = pnand %p11444_p6, %p11441_p5 }
0x47a0   :  { %11449 = shalt.err (!%p11446_p7)
}
0x47a1   :  { %8725 = dma.vmem_to_hbm [thread:$0]  %s8723_s15, 16, %s13393_s14, [#allocation4]  }
0x47a2   :  { %11450 = dma.done.wait [#allocation4], 16  }
0x47a3   :  { %11451 = vsyncadd [#allocation4], 4294967280 }
0x47a4   :  { %8731 = vsyncpa [#allocation4], 1 }

</bundles_post_ra>
